<compile_context>
chip_gen: v7x
topology: tpu7x:2x2x1
jax: 0.10.0
libtpu: 0.0.40
codegen_flags: <defaults>
</compile_context>

<pallas_src>
import jax
import jax.numpy as jnp
from jax.experimental import pallas as pl
from jax.experimental.pallas import tpu as pltpu

H = 64            # logical hidden size (nn.LSTM(hidden_size=64))
HP = 128          # lane-padded hidden size (each gate block = one full 128-lane vreg)
GP = 4 * HP       # padded gate width (i, f, g, o blocks of 128 lanes each)


def pack_params(params):
    """One-time packing of PyTorch-style params into the padded / fused / bf16 kernel layout.

    Gate order stays (i, f, g, o); each 64-wide gate block starts a 128-lane block and is
    zero-padded.  Layer-1 recurrent, layer-2 input and layer-2 recurrent weights are stacked
    into one (2*HP, 2*GP) matrix so the per-step recurrent work is a single MXU matmul on the
    concatenated [h1 | h2] state.  Call this ONCE (outside the jitted forward) and reuse.
    """
    wih1_t, whh1_t, b1, wih2_t, whh2_t, b2, wfc_t, bfc = params

    def pad_gate_cols(w):   # (K, 4H) -> (K, GP)
        blocks = [jnp.pad(w[:, k * H:(k + 1) * H], ((0, 0), (0, HP - H)))
                  for k in range(4)]
        return jnp.concatenate(blocks, axis=1)

    def pad_rows(w):        # (H, N) -> (HP, N); padded h lanes are always 0 anyway
        return jnp.pad(w, ((0, HP - H), (0, 0)))

    wih1_p = pad_gate_cols(wih1_t).astype(jnp.bfloat16)            # (F, GP)
    whh1_p = pad_rows(pad_gate_cols(whh1_t))                       # (HP, GP)
    wih2_p = pad_rows(pad_gate_cols(wih2_t))                       # (HP, GP)
    whh2_p = pad_rows(pad_gate_cols(whh2_t))                       # (HP, GP)
    # Fused recurrent weight: [h1 | h2] @ [[whh1, wih2], [0, whh2]]
    top = jnp.concatenate([whh1_p, wih2_p], axis=1)                # (HP, 2*GP)
    bot = jnp.concatenate([jnp.zeros((HP, GP), jnp.float32), whh2_p], axis=1)
    wbig = jnp.concatenate([top, bot], axis=0).astype(jnp.bfloat16)  # (2*HP, 2*GP)

    b1_p = pad_gate_cols(b1)                                       # (1, GP) f32
    b2_p = pad_gate_cols(b2)                                       # (1, GP) f32
    wfc_row = jnp.pad(wfc_t[:, 0][None, :], ((0, 0), (0, HP - H)))  # (1, HP) f32
    return wih1_p, b1_p, wbig, b2_p, wfc_row, bfc


def net_forward(x, packed):
    """x: (B, T, F) float32, packed = pack_params(...).  Returns (B, 1) f32 (eval-mode Net.forward)."""
    B, T, F = x.shape
    wih1_p, b1_p, wbig, b2_p, wfc_row, bfc = packed
    # Time-major, flattened, bf16 for the MXU: the non-recurrent projection is one batched matmul.
    x2d = jnp.transpose(x, (1, 0, 2)).reshape(T * B, F).astype(jnp.bfloat16)

    def kernel(x_ref, wih1_ref, b1_ref, wbig_hbm, b2_ref, wfc_ref, bfc_ref,
               out_ref, wbig_vmem, precomp_ref, dma_sem):
        # Kick off the fused recurrent-weight DMA (HBM -> VMEM) immediately; it overlaps with the
        # hoisted input projection and step-0's layer-1 cell below.
        wcopy = pltpu.make_async_copy(wbig_hbm, wbig_vmem, dma_sem)
        wcopy.start()

        # Hoisted, non-recurrent: all T timesteps through W_ih1 at once (M = T*B rows), with
        # b_ih1 + b_hh1 folded in.  Staged in a VMEM scratch, not kept as a live value.
        precomp_ref[...] = jnp.dot(x_ref[...], wih1_ref[...],
                                   preferred_element_type=jnp.float32) + b1_ref[...]

        b2b = jnp.broadcast_to(b2_ref[...], (B, GP))   # bias broadcast hoisted out of the loop

        h1 = jnp.zeros((B, HP), jnp.float32)
        c1 = jnp.zeros((B, HP), jnp.float32)
        h2 = jnp.zeros((B, HP), jnp.float32)
        c2 = jnp.zeros((B, HP), jnp.float32)
        rec1 = jnp.zeros((B, GP), jnp.float32)         # h1(t-1) @ W_hh1, from the fused matmul

        def cell_update(gates, c):
            # PyTorch gate order i, f, g, o; every slice is 128-lane aligned.
            i = jax.nn.sigmoid(gates[:, 0:HP])
            f = jax.nn.sigmoid(gates[:, HP:2 * HP])
            g = jnp.tanh(gates[:, 2 * HP:3 * HP])
            o = jax.nn.sigmoid(gates[:, 3 * HP:4 * HP])
            c_new = f * c + i * g            # padded lanes: 0.5*0 + 0.5*0 = 0 (stay zero)
            h_new = o * jnp.tanh(c_new)      # padded lanes: 0.5*tanh(0)   = 0
            return h_new, c_new

        # Fully unrolled recurrence (T is a small static constant).
        for t in range(T):
            gates1 = precomp_ref[pl.ds(t * B, B), :] + rec1   # at t=0, rec1 == 0
            h1, c1 = cell_update(gates1, c1)

            if t == 0:
                # Weights must be resident for the first fused matmul; the precomp matmul and
                # step-0's layer-1 cell ran entirely under the DMA.
                wcopy.wait()

            # TODO(synk): inter-layer dropout (p=0.3) and self.dropout are training-only;
            # inference (identity) semantics are implemented here.

            # ONE fused MXU matmul per step: [h1(t) | h2(t-1)] @ [[Whh1, Wih2], [0, Whh2]].
            hcat = jnp.concatenate([h1, h2], axis=-1).astype(jnp.bfloat16)      # (B, 2*HP)
            big = jnp.dot(hcat, wbig_vmem[...],
                          preferred_element_type=jnp.float32)                    # (B, 2*GP)
            rec1 = big[:, 0:GP]                       # recurrent part of gates1(t+1)
            gates2 = big[:, GP:2 * GP] + b2b
            h2, c2 = cell_update(gates2, c2)

        # fc(out[:, -1, :]) + ReLU.  N=1 matmul replaced by VPU multiply + lane reduction.
        y = jnp.sum(h2 * wfc_ref[...], axis=-1, keepdims=True) + bfc_ref[...]
        out_ref[...] = jnp.maximum(y, 0.0)

    vmem = pl.BlockSpec(memory_space=pltpu.MemorySpace.VMEM)
    out = pl.pallas_call(
        kernel,
        out_shape=jax.ShapeDtypeStruct((B, 1), jnp.float32),
        in_specs=[vmem,                                   # x2d
                  vmem,                                   # wih1_p
                  vmem,                                   # b1_p
                  pl.BlockSpec(memory_space=pl.ANY),      # wbig: stays in HBM, manual DMA
                  vmem,                                   # b2_p
                  vmem,                                   # wfc_row
                  vmem],                                  # bfc
        out_specs=vmem,
        scratch_shapes=[
            pltpu.VMEM((2 * HP, 2 * GP), jnp.bfloat16),   # fused recurrent weight landing buffer
            pltpu.VMEM((T * B, GP), jnp.float32),         # staged precomp (per-step static slices)
            pltpu.SemaphoreType.DMA,
        ],
        # Single invocation, no grid: per-grid-step overhead would dominate this sub-microsecond,
        # latency-bound workload and everything fits comfortably in VMEM on v5e/v6e/v7x.
        # TODO(synk): for batched serving on v7x, add a leading "parallel" grid axis over
        # independent sequences (or pl.core_map over the 2-TC mesh) so both TensorCores are used.
    )(x2d, wih1_p, b1_p, wbig, b2_p, wfc_row, bfc)
    return out


def init_params(key, num_features):
    """Deterministic PyTorch-style uniform(-1/sqrt(H), 1/sqrt(H)) init.
    Weights stored pre-transposed (input_dim, 4H); gate order i,f,g,o; b_ih+b_hh combined."""
    bound = 1.0 / jnp.sqrt(jnp.float32(H))
    ks = jax.random.split(key, 10)
    u = lambda k, shape: jax.random.uniform(k, shape, jnp.float32, -bound, bound)

    wih1_t = u(ks[0], (num_features, 4 * H))
    whh1_t = u(ks[1], (H, 4 * H))
    b1 = u(ks[2], (1, 4 * H)) + u(ks[3], (1, 4 * H))
    wih2_t = u(ks[4], (H, 4 * H))
    whh2_t = u(ks[5], (H, 4 * H))
    b2 = u(ks[6], (1, 4 * H)) + u(ks[7], (1, 4 * H))
    wfc_t = u(ks[8], (H, 1))
    bfc = u(ks[9], (1, 1))
    return (wih1_t, whh1_t, b1, wih2_t, whh2_t, b2, wfc_t, bfc)


def net_forward_ref(x, params):
    """Pure-JAX f32 reference of the same forward pass (unpadded layout), for a sanity check."""
    (wih1_t, whh1_t, b1, wih2_t, whh2_t, b2, wfc_t, bfc) = params
    B, T, F = x.shape
    h1 = jnp.zeros((B, H)); c1 = jnp.zeros((B, H))
    h2 = jnp.zeros((B, H)); c2 = jnp.zeros((B, H))

    def cell(x_t, h, c, wih_t, whh_t, b):
        g = x_t @ wih_t + h @ whh_t + b
        i = jax.nn.sigmoid(g[:, 0:H]); f = jax.nn.sigmoid(g[:, H:2 * H])
        gg = jnp.tanh(g[:, 2 * H:3 * H]); o = jax.nn.sigmoid(g[:, 3 * H:4 * H])
        c_new = f * c + i * gg
        return o * jnp.tanh(c_new), c_new

    for t in range(T):
        h1, c1 = cell(x[:, t, :], h1, c1, wih1_t, whh1_t, b1)
        h2, c2 = cell(h1, h2, c2, wih2_t, whh2_t, b2)
    return jnp.maximum(h2 @ wfc_t + bfc, 0.0)


if __name__ == "__main__":
    B, T, F = 2, 8, 8  # batch, sequence length, NumberofFeatures
    key = jax.random.PRNGKey(0)
    kx, kp = jax.random.split(key)
    x = jax.random.normal(kx, (B, T, F), dtype=jnp.float32)
    params = init_params(kp, F)

    # Pre-pack ONCE outside the jitted per-call path (avoids per-call pad/concat HLOs and the
    # associated HBM round trip of the padded weights).
    packed = pack_params(params)

    fwd = jax.jit(net_forward)
    out = jax.block_until_ready(fwd(x, packed))

    ref = net_forward_ref(x, params)
    assert out.shape == (B, 1)
    # bf16 matmul operands (f32 accumulation/state): tolerance loosened vs the pure-f32 reference.
    assert jnp.allclose(out, ref, atol=2e-2, rtol=2e-2), (out, ref)
    print("KERNEL_OK")
</pallas_src>

<mosaic_0001>
module attributes {stable_mosaic.version = 11 : i64} {
  func.func @kernel(%arg0: memref<16x8xbf16, #tpu.memory_space<vmem>>, %arg1: memref<8x512xbf16, #tpu.memory_space<vmem>>, %arg2: memref<1x512xf32, #tpu.memory_space<vmem>>, %arg3: memref<256x1024xbf16, #tpu.memory_space<any>>, %arg4: memref<1x512xf32, #tpu.memory_space<vmem>>, %arg5: memref<1x128xf32, #tpu.memory_space<vmem>>, %arg6: memref<1x1xf32, #tpu.memory_space<vmem>>, %arg7: memref<2x1xf32, #tpu.memory_space<vmem>>, %arg8: memref<256x1024xbf16, #tpu.memory_space<vmem>>, %arg9: memref<16x512xf32, #tpu.memory_space<vmem>>, %arg10: memref<!tpu.dma_semaphore, #tpu.memory_space<semaphore_mem>>) attributes {dimension_semantics = [], scalar_prefetch = 0 : i64, scratch_operands = 3 : i64, tpu.core_type = #tpu.core_type<tc>} {
    tpu.enqueue_dma source(%arg3 : memref<256x1024xbf16, #tpu.memory_space<any>>) target(%arg8 : memref<256x1024xbf16, #tpu.memory_space<vmem>>) target_semaphore(%arg10 : memref<!tpu.dma_semaphore, #tpu.memory_space<semaphore_mem>>)
    %c0 = arith.constant 0 : index
    %c0_0 = arith.constant 0 : index
    %0 = vector.load %arg0[%c0, %c0_0] : memref<16x8xbf16, #tpu.memory_space<vmem>>, vector<16x8xbf16>
    %c0_1 = arith.constant 0 : index
    %c0_2 = arith.constant 0 : index
    %1 = vector.load %arg1[%c0_1, %c0_2] : memref<8x512xbf16, #tpu.memory_space<vmem>>, vector<8x512xbf16>
    %cst = arith.constant dense<0.000000e+00> : vector<16x512xf32>
    %2 = tpu.matmul %0, %1, %cst {dimension_numbers = #tpu.dot_dimension_numbers<[1], [0], [0], [1], [0, 0, 1, 1], [], []>} : vector<16x8xbf16>, vector<8x512xbf16>, vector<16x512xf32> -> vector<16x512xf32>
    %c0_3 = arith.constant 0 : index
    %c0_4 = arith.constant 0 : index
    %3 = vector.load %arg2[%c0_3, %c0_4] : memref<1x512xf32, #tpu.memory_space<vmem>>, vector<1x512xf32>
    %4 = vector.broadcast %3 : vector<1x512xf32> to vector<16x512xf32>
    %5 = arith.addf %2, %4 : vector<16x512xf32>
    %c0_5 = arith.constant 0 : index
    %c0_6 = arith.constant 0 : index
    %6 = vector.load %arg9[%c0_5, %c0_6] : memref<16x512xf32, #tpu.memory_space<vmem>>, vector<16x512xf32>
    tpu.vector_store %arg9[%c0_5, %c0_6], %5 {strides = array<i32>} : memref<16x512xf32, #tpu.memory_space<vmem>>, vector<16x512xf32>,
    %c0_7 = arith.constant 0 : index
    %c0_8 = arith.constant 0 : index
    %7 = vector.load %arg4[%c0_7, %c0_8] : memref<1x512xf32, #tpu.memory_space<vmem>>, vector<1x512xf32>
    %8 = vector.shape_cast %7 : vector<1x512xf32> to vector<1x512xf32>
    %9 = vector.broadcast %8 : vector<1x512xf32> to vector<2x512xf32>
    %cst_9 = arith.constant 0.000000e+00 : f32
    %10 = vector.broadcast %cst_9 : f32 to vector<2x128xf32>
    %cst_10 = arith.constant 0.000000e+00 : f32
    %11 = vector.broadcast %cst_10 : f32 to vector<2x128xf32>
    %cst_11 = arith.constant 0.000000e+00 : f32
    %12 = vector.broadcast %cst_11 : f32 to vector<2x128xf32>
    %cst_12 = arith.constant 0.000000e+00 : f32
    %13 = vector.broadcast %cst_12 : f32 to vector<2x512xf32>
    %c0_13 = arith.constant 0 : index
    %c0_14 = arith.constant 0 : index
    %14 = vector.load %arg9[%c0_13, %c0_14] : memref<16x512xf32, #tpu.memory_space<vmem>>, vector<2x512xf32>
    %15 = arith.addf %14, %13 : vector<2x512xf32>
    %16 = vector.extract_strided_slice %15 {offsets = [0, 0], sizes = [2, 128], strides = [1, 1]} : vector<2x512xf32> to vector<2x128xf32>
    %17 = arith.negf %16 : vector<2x128xf32>
    %18 = math.exp %17 : vector<2x128xf32>
    %cst_15 = arith.constant 1.000000e+00 : f32
    %19 = vector.broadcast %cst_15 : f32 to vector<2x128xf32>
    %20 = arith.addf %19, %18 : vector<2x128xf32>
    %21 = arith.divf %19, %20 : vector<2x128xf32>
    %22 = vector.extract_strided_slice %15 {offsets = [0, 128], sizes = [2, 128], strides = [1, 1]} : vector<2x512xf32> to vector<2x128xf32>
    %23 = arith.negf %22 : vector<2x128xf32>
    %24 = math.exp %23 : vector<2x128xf32>
    %cst_16 = arith.constant 1.000000e+00 : f32
    %25 = vector.broadcast %cst_16 : f32 to vector<2x128xf32>
    %26 = arith.addf %25, %24 : vector<2x128xf32>
    %27 = arith.divf %25, %26 : vector<2x128xf32>
    %28 = vector.extract_strided_slice %15 {offsets = [0, 256], sizes = [2, 128], strides = [1, 1]} : vector<2x512xf32> to vector<2x128xf32>
    %29 = math.tanh %28 : vector<2x128xf32>
    %30 = vector.extract_strided_slice %15 {offsets = [0, 384], sizes = [2, 128], strides = [1, 1]} : vector<2x512xf32> to vector<2x128xf32>
    %31 = arith.negf %30 : vector<2x128xf32>
    %32 = math.exp %31 : vector<2x128xf32>
    %cst_17 = arith.constant 1.000000e+00 : f32
    %33 = vector.broadcast %cst_17 : f32 to vector<2x128xf32>
    %34 = arith.addf %33, %32 : vector<2x128xf32>
    %35 = arith.divf %33, %34 : vector<2x128xf32>
    %36 = arith.mulf %27, %10 : vector<2x128xf32>
    %37 = arith.mulf %21, %29 : vector<2x128xf32>
    %38 = arith.addf %36, %37 : vector<2x128xf32>
    %39 = math.tanh %38 : vector<2x128xf32>
    %40 = arith.mulf %35, %39 : vector<2x128xf32>
    tpu.wait_dma2 semaphore(%arg10 : memref<!tpu.dma_semaphore, #tpu.memory_space<semaphore_mem>>) src(%arg3 : memref<256x1024xbf16, #tpu.memory_space<any>>) dst(%arg8 : memref<256x1024xbf16, #tpu.memory_space<vmem>>)
    %41 = tpu.concatenate %40, %11 in 1 : vector<2x128xf32>, vector<2x128xf32> -> vector<2x256xf32>
    %42 = arith.truncf %41 : vector<2x256xf32> to vector<2x256xbf16>
    %c0_18 = arith.constant 0 : index
    %c0_19 = arith.constant 0 : index
    %43 = vector.load %arg8[%c0_18, %c0_19] : memref<256x1024xbf16, #tpu.memory_space<vmem>>, vector<256x1024xbf16>
    %cst_20 = arith.constant dense<0.000000e+00> : vector<2x1024xf32>
    %44 = tpu.matmul %42, %43, %cst_20 {dimension_numbers = #tpu.dot_dimension_numbers<[1], [0], [0], [1], [0, 0, 1, 1], [], []>} : vector<2x256xbf16>, vector<256x1024xbf16>, vector<2x1024xf32> -> vector<2x1024xf32>
    %45 = vector.extract_strided_slice %44 {offsets = [0, 0], sizes = [2, 512], strides = [1, 1]} : vector<2x1024xf32> to vector<2x512xf32>
    %46 = vector.extract_strided_slice %44 {offsets = [0, 512], sizes = [2, 512], strides = [1, 1]} : vector<2x1024xf32> to vector<2x512xf32>
    %47 = arith.addf %46, %9 : vector<2x512xf32>
    %48 = vector.extract_strided_slice %47 {offsets = [0, 0], sizes = [2, 128], strides = [1, 1]} : vector<2x512xf32> to vector<2x128xf32>
    %49 = arith.negf %48 : vector<2x128xf32>
    %50 = math.exp %49 : vector<2x128xf32>
    %cst_21 = arith.constant 1.000000e+00 : f32
    %51 = vector.broadcast %cst_21 : f32 to vector<2x128xf32>
    %52 = arith.addf %51, %50 : vector<2x128xf32>
    %53 = arith.divf %51, %52 : vector<2x128xf32>
    %54 = vector.extract_strided_slice %47 {offsets = [0, 128], sizes = [2, 128], strides = [1, 1]} : vector<2x512xf32> to vector<2x128xf32>
    %55 = arith.negf %54 : vector<2x128xf32>
    %56 = math.exp %55 : vector<2x128xf32>
    %cst_22 = arith.constant 1.000000e+00 : f32
    %57 = vector.broadcast %cst_22 : f32 to vector<2x128xf32>
    %58 = arith.addf %57, %56 : vector<2x128xf32>
    %59 = arith.divf %57, %58 : vector<2x128xf32>
    %60 = vector.extract_strided_slice %47 {offsets = [0, 256], sizes = [2, 128], strides = [1, 1]} : vector<2x512xf32> to vector<2x128xf32>
    %61 = math.tanh %60 : vector<2x128xf32>
    %62 = vector.extract_strided_slice %47 {offsets = [0, 384], sizes = [2, 128], strides = [1, 1]} : vector<2x512xf32> to vector<2x128xf32>
    %63 = arith.negf %62 : vector<2x128xf32>
    %64 = math.exp %63 : vector<2x128xf32>
    %cst_23 = arith.constant 1.000000e+00 : f32
    %65 = vector.broadcast %cst_23 : f32 to vector<2x128xf32>
    %66 = arith.addf %65, %64 : vector<2x128xf32>
    %67 = arith.divf %65, %66 : vector<2x128xf32>
    %68 = arith.mulf %59, %12 : vector<2x128xf32>
    %69 = arith.mulf %53, %61 : vector<2x128xf32>
    %70 = arith.addf %68, %69 : vector<2x128xf32>
    %71 = math.tanh %70 : vector<2x128xf32>
    %72 = arith.mulf %67, %71 : vector<2x128xf32>
    %c2 = arith.constant 2 : index
    %c0_24 = arith.constant 0 : index
    %73 = vector.load %arg9[%c2, %c0_24] : memref<16x512xf32, #tpu.memory_space<vmem>>, vector<2x512xf32>
    %74 = arith.addf %73, %45 : vector<2x512xf32>
    %75 = vector.extract_strided_slice %74 {offsets = [0, 0], sizes = [2, 128], strides = [1, 1]} : vector<2x512xf32> to vector<2x128xf32>
    %76 = arith.negf %75 : vector<2x128xf32>
    %77 = math.exp %76 : vector<2x128xf32>
    %cst_25 = arith.constant 1.000000e+00 : f32
    %78 = vector.broadcast %cst_25 : f32 to vector<2x128xf32>
    %79 = arith.addf %78, %77 : vector<2x128xf32>
    %80 = arith.divf %78, %79 : vector<2x128xf32>
    %81 = vector.extract_strided_slice %74 {offsets = [0, 128], sizes = [2, 128], strides = [1, 1]} : vector<2x512xf32> to vector<2x128xf32>
    %82 = arith.negf %81 : vector<2x128xf32>
    %83 = math.exp %82 : vector<2x128xf32>
    %cst_26 = arith.constant 1.000000e+00 : f32
    %84 = vector.broadcast %cst_26 : f32 to vector<2x128xf32>
    %85 = arith.addf %84, %83 : vector<2x128xf32>
    %86 = arith.divf %84, %85 : vector<2x128xf32>
    %87 = vector.extract_strided_slice %74 {offsets = [0, 256], sizes = [2, 128], strides = [1, 1]} : vector<2x512xf32> to vector<2x128xf32>
    %88 = math.tanh %87 : vector<2x128xf32>
    %89 = vector.extract_strided_slice %74 {offsets = [0, 384], sizes = [2, 128], strides = [1, 1]} : vector<2x512xf32> to vector<2x128xf32>
    %90 = arith.negf %89 : vector<2x128xf32>
    %91 = math.exp %90 : vector<2x128xf32>
    %cst_27 = arith.constant 1.000000e+00 : f32
    %92 = vector.broadcast %cst_27 : f32 to vector<2x128xf32>
    %93 = arith.addf %92, %91 : vector<2x128xf32>
    %94 = arith.divf %92, %93 : vector<2x128xf32>
    %95 = arith.mulf %86, %38 : vector<2x128xf32>
    %96 = arith.mulf %80, %88 : vector<2x128xf32>
    %97 = arith.addf %95, %96 : vector<2x128xf32>
    %98 = math.tanh %97 : vector<2x128xf32>
    %99 = arith.mulf %94, %98 : vector<2x128xf32>
    %100 = tpu.concatenate %99, %72 in 1 : vector<2x128xf32>, vector<2x128xf32> -> vector<2x256xf32>
    %101 = arith.truncf %100 : vector<2x256xf32> to vector<2x256xbf16>
    %c0_28 = arith.constant 0 : index
    %c0_29 = arith.constant 0 : index
    %102 = vector.load %arg8[%c0_28, %c0_29] : memref<256x1024xbf16, #tpu.memory_space<vmem>>, vector<256x1024xbf16>
    %cst_30 = arith.constant dense<0.000000e+00> : vector<2x1024xf32>
    %103 = tpu.matmul %101, %102, %cst_30 {dimension_numbers = #tpu.dot_dimension_numbers<[1], [0], [0], [1], [0, 0, 1, 1], [], []>} : vector<2x256xbf16>, vector<256x1024xbf16>, vector<2x1024xf32> -> vector<2x1024xf32>
    %104 = vector.extract_strided_slice %103 {offsets = [0, 0], sizes = [2, 512], strides = [1, 1]} : vector<2x1024xf32> to vector<2x512xf32>
    %105 = vector.extract_strided_slice %103 {offsets = [0, 512], sizes = [2, 512], strides = [1, 1]} : vector<2x1024xf32> to vector<2x512xf32>
    %106 = arith.addf %105, %9 : vector<2x512xf32>
    %107 = vector.extract_strided_slice %106 {offsets = [0, 0], sizes = [2, 128], strides = [1, 1]} : vector<2x512xf32> to vector<2x128xf32>
    %108 = arith.negf %107 : vector<2x128xf32>
    %109 = math.exp %108 : vector<2x128xf32>
    %cst_31 = arith.constant 1.000000e+00 : f32
    %110 = vector.broadcast %cst_31 : f32 to vector<2x128xf32>
    %111 = arith.addf %110, %109 : vector<2x128xf32>
    %112 = arith.divf %110, %111 : vector<2x128xf32>
    %113 = vector.extract_strided_slice %106 {offsets = [0, 128], sizes = [2, 128], strides = [1, 1]} : vector<2x512xf32> to vector<2x128xf32>
    %114 = arith.negf %113 : vector<2x128xf32>
    %115 = math.exp %114 : vector<2x128xf32>
    %cst_32 = arith.constant 1.000000e+00 : f32
    %116 = vector.broadcast %cst_32 : f32 to vector<2x128xf32>
    %117 = arith.addf %116, %115 : vector<2x128xf32>
    %118 = arith.divf %116, %117 : vector<2x128xf32>
    %119 = vector.extract_strided_slice %106 {offsets = [0, 256], sizes = [2, 128], strides = [1, 1]} : vector<2x512xf32> to vector<2x128xf32>
    %120 = math.tanh %119 : vector<2x128xf32>
    %121 = vector.extract_strided_slice %106 {offsets = [0, 384], sizes = [2, 128], strides = [1, 1]} : vector<2x512xf32> to vector<2x128xf32>
    %122 = arith.negf %121 : vector<2x128xf32>
    %123 = math.exp %122 : vector<2x128xf32>
    %cst_33 = arith.constant 1.000000e+00 : f32
    %124 = vector.broadcast %cst_33 : f32 to vector<2x128xf32>
    %125 = arith.addf %124, %123 : vector<2x128xf32>
    %126 = arith.divf %124, %125 : vector<2x128xf32>
    %127 = arith.mulf %118, %70 : vector<2x128xf32>
    %128 = arith.mulf %112, %120 : vector<2x128xf32>
    %129 = arith.addf %127, %128 : vector<2x128xf32>
    %130 = math.tanh %129 : vector<2x128xf32>
    %131 = arith.mulf %126, %130 : vector<2x128xf32>
    %c4 = arith.constant 4 : index
    %c0_34 = arith.constant 0 : index
    %132 = vector.load %arg9[%c4, %c0_34] : memref<16x512xf32, #tpu.memory_space<vmem>>, vector<2x512xf32>
    %133 = arith.addf %132, %104 : vector<2x512xf32>
    %134 = vector.extract_strided_slice %133 {offsets = [0, 0], sizes = [2, 128], strides = [1, 1]} : vector<2x512xf32> to vector<2x128xf32>
    %135 = arith.negf %134 : vector<2x128xf32>
    %136 = math.exp %135 : vector<2x128xf32>
    %cst_35 = arith.constant 1.000000e+00 : f32
    %137 = vector.broadcast %cst_35 : f32 to vector<2x128xf32>
    %138 = arith.addf %137, %136 : vector<2x128xf32>
    %139 = arith.divf %137, %138 : vector<2x128xf32>
    %140 = vector.extract_strided_slice %133 {offsets = [0, 128], sizes = [2, 128], strides = [1, 1]} : vector<2x512xf32> to vector<2x128xf32>
    %141 = arith.negf %140 : vector<2x128xf32>
    %142 = math.exp %141 : vector<2x128xf32>
    %cst_36 = arith.constant 1.000000e+00 : f32
    %143 = vector.broadcast %cst_36 : f32 to vector<2x128xf32>
    %144 = arith.addf %143, %142 : vector<2x128xf32>
    %145 = arith.divf %143, %144 : vector<2x128xf32>
    %146 = vector.extract_strided_slice %133 {offsets = [0, 256], sizes = [2, 128], strides = [1, 1]} : vector<2x512xf32> to vector<2x128xf32>
    %147 = math.tanh %146 : vector<2x128xf32>
    %148 = vector.extract_strided_slice %133 {offsets = [0, 384], sizes = [2, 128], strides = [1, 1]} : vector<2x512xf32> to vector<2x128xf32>
    %149 = arith.negf %148 : vector<2x128xf32>
    %150 = math.exp %149 : vector<2x128xf32>
    %cst_37 = arith.constant 1.000000e+00 : f32
    %151 = vector.broadcast %cst_37 : f32 to vector<2x128xf32>
    %152 = arith.addf %151, %150 : vector<2x128xf32>
    %153 = arith.divf %151, %152 : vector<2x128xf32>
    %154 = arith.mulf %145, %97 : vector<2x128xf32>
    %155 = arith.mulf %139, %147 : vector<2x128xf32>
    %156 = arith.addf %154, %155 : vector<2x128xf32>
    %157 = math.tanh %156 : vector<2x128xf32>
    %158 = arith.mulf %153, %157 : vector<2x128xf32>
    %159 = tpu.concatenate %158, %131 in 1 : vector<2x128xf32>, vector<2x128xf32> -> vector<2x256xf32>
    %160 = arith.truncf %159 : vector<2x256xf32> to vector<2x256xbf16>
    %c0_38 = arith.constant 0 : index
    %c0_39 = arith.constant 0 : index
    %161 = vector.load %arg8[%c0_38, %c0_39] : memref<256x1024xbf16, #tpu.memory_space<vmem>>, vector<256x1024xbf16>
    %cst_40 = arith.constant dense<0.000000e+00> : vector<2x1024xf32>
    %162 = tpu.matmul %160, %161, %cst_40 {dimension_numbers = #tpu.dot_dimension_numbers<[1], [0], [0], [1], [0, 0, 1, 1], [], []>} : vector<2x256xbf16>, vector<256x1024xbf16>, vector<2x1024xf32> -> vector<2x1024xf32>
    %163 = vector.extract_strided_slice %162 {offsets = [0, 0], sizes = [2, 512], strides = [1, 1]} : vector<2x1024xf32> to vector<2x512xf32>
    %164 = vector.extract_strided_slice %162 {offsets = [0, 512], sizes = [2, 512], strides = [1, 1]} : vector<2x1024xf32> to vector<2x512xf32>
    %165 = arith.addf %164, %9 : vector<2x512xf32>
    %166 = vector.extract_strided_slice %165 {offsets = [0, 0], sizes = [2, 128], strides = [1, 1]} : vector<2x512xf32> to vector<2x128xf32>
    %167 = arith.negf %166 : vector<2x128xf32>
    %168 = math.exp %167 : vector<2x128xf32>
    %cst_41 = arith.constant 1.000000e+00 : f32
    %169 = vector.broadcast %cst_41 : f32 to vector<2x128xf32>
    %170 = arith.addf %169, %168 : vector<2x128xf32>
    %171 = arith.divf %169, %170 : vector<2x128xf32>
    %172 = vector.extract_strided_slice %165 {offsets = [0, 128], sizes = [2, 128], strides = [1, 1]} : vector<2x512xf32> to vector<2x128xf32>
    %173 = arith.negf %172 : vector<2x128xf32>
    %174 = math.exp %173 : vector<2x128xf32>
    %cst_42 = arith.constant 1.000000e+00 : f32
    %175 = vector.broadcast %cst_42 : f32 to vector<2x128xf32>
    %176 = arith.addf %175, %174 : vector<2x128xf32>
    %177 = arith.divf %175, %176 : vector<2x128xf32>
    %178 = vector.extract_strided_slice %165 {offsets = [0, 256], sizes = [2, 128], strides = [1, 1]} : vector<2x512xf32> to vector<2x128xf32>
    %179 = math.tanh %178 : vector<2x128xf32>
    %180 = vector.extract_strided_slice %165 {offsets = [0, 384], sizes = [2, 128], strides = [1, 1]} : vector<2x512xf32> to vector<2x128xf32>
    %181 = arith.negf %180 : vector<2x128xf32>
    %182 = math.exp %181 : vector<2x128xf32>
    %cst_43 = arith.constant 1.000000e+00 : f32
    %183 = vector.broadcast %cst_43 : f32 to vector<2x128xf32>
    %184 = arith.addf %183, %182 : vector<2x128xf32>
    %185 = arith.divf %183, %184 : vector<2x128xf32>
    %186 = arith.mulf %177, %129 : vector<2x128xf32>
    %187 = arith.mulf %171, %179 : vector<2x128xf32>
    %188 = arith.addf %186, %187 : vector<2x128xf32>
    %189 = math.tanh %188 : vector<2x128xf32>
    %190 = arith.mulf %185, %189 : vector<2x128xf32>
    %c6 = arith.constant 6 : index
    %c0_44 = arith.constant 0 : index
    %191 = vector.load %arg9[%c6, %c0_44] : memref<16x512xf32, #tpu.memory_space<vmem>>, vector<2x512xf32>
    %192 = arith.addf %191, %163 : vector<2x512xf32>
    %193 = vector.extract_strided_slice %192 {offsets = [0, 0], sizes = [2, 128], strides = [1, 1]} : vector<2x512xf32> to vector<2x128xf32>
    %194 = arith.negf %193 : vector<2x128xf32>
    %195 = math.exp %194 : vector<2x128xf32>
    %cst_45 = arith.constant 1.000000e+00 : f32
    %196 = vector.broadcast %cst_45 : f32 to vector<2x128xf32>
    %197 = arith.addf %196, %195 : vector<2x128xf32>
    %198 = arith.divf %196, %197 : vector<2x128xf32>
    %199 = vector.extract_strided_slice %192 {offsets = [0, 128], sizes = [2, 128], strides = [1, 1]} : vector<2x512xf32> to vector<2x128xf32>
    %200 = arith.negf %199 : vector<2x128xf32>
    %201 = math.exp %200 : vector<2x128xf32>
    %cst_46 = arith.constant 1.000000e+00 : f32
    %202 = vector.broadcast %cst_46 : f32 to vector<2x128xf32>
    %203 = arith.addf %202, %201 : vector<2x128xf32>
    %204 = arith.divf %202, %203 : vector<2x128xf32>
    %205 = vector.extract_strided_slice %192 {offsets = [0, 256], sizes = [2, 128], strides = [1, 1]} : vector<2x512xf32> to vector<2x128xf32>
    %206 = math.tanh %205 : vector<2x128xf32>
    %207 = vector.extract_strided_slice %192 {offsets = [0, 384], sizes = [2, 128], strides = [1, 1]} : vector<2x512xf32> to vector<2x128xf32>
    %208 = arith.negf %207 : vector<2x128xf32>
    %209 = math.exp %208 : vector<2x128xf32>
    %cst_47 = arith.constant 1.000000e+00 : f32
    %210 = vector.broadcast %cst_47 : f32 to vector<2x128xf32>
    %211 = arith.addf %210, %209 : vector<2x128xf32>
    %212 = arith.divf %210, %211 : vector<2x128xf32>
    %213 = arith.mulf %204, %156 : vector<2x128xf32>
    %214 = arith.mulf %198, %206 : vector<2x128xf32>
    %215 = arith.addf %213, %214 : vector<2x128xf32>
    %216 = math.tanh %215 : vector<2x128xf32>
    %217 = arith.mulf %212, %216 : vector<2x128xf32>
    %218 = tpu.concatenate %217, %190 in 1 : vector<2x128xf32>, vector<2x128xf32> -> vector<2x256xf32>
    %219 = arith.truncf %218 : vector<2x256xf32> to vector<2x256xbf16>
    %c0_48 = arith.constant 0 : index
    %c0_49 = arith.constant 0 : index
    %220 = vector.load %arg8[%c0_48, %c0_49] : memref<256x1024xbf16, #tpu.memory_space<vmem>>, vector<256x1024xbf16>
    %cst_50 = arith.constant dense<0.000000e+00> : vector<2x1024xf32>
    %221 = tpu.matmul %219, %220, %cst_50 {dimension_numbers = #tpu.dot_dimension_numbers<[1], [0], [0], [1], [0, 0, 1, 1], [], []>} : vector<2x256xbf16>, vector<256x1024xbf16>, vector<2x1024xf32> -> vector<2x1024xf32>
    %222 = vector.extract_strided_slice %221 {offsets = [0, 0], sizes = [2, 512], strides = [1, 1]} : vector<2x1024xf32> to vector<2x512xf32>
    %223 = vector.extract_strided_slice %221 {offsets = [0, 512], sizes = [2, 512], strides = [1, 1]} : vector<2x1024xf32> to vector<2x512xf32>
    %224 = arith.addf %223, %9 : vector<2x512xf32>
    %225 = vector.extract_strided_slice %224 {offsets = [0, 0], sizes = [2, 128], strides = [1, 1]} : vector<2x512xf32> to vector<2x128xf32>
    %226 = arith.negf %225 : vector<2x128xf32>
    %227 = math.exp %226 : vector<2x128xf32>
    %cst_51 = arith.constant 1.000000e+00 : f32
    %228 = vector.broadcast %cst_51 : f32 to vector<2x128xf32>
    %229 = arith.addf %228, %227 : vector<2x128xf32>
    %230 = arith.divf %228, %229 : vector<2x128xf32>
    %231 = vector.extract_strided_slice %224 {offsets = [0, 128], sizes = [2, 128], strides = [1, 1]} : vector<2x512xf32> to vector<2x128xf32>
    %232 = arith.negf %231 : vector<2x128xf32>
    %233 = math.exp %232 : vector<2x128xf32>
    %cst_52 = arith.constant 1.000000e+00 : f32
    %234 = vector.broadcast %cst_52 : f32 to vector<2x128xf32>
    %235 = arith.addf %234, %233 : vector<2x128xf32>
    %236 = arith.divf %234, %235 : vector<2x128xf32>
    %237 = vector.extract_strided_slice %224 {offsets = [0, 256], sizes = [2, 128], strides = [1, 1]} : vector<2x512xf32> to vector<2x128xf32>
    %238 = math.tanh %237 : vector<2x128xf32>
    %239 = vector.extract_strided_slice %224 {offsets = [0, 384], sizes = [2, 128], strides = [1, 1]} : vector<2x512xf32> to vector<2x128xf32>
    %240 = arith.negf %239 : vector<2x128xf32>
    %241 = math.exp %240 : vector<2x128xf32>
    %cst_53 = arith.constant 1.000000e+00 : f32
    %242 = vector.broadcast %cst_53 : f32 to vector<2x128xf32>
    %243 = arith.addf %242, %241 : vector<2x128xf32>
    %244 = arith.divf %242, %243 : vector<2x128xf32>
    %245 = arith.mulf %236, %188 : vector<2x128xf32>
    %246 = arith.mulf %230, %238 : vector<2x128xf32>
    %247 = arith.addf %245, %246 : vector<2x128xf32>
    %248 = math.tanh %247 : vector<2x128xf32>
    %249 = arith.mulf %244, %248 : vector<2x128xf32>
    %c8 = arith.constant 8 : index
    %c0_54 = arith.constant 0 : index
    %250 = vector.load %arg9[%c8, %c0_54] : memref<16x512xf32, #tpu.memory_space<vmem>>, vector<2x512xf32>
    %251 = arith.addf %250, %222 : vector<2x512xf32>
    %252 = vector.extract_strided_slice %251 {offsets = [0, 0], sizes = [2, 128], strides = [1, 1]} : vector<2x512xf32> to vector<2x128xf32>
    %253 = arith.negf %252 : vector<2x128xf32>
    %254 = math.exp %253 : vector<2x128xf32>
    %cst_55 = arith.constant 1.000000e+00 : f32
    %255 = vector.broadcast %cst_55 : f32 to vector<2x128xf32>
    %256 = arith.addf %255, %254 : vector<2x128xf32>
    %257 = arith.divf %255, %256 : vector<2x128xf32>
    %258 = vector.extract_strided_slice %251 {offsets = [0, 128], sizes = [2, 128], strides = [1, 1]} : vector<2x512xf32> to vector<2x128xf32>
    %259 = arith.negf %258 : vector<2x128xf32>
    %260 = math.exp %259 : vector<2x128xf32>
    %cst_56 = arith.constant 1.000000e+00 : f32
    %261 = vector.broadcast %cst_56 : f32 to vector<2x128xf32>
    %262 = arith.addf %261, %260 : vector<2x128xf32>
    %263 = arith.divf %261, %262 : vector<2x128xf32>
    %264 = vector.extract_strided_slice %251 {offsets = [0, 256], sizes = [2, 128], strides = [1, 1]} : vector<2x512xf32> to vector<2x128xf32>
    %265 = math.tanh %264 : vector<2x128xf32>
    %266 = vector.extract_strided_slice %251 {offsets = [0, 384], sizes = [2, 128], strides = [1, 1]} : vector<2x512xf32> to vector<2x128xf32>
    %267 = arith.negf %266 : vector<2x128xf32>
    %268 = math.exp %267 : vector<2x128xf32>
    %cst_57 = arith.constant 1.000000e+00 : f32
    %269 = vector.broadcast %cst_57 : f32 to vector<2x128xf32>
    %270 = arith.addf %269, %268 : vector<2x128xf32>
    %271 = arith.divf %269, %270 : vector<2x128xf32>
    %272 = arith.mulf %263, %215 : vector<2x128xf32>
    %273 = arith.mulf %257, %265 : vector<2x128xf32>
    %274 = arith.addf %272, %273 : vector<2x128xf32>
    %275 = math.tanh %274 : vector<2x128xf32>
    %276 = arith.mulf %271, %275 : vector<2x128xf32>
    %277 = tpu.concatenate %276, %249 in 1 : vector<2x128xf32>, vector<2x128xf32> -> vector<2x256xf32>
    %278 = arith.truncf %277 : vector<2x256xf32> to vector<2x256xbf16>
    %c0_58 = arith.constant 0 : index
    %c0_59 = arith.constant 0 : index
    %279 = vector.load %arg8[%c0_58, %c0_59] : memref<256x1024xbf16, #tpu.memory_space<vmem>>, vector<256x1024xbf16>
    %cst_60 = arith.constant dense<0.000000e+00> : vector<2x1024xf32>
    %280 = tpu.matmul %278, %279, %cst_60 {dimension_numbers = #tpu.dot_dimension_numbers<[1], [0], [0], [1], [0, 0, 1, 1], [], []>} : vector<2x256xbf16>, vector<256x1024xbf16>, vector<2x1024xf32> -> vector<2x1024xf32>
    %281 = vector.extract_strided_slice %280 {offsets = [0, 0], sizes = [2, 512], strides = [1, 1]} : vector<2x1024xf32> to vector<2x512xf32>
    %282 = vector.extract_strided_slice %280 {offsets = [0, 512], sizes = [2, 512], strides = [1, 1]} : vector<2x1024xf32> to vector<2x512xf32>
    %283 = arith.addf %282, %9 : vector<2x512xf32>
    %284 = vector.extract_strided_slice %283 {offsets = [0, 0], sizes = [2, 128], strides = [1, 1]} : vector<2x512xf32> to vector<2x128xf32>
    %285 = arith.negf %284 : vector<2x128xf32>
    %286 = math.exp %285 : vector<2x128xf32>
    %cst_61 = arith.constant 1.000000e+00 : f32
    %287 = vector.broadcast %cst_61 : f32 to vector<2x128xf32>
    %288 = arith.addf %287, %286 : vector<2x128xf32>
    %289 = arith.divf %287, %288 : vector<2x128xf32>
    %290 = vector.extract_strided_slice %283 {offsets = [0, 128], sizes = [2, 128], strides = [1, 1]} : vector<2x512xf32> to vector<2x128xf32>
    %291 = arith.negf %290 : vector<2x128xf32>
    %292 = math.exp %291 : vector<2x128xf32>
    %cst_62 = arith.constant 1.000000e+00 : f32
    %293 = vector.broadcast %cst_62 : f32 to vector<2x128xf32>
    %294 = arith.addf %293, %292 : vector<2x128xf32>
    %295 = arith.divf %293, %294 : vector<2x128xf32>
    %296 = vector.extract_strided_slice %283 {offsets = [0, 256], sizes = [2, 128], strides = [1, 1]} : vector<2x512xf32> to vector<2x128xf32>
    %297 = math.tanh %296 : vector<2x128xf32>
    %298 = vector.extract_strided_slice %283 {offsets = [0, 384], sizes = [2, 128], strides = [1, 1]} : vector<2x512xf32> to vector<2x128xf32>
    %299 = arith.negf %298 : vector<2x128xf32>
    %300 = math.exp %299 : vector<2x128xf32>
    %cst_63 = arith.constant 1.000000e+00 : f32
    %301 = vector.broadcast %cst_63 : f32 to vector<2x128xf32>
    %302 = arith.addf %301, %300 : vector<2x128xf32>
    %303 = arith.divf %301, %302 : vector<2x128xf32>
    %304 = arith.mulf %295, %247 : vector<2x128xf32>
    %305 = arith.mulf %289, %297 : vector<2x128xf32>
    %306 = arith.addf %304, %305 : vector<2x128xf32>
    %307 = math.tanh %306 : vector<2x128xf32>
    %308 = arith.mulf %303, %307 : vector<2x128xf32>
    %c10 = arith.constant 10 : index
    %c0_64 = arith.constant 0 : index
    %309 = vector.load %arg9[%c10, %c0_64] : memref<16x512xf32, #tpu.memory_space<vmem>>, vector<2x512xf32>
    %310 = arith.addf %309, %281 : vector<2x512xf32>
    %311 = vector.extract_strided_slice %310 {offsets = [0, 0], sizes = [2, 128], strides = [1, 1]} : vector<2x512xf32> to vector<2x128xf32>
    %312 = arith.negf %311 : vector<2x128xf32>
    %313 = math.exp %312 : vector<2x128xf32>
    %cst_65 = arith.constant 1.000000e+00 : f32
    %314 = vector.broadcast %cst_65 : f32 to vector<2x128xf32>
    %315 = arith.addf %314, %313 : vector<2x128xf32>
    %316 = arith.divf %314, %315 : vector<2x128xf32>
    %317 = vector.extract_strided_slice %310 {offsets = [0, 128], sizes = [2, 128], strides = [1, 1]} : vector<2x512xf32> to vector<2x128xf32>
    %318 = arith.negf %317 : vector<2x128xf32>
    %319 = math.exp %318 : vector<2x128xf32>
    %cst_66 = arith.constant 1.000000e+00 : f32
    %320 = vector.broadcast %cst_66 : f32 to vector<2x128xf32>
    %321 = arith.addf %320, %319 : vector<2x128xf32>
    %322 = arith.divf %320, %321 : vector<2x128xf32>
    %323 = vector.extract_strided_slice %310 {offsets = [0, 256], sizes = [2, 128], strides = [1, 1]} : vector<2x512xf32> to vector<2x128xf32>
    %324 = math.tanh %323 : vector<2x128xf32>
    %325 = vector.extract_strided_slice %310 {offsets = [0, 384], sizes = [2, 128], strides = [1, 1]} : vector<2x512xf32> to vector<2x128xf32>
    %326 = arith.negf %325 : vector<2x128xf32>
    %327 = math.exp %326 : vector<2x128xf32>
    %cst_67 = arith.constant 1.000000e+00 : f32
    %328 = vector.broadcast %cst_67 : f32 to vector<2x128xf32>
    %329 = arith.addf %328, %327 : vector<2x128xf32>
    %330 = arith.divf %328, %329 : vector<2x128xf32>
    %331 = arith.mulf %322, %274 : vector<2x128xf32>
    %332 = arith.mulf %316, %324 : vector<2x128xf32>
    %333 = arith.addf %331, %332 : vector<2x128xf32>
    %334 = math.tanh %333 : vector<2x128xf32>
    %335 = arith.mulf %330, %334 : vector<2x128xf32>
    %336 = tpu.concatenate %335, %308 in 1 : vector<2x128xf32>, vector<2x128xf32> -> vector<2x256xf32>
    %337 = arith.truncf %336 : vector<2x256xf32> to vector<2x256xbf16>
    %c0_68 = arith.constant 0 : index
    %c0_69 = arith.constant 0 : index
    %338 = vector.load %arg8[%c0_68, %c0_69] : memref<256x1024xbf16, #tpu.memory_space<vmem>>, vector<256x1024xbf16>
    %cst_70 = arith.constant dense<0.000000e+00> : vector<2x1024xf32>
    %339 = tpu.matmul %337, %338, %cst_70 {dimension_numbers = #tpu.dot_dimension_numbers<[1], [0], [0], [1], [0, 0, 1, 1], [], []>} : vector<2x256xbf16>, vector<256x1024xbf16>, vector<2x1024xf32> -> vector<2x1024xf32>
    %340 = vector.extract_strided_slice %339 {offsets = [0, 0], sizes = [2, 512], strides = [1, 1]} : vector<2x1024xf32> to vector<2x512xf32>
    %341 = vector.extract_strided_slice %339 {offsets = [0, 512], sizes = [2, 512], strides = [1, 1]} : vector<2x1024xf32> to vector<2x512xf32>
    %342 = arith.addf %341, %9 : vector<2x512xf32>
    %343 = vector.extract_strided_slice %342 {offsets = [0, 0], sizes = [2, 128], strides = [1, 1]} : vector<2x512xf32> to vector<2x128xf32>
    %344 = arith.negf %343 : vector<2x128xf32>
    %345 = math.exp %344 : vector<2x128xf32>
    %cst_71 = arith.constant 1.000000e+00 : f32
    %346 = vector.broadcast %cst_71 : f32 to vector<2x128xf32>
    %347 = arith.addf %346, %345 : vector<2x128xf32>
    %348 = arith.divf %346, %347 : vector<2x128xf32>
    %349 = vector.extract_strided_slice %342 {offsets = [0, 128], sizes = [2, 128], strides = [1, 1]} : vector<2x512xf32> to vector<2x128xf32>
    %350 = arith.negf %349 : vector<2x128xf32>
    %351 = math.exp %350 : vector<2x128xf32>
    %cst_72 = arith.constant 1.000000e+00 : f32
    %352 = vector.broadcast %cst_72 : f32 to vector<2x128xf32>
    %353 = arith.addf %352, %351 : vector<2x128xf32>
    %354 = arith.divf %352, %353 : vector<2x128xf32>
    %355 = vector.extract_strided_slice %342 {offsets = [0, 256], sizes = [2, 128], strides = [1, 1]} : vector<2x512xf32> to vector<2x128xf32>
    %356 = math.tanh %355 : vector<2x128xf32>
    %357 = vector.extract_strided_slice %342 {offsets = [0, 384], sizes = [2, 128], strides = [1, 1]} : vector<2x512xf32> to vector<2x128xf32>
    %358 = arith.negf %357 : vector<2x128xf32>
    %359 = math.exp %358 : vector<2x128xf32>
    %cst_73 = arith.constant 1.000000e+00 : f32
    %360 = vector.broadcast %cst_73 : f32 to vector<2x128xf32>
    %361 = arith.addf %360, %359 : vector<2x128xf32>
    %362 = arith.divf %360, %361 : vector<2x128xf32>
    %363 = arith.mulf %354, %306 : vector<2x128xf32>
    %364 = arith.mulf %348, %356 : vector<2x128xf32>
    %365 = arith.addf %363, %364 : vector<2x128xf32>
    %366 = math.tanh %365 : vector<2x128xf32>
    %367 = arith.mulf %362, %366 : vector<2x128xf32>
    %c12 = arith.constant 12 : index
    %c0_74 = arith.constant 0 : index
    %368 = vector.load %arg9[%c12, %c0_74] : memref<16x512xf32, #tpu.memory_space<vmem>>, vector<2x512xf32>
    %369 = arith.addf %368, %340 : vector<2x512xf32>
    %370 = vector.extract_strided_slice %369 {offsets = [0, 0], sizes = [2, 128], strides = [1, 1]} : vector<2x512xf32> to vector<2x128xf32>
    %371 = arith.negf %370 : vector<2x128xf32>
    %372 = math.exp %371 : vector<2x128xf32>
    %cst_75 = arith.constant 1.000000e+00 : f32
    %373 = vector.broadcast %cst_75 : f32 to vector<2x128xf32>
    %374 = arith.addf %373, %372 : vector<2x128xf32>
    %375 = arith.divf %373, %374 : vector<2x128xf32>
    %376 = vector.extract_strided_slice %369 {offsets = [0, 128], sizes = [2, 128], strides = [1, 1]} : vector<2x512xf32> to vector<2x128xf32>
    %377 = arith.negf %376 : vector<2x128xf32>
    %378 = math.exp %377 : vector<2x128xf32>
    %cst_76 = arith.constant 1.000000e+00 : f32
    %379 = vector.broadcast %cst_76 : f32 to vector<2x128xf32>
    %380 = arith.addf %379, %378 : vector<2x128xf32>
    %381 = arith.divf %379, %380 : vector<2x128xf32>
    %382 = vector.extract_strided_slice %369 {offsets = [0, 256], sizes = [2, 128], strides = [1, 1]} : vector<2x512xf32> to vector<2x128xf32>
    %383 = math.tanh %382 : vector<2x128xf32>
    %384 = vector.extract_strided_slice %369 {offsets = [0, 384], sizes = [2, 128], strides = [1, 1]} : vector<2x512xf32> to vector<2x128xf32>
    %385 = arith.negf %384 : vector<2x128xf32>
    %386 = math.exp %385 : vector<2x128xf32>
    %cst_77 = arith.constant 1.000000e+00 : f32
    %387 = vector.broadcast %cst_77 : f32 to vector<2x128xf32>
    %388 = arith.addf %387, %386 : vector<2x128xf32>
    %389 = arith.divf %387, %388 : vector<2x128xf32>
    %390 = arith.mulf %381, %333 : vector<2x128xf32>
    %391 = arith.mulf %375, %383 : vector<2x128xf32>
    %392 = arith.addf %390, %391 : vector<2x128xf32>
    %393 = math.tanh %392 : vector<2x128xf32>
    %394 = arith.mulf %389, %393 : vector<2x128xf32>
    %395 = tpu.concatenate %394, %367 in 1 : vector<2x128xf32>, vector<2x128xf32> -> vector<2x256xf32>
    %396 = arith.truncf %395 : vector<2x256xf32> to vector<2x256xbf16>
    %c0_78 = arith.constant 0 : index
    %c0_79 = arith.constant 0 : index
    %397 = vector.load %arg8[%c0_78, %c0_79] : memref<256x1024xbf16, #tpu.memory_space<vmem>>, vector<256x1024xbf16>
    %cst_80 = arith.constant dense<0.000000e+00> : vector<2x1024xf32>
    %398 = tpu.matmul %396, %397, %cst_80 {dimension_numbers = #tpu.dot_dimension_numbers<[1], [0], [0], [1], [0, 0, 1, 1], [], []>} : vector<2x256xbf16>, vector<256x1024xbf16>, vector<2x1024xf32> -> vector<2x1024xf32>
    %399 = vector.extract_strided_slice %398 {offsets = [0, 0], sizes = [2, 512], strides = [1, 1]} : vector<2x1024xf32> to vector<2x512xf32>
    %400 = vector.extract_strided_slice %398 {offsets = [0, 512], sizes = [2, 512], strides = [1, 1]} : vector<2x1024xf32> to vector<2x512xf32>
    %401 = arith.addf %400, %9 : vector<2x512xf32>
    %402 = vector.extract_strided_slice %401 {offsets = [0, 0], sizes = [2, 128], strides = [1, 1]} : vector<2x512xf32> to vector<2x128xf32>
    %403 = arith.negf %402 : vector<2x128xf32>
    %404 = math.exp %403 : vector<2x128xf32>
    %cst_81 = arith.constant 1.000000e+00 : f32
    %405 = vector.broadcast %cst_81 : f32 to vector<2x128xf32>
    %406 = arith.addf %405, %404 : vector<2x128xf32>
    %407 = arith.divf %405, %406 : vector<2x128xf32>
    %408 = vector.extract_strided_slice %401 {offsets = [0, 128], sizes = [2, 128], strides = [1, 1]} : vector<2x512xf32> to vector<2x128xf32>
    %409 = arith.negf %408 : vector<2x128xf32>
    %410 = math.exp %409 : vector<2x128xf32>
    %cst_82 = arith.constant 1.000000e+00 : f32
    %411 = vector.broadcast %cst_82 : f32 to vector<2x128xf32>
    %412 = arith.addf %411, %410 : vector<2x128xf32>
    %413 = arith.divf %411, %412 : vector<2x128xf32>
    %414 = vector.extract_strided_slice %401 {offsets = [0, 256], sizes = [2, 128], strides = [1, 1]} : vector<2x512xf32> to vector<2x128xf32>
    %415 = math.tanh %414 : vector<2x128xf32>
    %416 = vector.extract_strided_slice %401 {offsets = [0, 384], sizes = [2, 128], strides = [1, 1]} : vector<2x512xf32> to vector<2x128xf32>
    %417 = arith.negf %416 : vector<2x128xf32>
    %418 = math.exp %417 : vector<2x128xf32>
    %cst_83 = arith.constant 1.000000e+00 : f32
    %419 = vector.broadcast %cst_83 : f32 to vector<2x128xf32>
    %420 = arith.addf %419, %418 : vector<2x128xf32>
    %421 = arith.divf %419, %420 : vector<2x128xf32>
    %422 = arith.mulf %413, %365 : vector<2x128xf32>
    %423 = arith.mulf %407, %415 : vector<2x128xf32>
    %424 = arith.addf %422, %423 : vector<2x128xf32>
    %425 = math.tanh %424 : vector<2x128xf32>
    %426 = arith.mulf %421, %425 : vector<2x128xf32>
    %c14 = arith.constant 14 : index
    %c0_84 = arith.constant 0 : index
    %427 = vector.load %arg9[%c14, %c0_84] : memref<16x512xf32, #tpu.memory_space<vmem>>, vector<2x512xf32>
    %428 = arith.addf %427, %399 : vector<2x512xf32>
    %429 = vector.extract_strided_slice %428 {offsets = [0, 0], sizes = [2, 128], strides = [1, 1]} : vector<2x512xf32> to vector<2x128xf32>
    %430 = arith.negf %429 : vector<2x128xf32>
    %431 = math.exp %430 : vector<2x128xf32>
    %cst_85 = arith.constant 1.000000e+00 : f32
    %432 = vector.broadcast %cst_85 : f32 to vector<2x128xf32>
    %433 = arith.addf %432, %431 : vector<2x128xf32>
    %434 = arith.divf %432, %433 : vector<2x128xf32>
    %435 = vector.extract_strided_slice %428 {offsets = [0, 128], sizes = [2, 128], strides = [1, 1]} : vector<2x512xf32> to vector<2x128xf32>
    %436 = arith.negf %435 : vector<2x128xf32>
    %437 = math.exp %436 : vector<2x128xf32>
    %cst_86 = arith.constant 1.000000e+00 : f32
    %438 = vector.broadcast %cst_86 : f32 to vector<2x128xf32>
    %439 = arith.addf %438, %437 : vector<2x128xf32>
    %440 = arith.divf %438, %439 : vector<2x128xf32>
    %441 = vector.extract_strided_slice %428 {offsets = [0, 256], sizes = [2, 128], strides = [1, 1]} : vector<2x512xf32> to vector<2x128xf32>
    %442 = math.tanh %441 : vector<2x128xf32>
    %443 = vector.extract_strided_slice %428 {offsets = [0, 384], sizes = [2, 128], strides = [1, 1]} : vector<2x512xf32> to vector<2x128xf32>
    %444 = arith.negf %443 : vector<2x128xf32>
    %445 = math.exp %444 : vector<2x128xf32>
    %cst_87 = arith.constant 1.000000e+00 : f32
    %446 = vector.broadcast %cst_87 : f32 to vector<2x128xf32>
    %447 = arith.addf %446, %445 : vector<2x128xf32>
    %448 = arith.divf %446, %447 : vector<2x128xf32>
    %449 = arith.mulf %440, %392 : vector<2x128xf32>
    %450 = arith.mulf %434, %442 : vector<2x128xf32>
    %451 = arith.addf %449, %450 : vector<2x128xf32>
    %452 = math.tanh %451 : vector<2x128xf32>
    %453 = arith.mulf %448, %452 : vector<2x128xf32>
    %454 = tpu.concatenate %453, %426 in 1 : vector<2x128xf32>, vector<2x128xf32> -> vector<2x256xf32>
    %455 = arith.truncf %454 : vector<2x256xf32> to vector<2x256xbf16>
    %c0_88 = arith.constant 0 : index
    %c0_89 = arith.constant 0 : index
    %456 = vector.load %arg8[%c0_88, %c0_89] : memref<256x1024xbf16, #tpu.memory_space<vmem>>, vector<256x1024xbf16>
    %cst_90 = arith.constant dense<0.000000e+00> : vector<2x1024xf32>
    %457 = tpu.matmul %455, %456, %cst_90 {dimension_numbers = #tpu.dot_dimension_numbers<[1], [0], [0], [1], [0, 0, 1, 1], [], []>} : vector<2x256xbf16>, vector<256x1024xbf16>, vector<2x1024xf32> -> vector<2x1024xf32>
    %458 = vector.extract_strided_slice %457 {offsets = [0, 512], sizes = [2, 512], strides = [1, 1]} : vector<2x1024xf32> to vector<2x512xf32>
    %459 = arith.addf %458, %9 : vector<2x512xf32>
    %460 = vector.extract_strided_slice %459 {offsets = [0, 0], sizes = [2, 128], strides = [1, 1]} : vector<2x512xf32> to vector<2x128xf32>
    %461 = arith.negf %460 : vector<2x128xf32>
    %462 = math.exp %461 : vector<2x128xf32>
    %cst_91 = arith.constant 1.000000e+00 : f32
    %463 = vector.broadcast %cst_91 : f32 to vector<2x128xf32>
    %464 = arith.addf %463, %462 : vector<2x128xf32>
    %465 = arith.divf %463, %464 : vector<2x128xf32>
    %466 = vector.extract_strided_slice %459 {offsets = [0, 128], sizes = [2, 128], strides = [1, 1]} : vector<2x512xf32> to vector<2x128xf32>
    %467 = arith.negf %466 : vector<2x128xf32>
    %468 = math.exp %467 : vector<2x128xf32>
    %cst_92 = arith.constant 1.000000e+00 : f32
    %469 = vector.broadcast %cst_92 : f32 to vector<2x128xf32>
    %470 = arith.addf %469, %468 : vector<2x128xf32>
    %471 = arith.divf %469, %470 : vector<2x128xf32>
    %472 = vector.extract_strided_slice %459 {offsets = [0, 256], sizes = [2, 128], strides = [1, 1]} : vector<2x512xf32> to vector<2x128xf32>
    %473 = math.tanh %472 : vector<2x128xf32>
    %474 = vector.extract_strided_slice %459 {offsets = [0, 384], sizes = [2, 128], strides = [1, 1]} : vector<2x512xf32> to vector<2x128xf32>
    %475 = arith.negf %474 : vector<2x128xf32>
    %476 = math.exp %475 : vector<2x128xf32>
    %cst_93 = arith.constant 1.000000e+00 : f32
    %477 = vector.broadcast %cst_93 : f32 to vector<2x128xf32>
    %478 = arith.addf %477, %476 : vector<2x128xf32>
    %479 = arith.divf %477, %478 : vector<2x128xf32>
    %480 = arith.mulf %471, %424 : vector<2x128xf32>
    %481 = arith.mulf %465, %473 : vector<2x128xf32>
    %482 = arith.addf %480, %481 : vector<2x128xf32>
    %483 = math.tanh %482 : vector<2x128xf32>
    %484 = arith.mulf %479, %483 : vector<2x128xf32>
    %c0_94 = arith.constant 0 : index
    %c0_95 = arith.constant 0 : index
    %485 = vector.load %arg5[%c0_94, %c0_95] : memref<1x128xf32, #tpu.memory_space<vmem>>, vector<1x128xf32>
    %486 = vector.broadcast %485 : vector<1x128xf32> to vector<2x128xf32>
    %487 = arith.mulf %484, %486 : vector<2x128xf32>
    %cst_96 = arith.constant dense<0.000000e+00> : vector<2xf32>
    %488 = vector.multi_reduction <add>, %487, %cst_96 [1] : vector<2x128xf32> to vector<2xf32>
    %489 = vector.shape_cast %488 : vector<2xf32> to vector<2x1xf32>
    %c0_97 = arith.constant 0 : index
    %c0_98 = arith.constant 0 : index
    %490 = vector.load %arg6[%c0_97, %c0_98] : memref<1x1xf32, #tpu.memory_space<vmem>>, vector<1x1xf32>
    %491 = vector.broadcast %490 : vector<1x1xf32> to vector<2x1xf32>
    %492 = arith.addf %489, %491 : vector<2x1xf32>
    %cst_99 = arith.constant 0.000000e+00 : f32
    %493 = vector.broadcast %cst_99 : f32 to vector<2x1xf32>
    %494 = arith.maximumf %492, %493 : vector<2x1xf32>
    %c0_100 = arith.constant 0 : index
    %c0_101 = arith.constant 0 : index
    %495 = vector.load %arg7[%c0_100, %c0_101] : memref<2x1xf32, #tpu.memory_space<vmem>>, vector<2x1xf32>
    tpu.vector_store %arg7[%c0_100, %c0_101], %494 {strides = array<i32>} : memref<2x1xf32, #tpu.memory_space<vmem>>, vector<2x1xf32>,
    return
  }
}

</mosaic_0001>

<bundles_post_ra>
// kernel: net_forward.1
= control target key start
LH: loop header
LB: loop body
LE: loop exit
PB: predicated region body
PF: predicated region fallthrough
CT: control target
= control target key end

     0   :  { %s4627_s0 = inlined_call_operand.vmem [shape: bf16[16,8], index: 0, kind: input, shape index: {}]   ;;  %s4628_s1 = inlined_call_operand.vmem [shape: bf16[8,512], index: 1, kind: input, shape index: {}]   ;;  %s4629_s2 = inlined_call_operand.vmem [shape: f32[1,512], index: 2, kind: input, shape index: {}]   ;;  %s4630_s3 = inlined_call_operand.hbm [shape: bf16[256,1024], index: 3, kind: input, shape index: {}]   ;;  %s4631_s4 = inlined_call_operand.vmem [shape: f32[1,512], index: 4, kind: input, shape index: {}]   ;;  %s4632_s5 = inlined_call_operand.vmem [shape: f32[1,128], index: 5, kind: input, shape index: {}]   ;;  %s4633_s6 = inlined_call_operand.<no memory space> [shape: f32[1,1], index: 6, kind: input, shape index: {}]   ;;  %s4634_s7 = inlined_call_operand.vmem [shape: f32[2,1], index: 7, kind: output, shape index: {}]  }
   0x1   :  { %v12_v0 = vstv %s4633_s6 }
   0x2   :  { %13 = vst [vmem:[#allocation5] sm:$0x1] %v12_v0 }
   0x3   :  { %s31_s26 = sld [smem:[#allocation0]]   ;;  %s2867_s27 = smov [#allocation2]   ;;  %v2868_v1 = vmov 0   ;;  %vm107_vm0 = vcmask 1043456   ;;  %vm103_vm1 = vcmask 64512   ;;  %v68_v11 = vlaneseq }
   0x4   :  { %s2922_s28 = sshll.u32 %s2867_s27, 4  ;;  %152 = vmatprep.mubr.bf16.mxu0 %v2868_v1  ;;  %195 = vmatprep.mubr.bf16.mxu1 %v2868_v1  ;;  %s2869_s29 = smov 1024   ;;  %s40_s28 = int_to_ptr.vmem [resolvable:$true] %s2922_s28 }
   0x5   :  { %43 = sst [smem:[#allocation7]] %s2869_s29  ;;  %s2870_s30 = smov 8   ;;  %v69_v12 = vshrl.u32 %v68_v11, 7 }
   0x6   :  { %45 = sst [smem:[#allocation7 + $0x1]] %s2869_s29  ;;  %s2871_s8 = smov 64  }
   0x7   :  { %47 = sst [smem:[#allocation7 + $0x2]] %s2870_s30  ;;  %s2872_s10 = smov 128   ;;  %v70_v13 = vsub.s32 0, %v69_v12  ;;  %v74_v16 = vsub.s32 1, %v69_v12  ;;  %v78_v18 = vsub.s32 2, %v69_v12  ;;  %v82_v20 = vsub.s32 3, %v69_v12 }
   0x8   :  { %49 = sst [smem:[#allocation7 + $0x3]] %s2871_s8  ;;  %s2873_s11 = smov 2  }
   0x9   :  { %s2274_s9 = sshll.u32 %s31_s26, 26  ;;  %51 = sst [smem:[#allocation7 + $0x4]] %s2872_s10 }
   0xa   :  { %s2275_s6 = sadd.s32 134217728, %s2274_s9  ;;  %53 = sst [smem:[#allocation7 + $0x5]] %s2873_s11 }
   0xb   :  { %s2874_s12 = smov 512   ;;  %57 = sst [smem:[#allocation7 + $0x7]] %s2871_s8 }
   0xc   :  { %55 = sst [smem:[#allocation7 + $0x6]] %s2874_s12  ;;  %s2875_s13 = smov 4  }
   0xd   :  { %59 = sst [smem:[#allocation7 + $0x8]] %s2875_s13  ;;  %s2876_s14 = smov [#allocation4]  }
   0xe   :  { %s2877_s15 = smov [#allocation6]  }
   0xf   :  { %61 = dma.general %s4630_s3, 16384, %s40_s28, %s2876_s14, %s2877_s15, [#allocation7], %s2275_s6, 0  }
  0x10   :  { %v64_v2 = vld [vmem:[%s4628_s1] sm:$0xff]  ;;  %v65_v5 = vld [vmem:[%s4628_s1 + $0x8] sm:$0xff] }
  0x11   :  { %v2278_v3 = vcombine.high %v64_v2, %v64_v2  ;;  %v2277_v4 = vcombine.low %v64_v2, %v64_v2  ;;  %v2280_v6 = vcombine.high %v65_v5, %v65_v5  ;;  %v2279_v7 = vcombine.low %v65_v5, %v65_v5  ;;  %v2350_v9 = vld [vmem:[%s4627_s0] sm:$0xff]  }
  0x12   :  { %v214_v14 = vld [vmem:[%s4631_s4] sm:$0xf] }
  0x13   :  { %2281 = vmatprep.subr.msk.bf16.mxu0 %vm107_vm0, %v2278_v3  ;;  %v109_v8 = vsel %vm107_vm0, %v2277_v4, 0  ;;  %2283 = vmatprep.subr.msk.bf16.mxu1 %vm107_vm0, %v2280_v6  ;;  %v115_v10 = vsel %vm107_vm0, %v2279_v7, 0  ;;  %v2940_v15 = vrot.slane %v214_v14, %v70_v13  ;;  %v2942_v17 = vrot.slane %v214_v14, %v74_v16  ;;  %v66_v22 = vld [vmem:[%s4629_s2] sm:$0xf] }
  0x14   :  { %121 = vmatpush1.bf16.msra.mxu0 %v109_v8  ;;  %164 = vmatpush1.bf16.msra.mxu1 %v115_v10  ;;  %v2944_v19 = vrot.slane %v214_v14, %v78_v18  ;;  %v2946_v21 = vrot.slane %v214_v14, %v82_v20  ;;  %v71_v23 = vrot.slane %v66_v22, %v70_v13 }
  0x15   :  { %4963 = vst [vmem:[#allocation9_spill] sm:$0xff] %v2940_v15  ;;  %4964 = vst [vmem:[#allocation10_spill] sm:$0xff] %v2942_v17  ;;  %v75_v24 = vrot.slane %v66_v22, %v74_v16  ;;  %v79_v25 = vrot.slane %v66_v22, %v78_v18  ;;  %v83_v26 = vrot.slane %v66_v22, %v82_v20 }
  0x16   :  { %4965 = vst [vmem:[#allocation11_spill] sm:$0xff] %v2944_v19  ;;  %4966 = vst [vmem:[#allocation12_spill] sm:$0xff] %v2946_v21 }
  0x17   :  { %2282 = vmatmul.mubr.msk.bf16.vlgmr.msra.gmra.mrb[0].mxu0 %vm103_vm1, %v2350_v9  ;;  %2284 = vmatmul.mubr.msk.bf16.vlgmr.msra.gmra.mrb[0].mxu1 %vm103_vm1, %v2350_v9 }
  0xea   :  { %v154_v27 = vpop.f32.mrb[0].mxu0  ;;  %v197_v30 = vpop.f32.mrb[0].mxu1 }
  0xeb   :  { %v155_v28 = vadd.f32 %v154_v27, %v71_v23  ;;  %v156_v29 = vpop.f32.mrb[1].mxu0  ;;  %v198_v33 = vadd.f32 %v197_v30, %v79_v25  ;;  %v199_v34 = vpop.f32.mrb[1].mxu1 }
  0xec   :  { %v157_v31 = vadd.f32 %v156_v29, %v75_v24  ;;  %v158_v32 = vpop.f32.mrb[2].mxu0  ;;  %v200_v37 = vadd.f32 %v199_v34, %v83_v26  ;;  %v201_v38 = vpop.f32.mrb[2].mxu1 }
  0xed   :  { %206 = vst [vmem:[#allocation3] sm:$0xff] %v155_v28  ;;  %v159_v35 = vadd.f32 %v158_v32, %v71_v23  ;;  %v160_v36 = vpop.f32.mrb[3].mxu0  ;;  %208 = vst [vmem:[#allocation3 + $0x10] sm:$0xff] %v198_v33  ;;  %v202_v40 = vadd.f32 %v201_v38, %v79_v25  ;;  %v203_v41 = vpop.f32.mrb[3].mxu1 }
  0xee   :  { %207 = vst [vmem:[#allocation3 + $0x8] sm:$0xff] %v157_v31  ;;  %v161_v39 = vadd.f32 %v160_v36, %v75_v24  ;;  %209 = vst [vmem:[#allocation3 + $0x18] sm:$0xff] %v200_v37  ;;  %v204_v42 = vadd.f32 %v203_v41, %v83_v26 }
  0xef   :  { %210 = vst [vmem:[#allocation3 + $0x20] sm:$0xff] %v159_v35  ;;  %212 = vst [vmem:[#allocation3 + $0x30] sm:$0xff] %v202_v40 }
  0xf0   :  { %211 = vst [vmem:[#allocation3 + $0x28] sm:$0xff] %v161_v39  ;;  %213 = vst [vmem:[#allocation3 + $0x38] sm:$0xff] %v204_v42 }
  0xf4   :  { %v236_v43 = vld [vmem:[#allocation3] sm:$0x3]  ;;  %v238_v49 = vld [vmem:[#allocation3 + $0x10] sm:$0x3] }
  0xf5   :  { %v2285_v44 = vmul.f32 -1.442695, %v236_v43  ;;  %v237_v45 = vld [vmem:[#allocation3 + $0x8] sm:$0x3]  ;;  %v239_v47 = vld [vmem:[#allocation3 + $0x18] sm:$0x3] }
  0xf6   :  { %v2286_v46 = vmul.f32 -1.442695, %v237_v45  ;;  %v2287_v48 = vmul.f32 -1.442695, %v239_v47 }
  0xf7   :  { %2353 = vpow2.f32 %v2285_v44 }
  0xf8   :  { %2355 = vpow2.f32 %v2286_v46 }
  0xf9   :  { %2357 = vpow2.f32 %v2287_v48 }
  0xfa   :  { %2359 = vtanh.f32 %v238_v49 }
 0x101   :  { %v2354_v50 = vpop.eup %2353 }
 0x102   :  { %v2356_v51 = vpop.eup %2355  ;;  %v247_v52 = vadd.f32 1.0, %v2354_v50 }
 0x103   :  { %v253_v53 = vadd.f32 1.0, %v2356_v51  ;;  %v2358_v54 = vpop.eup %2357 }
 0x104   :  { %2361 = vrcp.f32 %v247_v52  ;;  %v2360_v55 = vpop.eup %2359  ;;  %v260_v57 = vadd.f32 1.0, %v2358_v54 }
 0x105   :  { %2363 = vrcp.f32 %v253_v53 }
 0x106   :  { %2365 = vrcp.f32 %v260_v57 }
 0x10e   :  { %v2362_v56 = vpop.eup %2361 }
 0x10f   :  { %v2364_v58 = vpop.eup %2363  ;;  %v264_v59 = vmul.f32 %v2362_v56, %v2360_v55 }
 0x110   :  { %v263_v60 = vmul.f32 0.0, %v2364_v58  ;;  %v2366_v62 = vpop.eup %2365 }
 0x112   :  { %v2951_v61 = vadd.f32 %v264_v59, %v263_v60 }
 0x114   :  { %4967 = vst [vmem:[#allocation13_spill] sm:$0xff] %v2951_v61  ;;  %2367 = vtanh.f32 %v2951_v61 }
 0x11e   :  { %v2368_v63 = vpop.eup %2367 }
 0x11f   :  { %v2954_v0 = vmul.f32 %v2368_v63, %v2366_v62 }
 0x120   :  { %2865 = dma.done.wait [#allocation4], 16384 }
 0x121   :  { %2866 = vsyncadd [#allocation4], 4294950912  ;;  %v4635_v1 = vmov 0.0|0.0   ;;  %v2958_v2 = vld [vmem:[#allocation2 + $0x8] sm:$0xff]  ;;  %v2960_v3 = vld [vmem:[#allocation2] sm:$0xff]  ;;  %vm2249_vm2 = vcmask 1041408  }
 0x122   :  { %434 = vmatprep.mubr.bf16.mxu0 %v4635_v1  ;;  %475 = vmatprep.mubr.bf16.mxu1 %v4635_v1  ;;  %v2962_v4 = vld [vmem:[#allocation2 + $0x48] sm:$0xff]  ;;  %v2966_v5 = vld [vmem:[#allocation2 + $0x18] sm:$0xff]  ;;  %v2969_v6 = vld [vmem:[#allocation2 + $0x40] sm:$0xff]  ;;  %vm2262_vm3 = vcmask 1024  }
 0x123   :  { %402 = vmatprep.subr.bf16.mxu0 %v2958_v2  ;;  %443 = vmatprep.subr.bf16.mxu1 %v2966_v5  ;;  %v2972_v7 = vld [vmem:[#allocation2 + $0x10] sm:$0xff]  ;;  %v2974_v8 = vld [vmem:[#allocation2 + $0x58] sm:$0xff]  ;;  %v2976_v9 = vld [vmem:[#allocation2 + $0x88] sm:$0xff] }
 0x124   :  { %403 = vmatpush1.bf16.msra.mxu0 %v2960_v3  ;;  %444 = vmatpush1.bf16.msra.mxu1 %v2972_v7  ;;  %v2980_v10 = vld [vmem:[#allocation2 + $0x50] sm:$0xff]  ;;  %v2983_v11 = vld [vmem:[#allocation2 + $0x98] sm:$0xff]  ;;  %v2986_v12 = vld [vmem:[#allocation2 + $0x80] sm:$0xff] }
 0x125   :  { %404 = vmatprep.subr.bf16.mxu0 %v2962_v4  ;;  %445 = vmatprep.subr.bf16.mxu1 %v2974_v8  ;;  %v2988_v13 = vld [vmem:[#allocation2 + $0xc8] sm:$0xff]  ;;  %v2992_v14 = vld [vmem:[#allocation2 + $0x90] sm:$0xff]  ;;  %v2995_v16 = vld [vmem:[#allocation2 + $0xd8] sm:$0xff] }
 0x126   :  { %v2998_v18 = vld [vmem:[#allocation2 + $0xc0] sm:$0xff]  ;;  %v3000_v20 = vld [vmem:[#allocation2 + $0x108] sm:$0xff]  ;;  %v3004_v22 = vld [vmem:[#allocation2 + $0xd0] sm:$0xff] }
 0x127   :  { %v3007_v23 = vld [vmem:[#allocation2 + $0x118] sm:$0xff]  ;;  %v3010_v24 = vld [vmem:[#allocation2 + $0x100] sm:$0xff]  ;;  %v3012_v25 = vld [vmem:[#allocation2 + $0x148] sm:$0xff] }
 0x128   :  { %405 = vmatpush1.bf16.msra.mxu0 %v2969_v6  ;;  %446 = vmatpush1.bf16.msra.mxu1 %v2980_v10  ;;  %v3016_v26 = vld [vmem:[#allocation2 + $0x110] sm:$0xff]  ;;  %v3019_v27 = vld [vmem:[#allocation2 + $0x158] sm:$0xff]  ;;  %v3022_v28 = vld [vmem:[#allocation2 + $0x140] sm:$0xff] }
 0x129   :  { %406 = vmatprep.subr.bf16.mxu0 %v2976_v9  ;;  %447 = vmatprep.subr.bf16.mxu1 %v2983_v11  ;;  %v3024_v29 = vld [vmem:[#allocation2 + $0x188] sm:$0xff]  ;;  %v3028_v30 = vld [vmem:[#allocation2 + $0x150] sm:$0xff]  ;;  %v3031_v31 = vld [vmem:[#allocation2 + $0x198] sm:$0xff] }
 0x12a   :  { %v3034_v32 = vld [vmem:[#allocation2 + $0x180] sm:$0xff]  ;;  %v3036_v33 = vld [vmem:[#allocation2 + $0x1c8] sm:$0xff]  ;;  %v3040_v34 = vld [vmem:[#allocation2 + $0x190] sm:$0xff] }
 0x12b   :  { %v3043_v35 = vld [vmem:[#allocation2 + $0x1d8] sm:$0xff]  ;;  %v3046_v36 = vld [vmem:[#allocation2 + $0x1c0] sm:$0xff]  ;;  %v3048_v37 = vld [vmem:[#allocation2 + $0x208] sm:$0xff] }
 0x12c   :  { %407 = vmatpush1.bf16.msra.mxu0 %v2986_v12  ;;  %448 = vmatpush1.bf16.msra.mxu1 %v2992_v14  ;;  %v3052_v38 = vld [vmem:[#allocation2 + $0x1d0] sm:$0xff]  ;;  %v3055_v39 = vld [vmem:[#allocation2 + $0x218] sm:$0xff]  ;;  %v3058_v40 = vld [vmem:[#allocation2 + $0x200] sm:$0xff] }
 0x12d   :  { %408 = vmatprep.subr.bf16.mxu0 %v2988_v13  ;;  %449 = vmatprep.subr.bf16.mxu1 %v2995_v16  ;;  %4968 = vst [vmem:[#allocation14_spill] sm:$0xff] %v3055_v39  ;;  %4969 = vst [vmem:[#allocation15_spill] sm:$0xff] %v3058_v40  ;;  %v3060_v41 = vld [vmem:[#allocation2 + $0x248] sm:$0xff]  ;;  %v3064_v42 = vld [vmem:[#allocation2 + $0x210] sm:$0xff] }
 0x12e   :  { %4970 = vst [vmem:[#allocation16_spill] sm:$0xff] %v3060_v41  ;;  %4971 = vst [vmem:[#allocation17_spill] sm:$0xff] %v3064_v42  ;;  %v3067_v43 = vld [vmem:[#allocation2 + $0x258] sm:$0xff]  ;;  %v3070_v44 = vld [vmem:[#allocation2 + $0x240] sm:$0xff] }
 0x12f   :  { %4972 = vst [vmem:[#allocation18_spill] sm:$0xff] %v3067_v43  ;;  %4973 = vst [vmem:[#allocation19_spill] sm:$0xff] %v3070_v44  ;;  %v3072_v45 = vld [vmem:[#allocation2 + $0x288] sm:$0xff]  ;;  %v3076_v46 = vld [vmem:[#allocation2 + $0x250] sm:$0xff] }
 0x130   :  { %409 = vmatpush1.bf16.msra.mxu0 %v2998_v18  ;;  %450 = vmatpush1.bf16.msra.mxu1 %v3004_v22  ;;  %4974 = vst [vmem:[#allocation20_spill] sm:$0xff] %v3072_v45  ;;  %4975 = vst [vmem:[#allocation21_spill] sm:$0xff] %v3076_v46  ;;  %v3079_v47 = vld [vmem:[#allocation2 + $0x298] sm:$0xff]  ;;  %v3082_v48 = vld [vmem:[#allocation2 + $0x280] sm:$0xff] }
 0x131   :  { %410 = vmatprep.subr.bf16.mxu0 %v3000_v20  ;;  %451 = vmatprep.subr.bf16.mxu1 %v3007_v23  ;;  %4976 = vst [vmem:[#allocation22_spill] sm:$0xff] %v3079_v47  ;;  %4977 = vst [vmem:[#allocation23_spill] sm:$0xff] %v3082_v48  ;;  %v3084_v49 = vld [vmem:[#allocation2 + $0x2c8] sm:$0xff]  ;;  %v3088_v50 = vld [vmem:[#allocation2 + $0x290] sm:$0xff] }
 0x132   :  { %4978 = vst [vmem:[#allocation24_spill] sm:$0xff] %v3084_v49  ;;  %4979 = vst [vmem:[#allocation25_spill] sm:$0xff] %v3088_v50  ;;  %v3091_v51 = vld [vmem:[#allocation2 + $0x2d8] sm:$0xff]  ;;  %v3094_v52 = vld [vmem:[#allocation2 + $0x2c0] sm:$0xff] }
 0x133   :  { %4980 = vst [vmem:[#allocation26_spill] sm:$0xff] %v3091_v51  ;;  %4981 = vst [vmem:[#allocation27_spill] sm:$0xff] %v3094_v52  ;;  %v3096_v53 = vld [vmem:[#allocation2 + $0x308] sm:$0xff]  ;;  %v3100_v54 = vld [vmem:[#allocation2 + $0x2d0] sm:$0xff] }
 0x134   :  { %411 = vmatpush1.bf16.msra.mxu0 %v3010_v24  ;;  %452 = vmatpush1.bf16.msra.mxu1 %v3016_v26  ;;  %4982 = vst [vmem:[#allocation28_spill] sm:$0xff] %v3096_v53  ;;  %4983 = vst [vmem:[#allocation29_spill] sm:$0xff] %v3100_v54  ;;  %v3103_v55 = vld [vmem:[#allocation2 + $0x318] sm:$0xff]  ;;  %v3106_v56 = vld [vmem:[#allocation2 + $0x300] sm:$0xff] }
 0x135   :  { %412 = vmatprep.subr.bf16.mxu0 %v3012_v25  ;;  %453 = vmatprep.subr.bf16.mxu1 %v3019_v27  ;;  %4984 = vst [vmem:[#allocation30_spill] sm:$0xff] %v3103_v55  ;;  %4985 = vst [vmem:[#allocation31_spill] sm:$0xff] %v3106_v56  ;;  %v3108_v57 = vld [vmem:[#allocation2 + $0x348] sm:$0xff]  ;;  %v3112_v58 = vld [vmem:[#allocation2 + $0x310] sm:$0xff] }
 0x136   :  { %4986 = vst [vmem:[#allocation32_spill] sm:$0xff] %v3108_v57  ;;  %4987 = vst [vmem:[#allocation33_spill] sm:$0xff] %v3112_v58  ;;  %v3115_v59 = vld [vmem:[#allocation2 + $0x358] sm:$0xff]  ;;  %v3118_v60 = vld [vmem:[#allocation2 + $0x340] sm:$0xff] }
 0x137   :  { %4988 = vst [vmem:[#allocation34_spill] sm:$0xff] %v3115_v59  ;;  %4989 = vst [vmem:[#allocation35_spill] sm:$0xff] %v3118_v60  ;;  %v3120_v62 = vld [vmem:[#allocation2 + $0x388] sm:$0xff]  ;;  %v3124_v63 = vld [vmem:[#allocation2 + $0x350] sm:$0xff] }
 0x138   :  { %413 = vmatpush1.bf16.msra.mxu0 %v3022_v28  ;;  %454 = vmatpush1.bf16.msra.mxu1 %v3028_v30  ;;  %4990 = vst [vmem:[#allocation36_spill] sm:$0xff] %v3120_v62  ;;  %4991 = vst [vmem:[#allocation37_spill] sm:$0xff] %v3124_v63  ;;  %v3127_v1 = vld [vmem:[#allocation2 + $0x398] sm:$0xff]  ;;  %v3130_v19 = vld [vmem:[#allocation2 + $0x380] sm:$0xff] }
 0x139   :  { %414 = vmatprep.subr.bf16.mxu0 %v3024_v29  ;;  %455 = vmatprep.subr.bf16.mxu1 %v3031_v31  ;;  %4992 = vst [vmem:[#allocation38_spill] sm:$0xff] %v3127_v1  ;;  %4993 = vst [vmem:[#allocation39_spill] sm:$0xff] %v3130_v19  ;;  %v3132_v21 = vld [vmem:[#allocation2 + $0x3c8] sm:$0xff]  ;;  %v3136_v17 = vld [vmem:[#allocation2 + $0x390] sm:$0xff] }
 0x13a   :  { %4994 = vst [vmem:[#allocation40_spill] sm:$0xff] %v3132_v21  ;;  %4995 = vst [vmem:[#allocation41_spill] sm:$0xff] %v3136_v17  ;;  %v3139_v15 = vld [vmem:[#allocation2 + $0x3d8] sm:$0xff]  ;;  %v3142_v61 = vld [vmem:[#allocation2 + $0x3c0] sm:$0xff] }
 0x13b   :  { %4996 = vst [vmem:[#allocation42_spill] sm:$0xff] %v3139_v15  ;;  %4997 = vst [vmem:[#allocation43_spill] sm:$0xff] %v3142_v61 }
 0x13c   :  { %415 = vmatpush1.bf16.msra.mxu0 %v3034_v32  ;;  %456 = vmatpush1.bf16.msra.mxu1 %v3040_v34 }
 0x13d   :  { %416 = vmatprep.subr.bf16.mxu0 %v3036_v33  ;;  %457 = vmatprep.subr.bf16.mxu1 %v3043_v35 }
 0x140   :  { %417 = vmatpush1.bf16.msra.mxu0 %v3046_v36  ;;  %458 = vmatpush1.bf16.msra.mxu1 %v3052_v38 }
 0x141   :  { %418 = vmatprep.subr.bf16.mxu0 %v3048_v37  ;;  %459 = vmatprep.subr.bf16.mxu1 %v3055_v39 }
 0x144   :  { %419 = vmatpush1.bf16.msra.mxu0 %v3058_v40  ;;  %460 = vmatpush1.bf16.msra.mxu1 %v3064_v42 }
 0x145   :  { %420 = vmatprep.subr.bf16.mxu0 %v3060_v41  ;;  %461 = vmatprep.subr.bf16.mxu1 %v3067_v43 }
 0x148   :  { %421 = vmatpush1.bf16.msra.mxu0 %v3070_v44  ;;  %462 = vmatpush1.bf16.msra.mxu1 %v3076_v46 }
 0x149   :  { %422 = vmatprep.subr.bf16.mxu0 %v3072_v45  ;;  %463 = vmatprep.subr.bf16.mxu1 %v3079_v47 }
 0x14c   :  { %423 = vmatpush1.bf16.msra.mxu0 %v3082_v48  ;;  %464 = vmatpush1.bf16.msra.mxu1 %v3088_v50 }
 0x14d   :  { %424 = vmatprep.subr.bf16.mxu0 %v3084_v49  ;;  %465 = vmatprep.subr.bf16.mxu1 %v3091_v51 }
 0x150   :  { %425 = vmatpush1.bf16.msra.mxu0 %v3094_v52  ;;  %466 = vmatpush1.bf16.msra.mxu1 %v3100_v54 }
 0x151   :  { %426 = vmatprep.subr.bf16.mxu0 %v3096_v53  ;;  %467 = vmatprep.subr.bf16.mxu1 %v3103_v55 }
 0x154   :  { %427 = vmatpush1.bf16.msra.mxu0 %v3106_v56  ;;  %468 = vmatpush1.bf16.msra.mxu1 %v3112_v58 }
 0x155   :  { %428 = vmatprep.subr.bf16.mxu0 %v3108_v57  ;;  %469 = vmatprep.subr.bf16.mxu1 %v3115_v59 }
 0x158   :  { %429 = vmatpush1.bf16.msra.mxu0 %v3118_v60  ;;  %470 = vmatpush1.bf16.msra.mxu1 %v3124_v63  ;;  %v3144_v60 = vld [vmem:[#allocation2 + $0x28] sm:$0xff] }
 0x159   :  { %430 = vmatprep.subr.bf16.mxu0 %v3120_v62  ;;  %471 = vmatprep.subr.bf16.mxu1 %v3127_v1  ;;  %4998 = vst [vmem:[#allocation44_spill] sm:$0xff] %v3144_v60  ;;  %v3149_v62 = vpack.c.bf16 %v2954_v0, %v2954_v0  ;;  %v3152_v1 = vld [vmem:[#allocation2 + $0x3d0] sm:$0xff]  ;;  %v3160_v63 = vld [vmem:[#allocation2 + $0x68] sm:$0xff] }
 0x15a   :  { %4999 = vst [vmem:[#allocation45_spill] sm:$0xff] %v3152_v1  ;;  %5002 = vst [vmem:[#allocation48_spill] sm:$0xff] %v3160_v63  ;;  %v3165_v0 = vld [vmem:[#allocation2 + $0x30] sm:$0xff] }
 0x15b   :  { %5003 = vst [vmem:[#allocation49_spill] sm:$0xff] %v3165_v0 }
 0x15c   :  { %431 = vmatpush1.bf16.msra.mxu0 %v3130_v19  ;;  %472 = vmatpush1.bf16.msra.mxu1 %v3136_v17  ;;  %v3155_v19 = vld [vmem:[#allocation2 + $0x38] sm:$0xff]  ;;  %v3175_v17 = vld [vmem:[#allocation2 + $0xa8] sm:$0xff] }
 0x15d   :  { %432 = vmatprep.subr.bf16.mxu0 %v3132_v21  ;;  %473 = vmatprep.subr.bf16.mxu1 %v3139_v15  ;;  %5000 = vst [vmem:[#allocation46_spill] sm:$0xff] %v3155_v19  ;;  %v3158_v21 = vld [vmem:[#allocation2 + $0x20] sm:$0xff]  ;;  %v3168_v15 = vld [vmem:[#allocation2 + $0x78] sm:$0xff]  ;;  %5007 = vst [vmem:[#allocation52_spill] sm:$0xff] %v3175_v17 }
 0x15e   :  { %5001 = vst [vmem:[#allocation47_spill] sm:$0xff] %v3158_v21  ;;  %5004 = vst [vmem:[#allocation50_spill] sm:$0xff] %v3168_v15 }
 0x160   :  { %433 = vmatpush1.bf16.msra.mxu0 %v3142_v61  ;;  %474 = vmatpush1.bf16.msra.mxu1 %v3152_v1  ;;  %v5005_v61 = vmov 0.0|0.0   ;;  %v3188_v1 = vld [vmem:[#allocation2 + $0xe8] sm:$0xff] }
 0x161   :  { %484 = vmatprep.subr.bf16.mxu0 %v3144_v60  ;;  %525 = vmatprep.subr.bf16.mxu1 %v3155_v19  ;;  %v3172_v60 = vld [vmem:[#allocation2 + $0x60] sm:$0xff]  ;;  %v3180_v19 = vld [vmem:[#allocation2 + $0x70] sm:$0xff]  ;;  %5011 = vst [vmem:[#allocation56_spill] sm:$0xff] %v3188_v1 }
 0x162   :  { %5006 = vst [vmem:[#allocation51_spill] sm:$0xff] %v3172_v60  ;;  %5008 = vst [vmem:[#allocation53_spill] sm:$0xff] %v3180_v19 }
 0x163   :  { %435 = vmatmul.mubr.bf16.vlgmr.msra.gmra.mrb[4].mxu0 %v3149_v62  ;;  %476 = vmatmul.mubr.bf16.vlgmr.msra.gmra.mrb[4].mxu1 %v3149_v62 }
 0x164   :  { %485 = vmatpush1.bf16.msra.mxu0 %v3158_v21  ;;  %516 = vmatprep.mubr.bf16.mxu0 %v5005_v61  ;;  %v3183_v21 = vld [vmem:[#allocation2 + $0xb8] sm:$0xff] }
 0x165   :  { %486 = vmatprep.subr.bf16.mxu0 %v3160_v63  ;;  %526 = vmatpush1.bf16.msra.mxu1 %v3165_v0  ;;  %5009 = vst [vmem:[#allocation54_spill] sm:$0xff] %v3183_v21  ;;  %v3186_v63 = vld [vmem:[#allocation2 + $0xa0] sm:$0xff]  ;;  %v3192_v0 = vld [vmem:[#allocation2 + $0xb0] sm:$0xff] }
 0x166   :  { %557 = vmatprep.mubr.bf16.mxu1 %v5005_v61  ;;  %527 = vmatprep.subr.bf16.mxu1 %v3168_v15  ;;  %5010 = vst [vmem:[#allocation55_spill] sm:$0xff] %v3186_v63  ;;  %5012 = vst [vmem:[#allocation57_spill] sm:$0xff] %v3192_v0  ;;  %v3195_v61 = vld [vmem:[#allocation2 + $0xf8] sm:$0xff]  ;;  %v3200_v15 = vld [vmem:[#allocation2 + $0x128] sm:$0xff] }
 0x167   :  { %5013 = vst [vmem:[#allocation58_spill] sm:$0xff] %v3195_v61  ;;  %5015 = vst [vmem:[#allocation60_spill] sm:$0xff] %v3200_v15 }
 0x168   :  { %487 = vmatpush1.bf16.msra.mxu0 %v3172_v60  ;;  %v3198_v60 = vld [vmem:[#allocation2 + $0xe0] sm:$0xff] }
 0x169   :  { %488 = vmatprep.subr.bf16.mxu0 %v3175_v17  ;;  %528 = vmatpush1.bf16.msra.mxu1 %v3180_v19  ;;  %5014 = vst [vmem:[#allocation59_spill] sm:$0xff] %v3198_v60  ;;  %v3204_v17 = vld [vmem:[#allocation2 + $0xf0] sm:$0xff]  ;;  %v3212_v19 = vld [vmem:[#allocation2 + $0x168] sm:$0xff] }
 0x16a   :  { %529 = vmatprep.subr.bf16.mxu1 %v3183_v21  ;;  %5016 = vst [vmem:[#allocation61_spill] sm:$0xff] %v3204_v17  ;;  %v3207_v21 = vld [vmem:[#allocation2 + $0x138] sm:$0xff]  ;;  %5019 = vst [vmem:[#allocation64_spill] sm:$0xff] %v3212_v19 }
 0x16b   :  { %5017 = vst [vmem:[#allocation62_spill] sm:$0xff] %v3207_v21 }
 0x16c   :  { %489 = vmatpush1.bf16.msra.mxu0 %v3186_v63  ;;  %v3210_v63 = vld [vmem:[#allocation2 + $0x120] sm:$0xff] }
 0x16d   :  { %490 = vmatprep.subr.bf16.mxu0 %v3188_v1  ;;  %530 = vmatpush1.bf16.msra.mxu1 %v3192_v0  ;;  %5018 = vst [vmem:[#allocation63_spill] sm:$0xff] %v3210_v63  ;;  %v3216_v1 = vld [vmem:[#allocation2 + $0x130] sm:$0xff]  ;;  %v3224_v0 = vld [vmem:[#allocation2 + $0x1a8] sm:$0xff] }
 0x16e   :  { %531 = vmatprep.subr.bf16.mxu1 %v3195_v61  ;;  %5020 = vst [vmem:[#allocation65_spill] sm:$0xff] %v3216_v1  ;;  %v3219_v61 = vld [vmem:[#allocation2 + $0x178] sm:$0xff]  ;;  %5023 = vst [vmem:[#allocation68_spill] sm:$0xff] %v3224_v0 }
 0x16f   :  { %5021 = vst [vmem:[#allocation66_spill] sm:$0xff] %v3219_v61 }
 0x170   :  { %491 = vmatpush1.bf16.msra.mxu0 %v3198_v60  ;;  %v3222_v60 = vld [vmem:[#allocation2 + $0x160] sm:$0xff] }
 0x171   :  { %492 = vmatprep.subr.bf16.mxu0 %v3200_v15  ;;  %532 = vmatpush1.bf16.msra.mxu1 %v3204_v17  ;;  %5022 = vst [vmem:[#allocation67_spill] sm:$0xff] %v3222_v60  ;;  %v3228_v15 = vld [vmem:[#allocation2 + $0x170] sm:$0xff]  ;;  %v3236_v17 = vld [vmem:[#allocation2 + $0x1e8] sm:$0xff] }
 0x172   :  { %533 = vmatprep.subr.bf16.mxu1 %v3207_v21  ;;  %5024 = vst [vmem:[#allocation69_spill] sm:$0xff] %v3228_v15  ;;  %v3231_v21 = vld [vmem:[#allocation2 + $0x1b8] sm:$0xff]  ;;  %5027 = vst [vmem:[#allocation72_spill] sm:$0xff] %v3236_v17 }
 0x173   :  { %5025 = vst [vmem:[#allocation70_spill] sm:$0xff] %v3231_v21 }
 0x174   :  { %493 = vmatpush1.bf16.msra.mxu0 %v3210_v63  ;;  %v3234_v63 = vld [vmem:[#allocation2 + $0x1a0] sm:$0xff] }
 0x175   :  { %494 = vmatprep.subr.bf16.mxu0 %v3212_v19  ;;  %534 = vmatpush1.bf16.msra.mxu1 %v3216_v1  ;;  %5026 = vst [vmem:[#allocation71_spill] sm:$0xff] %v3234_v63  ;;  %v3240_v19 = vld [vmem:[#allocation2 + $0x1b0] sm:$0xff]  ;;  %v3248_v1 = vld [vmem:[#allocation2 + $0x228] sm:$0xff] }
 0x176   :  { %535 = vmatprep.subr.bf16.mxu1 %v3219_v61  ;;  %5028 = vst [vmem:[#allocation73_spill] sm:$0xff] %v3240_v19  ;;  %v3243_v61 = vld [vmem:[#allocation2 + $0x1f8] sm:$0xff]  ;;  %5031 = vst [vmem:[#allocation76_spill] sm:$0xff] %v3248_v1 }
 0x177   :  { %5029 = vst [vmem:[#allocation74_spill] sm:$0xff] %v3243_v61 }
 0x178   :  { %495 = vmatpush1.bf16.msra.mxu0 %v3222_v60  ;;  %v3246_v60 = vld [vmem:[#allocation2 + $0x1e0] sm:$0xff] }
 0x179   :  { %496 = vmatprep.subr.bf16.mxu0 %v3224_v0  ;;  %536 = vmatpush1.bf16.msra.mxu1 %v3228_v15  ;;  %5030 = vst [vmem:[#allocation75_spill] sm:$0xff] %v3246_v60  ;;  %v3252_v0 = vld [vmem:[#allocation2 + $0x1f0] sm:$0xff]  ;;  %v3260_v15 = vld [vmem:[#allocation2 + $0x268] sm:$0xff] }
 0x17a   :  { %537 = vmatprep.subr.bf16.mxu1 %v3231_v21  ;;  %5032 = vst [vmem:[#allocation77_spill] sm:$0xff] %v3252_v0  ;;  %v3255_v21 = vld [vmem:[#allocation2 + $0x238] sm:$0xff]  ;;  %5035 = vst [vmem:[#allocation80_spill] sm:$0xff] %v3260_v15 }
 0x17b   :  { %5033 = vst [vmem:[#allocation78_spill] sm:$0xff] %v3255_v21 }
 0x17c   :  { %497 = vmatpush1.bf16.msra.mxu0 %v3234_v63  ;;  %v3258_v63 = vld [vmem:[#allocation2 + $0x220] sm:$0xff] }
 0x17d   :  { %498 = vmatprep.subr.bf16.mxu0 %v3236_v17  ;;  %538 = vmatpush1.bf16.msra.mxu1 %v3240_v19  ;;  %5034 = vst [vmem:[#allocation79_spill] sm:$0xff] %v3258_v63  ;;  %v3264_v17 = vld [vmem:[#allocation2 + $0x230] sm:$0xff]  ;;  %v3272_v19 = vld [vmem:[#allocation2 + $0x2a8] sm:$0xff] }
 0x17e   :  { %539 = vmatprep.subr.bf16.mxu1 %v3243_v61  ;;  %5036 = vst [vmem:[#allocation81_spill] sm:$0xff] %v3264_v17  ;;  %v3267_v61 = vld [vmem:[#allocation2 + $0x278] sm:$0xff]  ;;  %5039 = vst [vmem:[#allocation84_spill] sm:$0xff] %v3272_v19 }
 0x17f   :  { %5037 = vst [vmem:[#allocation82_spill] sm:$0xff] %v3267_v61 }
 0x180   :  { %499 = vmatpush1.bf16.msra.mxu0 %v3246_v60  ;;  %v3270_v60 = vld [vmem:[#allocation2 + $0x260] sm:$0xff] }
 0x181   :  { %500 = vmatprep.subr.bf16.mxu0 %v3248_v1  ;;  %540 = vmatpush1.bf16.msra.mxu1 %v3252_v0  ;;  %5038 = vst [vmem:[#allocation83_spill] sm:$0xff] %v3270_v60  ;;  %v3276_v1 = vld [vmem:[#allocation2 + $0x270] sm:$0xff]  ;;  %v3284_v0 = vld [vmem:[#allocation2 + $0x2e8] sm:$0xff] }
 0x182   :  { %541 = vmatprep.subr.bf16.mxu1 %v3255_v21  ;;  %5040 = vst [vmem:[#allocation85_spill] sm:$0xff] %v3276_v1  ;;  %v3279_v21 = vld [vmem:[#allocation2 + $0x2b8] sm:$0xff]  ;;  %5043 = vst [vmem:[#allocation88_spill] sm:$0xff] %v3284_v0 }
 0x183   :  { %5041 = vst [vmem:[#allocation86_spill] sm:$0xff] %v3279_v21 }
 0x184   :  { %501 = vmatpush1.bf16.msra.mxu0 %v3258_v63  ;;  %v3282_v63 = vld [vmem:[#allocation2 + $0x2a0] sm:$0xff] }
 0x185   :  { %502 = vmatprep.subr.bf16.mxu0 %v3260_v15  ;;  %542 = vmatpush1.bf16.msra.mxu1 %v3264_v17  ;;  %5042 = vst [vmem:[#allocation87_spill] sm:$0xff] %v3282_v63  ;;  %v3288_v15 = vld [vmem:[#allocation2 + $0x2b0] sm:$0xff]  ;;  %v3296_v17 = vld [vmem:[#allocation2 + $0x328] sm:$0xff] }
 0x186   :  { %543 = vmatprep.subr.bf16.mxu1 %v3267_v61  ;;  %5044 = vst [vmem:[#allocation89_spill] sm:$0xff] %v3288_v15  ;;  %v3291_v61 = vld [vmem:[#allocation2 + $0x2f8] sm:$0xff]  ;;  %5047 = vst [vmem:[#allocation92_spill] sm:$0xff] %v3296_v17 }
 0x187   :  { %5045 = vst [vmem:[#allocation90_spill] sm:$0xff] %v3291_v61 }
 0x188   :  { %503 = vmatpush1.bf16.msra.mxu0 %v3270_v60  ;;  %v3294_v60 = vld [vmem:[#allocation2 + $0x2e0] sm:$0xff] }
 0x189   :  { %504 = vmatprep.subr.bf16.mxu0 %v3272_v19  ;;  %544 = vmatpush1.bf16.msra.mxu1 %v3276_v1  ;;  %5046 = vst [vmem:[#allocation91_spill] sm:$0xff] %v3294_v60  ;;  %v3300_v19 = vld [vmem:[#allocation2 + $0x2f0] sm:$0xff]  ;;  %v3308_v1 = vld [vmem:[#allocation2 + $0x368] sm:$0xff] }
 0x18a   :  { %545 = vmatprep.subr.bf16.mxu1 %v3279_v21  ;;  %5048 = vst [vmem:[#allocation93_spill] sm:$0xff] %v3300_v19  ;;  %v3303_v21 = vld [vmem:[#allocation2 + $0x338] sm:$0xff]  ;;  %5051 = vst [vmem:[#allocation96_spill] sm:$0xff] %v3308_v1 }
 0x18b   :  { %5049 = vst [vmem:[#allocation94_spill] sm:$0xff] %v3303_v21 }
 0x18c   :  { %505 = vmatpush1.bf16.msra.mxu0 %v3282_v63  ;;  %v3306_v63 = vld [vmem:[#allocation2 + $0x320] sm:$0xff] }
 0x18d   :  { %506 = vmatprep.subr.bf16.mxu0 %v3284_v0  ;;  %546 = vmatpush1.bf16.msra.mxu1 %v3288_v15  ;;  %5050 = vst [vmem:[#allocation95_spill] sm:$0xff] %v3306_v63  ;;  %v3312_v0 = vld [vmem:[#allocation2 + $0x330] sm:$0xff]  ;;  %v3320_v15 = vld [vmem:[#allocation2 + $0x3a8] sm:$0xff] }
 0x18e   :  { %547 = vmatprep.subr.bf16.mxu1 %v3291_v61  ;;  %v3315_v61 = vld [vmem:[#allocation2 + $0x378] sm:$0xff]  ;;  %5054 = vst [vmem:[#allocation99_spill] sm:$0xff] %v3320_v15 }
 0x18f   :  { %5052 = vst [vmem:[#allocation97_spill] sm:$0xff] %v3315_v61 }
 0x190   :  { %507 = vmatpush1.bf16.msra.mxu0 %v3294_v60  ;;  %v3318_v60 = vld [vmem:[#allocation2 + $0x360] sm:$0xff] }
 0x191   :  { %508 = vmatprep.subr.bf16.mxu0 %v3296_v17  ;;  %548 = vmatpush1.bf16.msra.mxu1 %v3300_v19  ;;  %5053 = vst [vmem:[#allocation98_spill] sm:$0xff] %v3318_v60  ;;  %v3324_v17 = vld [vmem:[#allocation2 + $0x370] sm:$0xff]  ;;  %v3332_v19 = vld [vmem:[#allocation2 + $0x3e8] sm:$0xff] }
 0x192   :  { %549 = vmatprep.subr.bf16.mxu1 %v3303_v21  ;;  %v3327_v21 = vld [vmem:[#allocation2 + $0x3b8] sm:$0xff] }
 0x194   :  { %509 = vmatpush1.bf16.msra.mxu0 %v3306_v63  ;;  %v3330_v63 = vld [vmem:[#allocation2 + $0x3a0] sm:$0xff] }
 0x195   :  { %510 = vmatprep.subr.bf16.mxu0 %v3308_v1  ;;  %550 = vmatpush1.bf16.msra.mxu1 %v3312_v0  ;;  %v3336_v1 = vld [vmem:[#allocation2 + $0x3b0] sm:$0xff] }
 0x196   :  { %551 = vmatprep.subr.bf16.mxu1 %v3315_v61  ;;  %v3339_v61 = vld [vmem:[#allocation2 + $0x3f8] sm:$0xff] }
 0x198   :  { %511 = vmatpush1.bf16.msra.mxu0 %v3318_v60  ;;  %v3342_v60 = vld [vmem:[#allocation2 + $0x3e0] sm:$0xff] }
 0x199   :  { %512 = vmatprep.subr.bf16.mxu0 %v3320_v15  ;;  %552 = vmatpush1.bf16.msra.mxu1 %v3324_v17  ;;  %v3346_v15 = vld [vmem:[#allocation2 + $0x3f0] sm:$0xff] }
 0x19a   :  { %553 = vmatprep.subr.bf16.mxu1 %v3327_v21 }
 0x19c   :  { %513 = vmatpush1.bf16.msra.mxu0 %v3330_v63 }
 0x19d   :  { %514 = vmatprep.subr.bf16.mxu0 %v3332_v19  ;;  %554 = vmatpush1.bf16.msra.mxu1 %v3336_v1 }
 0x19e   :  { %555 = vmatprep.subr.bf16.mxu1 %v3339_v61 }
 0x1a0   :  { %515 = vmatpush1.bf16.msra.mxu0 %v3342_v60 }
 0x1a1   :  { %652 = vmatprep.subr.bf16.mxu0 %v2958_v2  ;;  %556 = vmatpush1.bf16.msra.mxu1 %v3346_v15 }
 0x1a2   :  { %693 = vmatprep.subr.bf16.mxu1 %v2966_v5 }
 0x1a3   :  { %517 = vmatmul.mubr.bf16.vlgmr.msra.gmra.mrb[8].mxu0 %v3149_v62 }
 0x1a4   :  { %653 = vmatpush1.bf16.msra.mxu0 %v2960_v3  ;;  %558 = vmatmul.mubr.bf16.vlgmr.msra.gmra.mrb[8].mxu1 %v3149_v62  ;;  %v5055_v62 = vld [vmem:[#allocation35_spill] sm:$0xff] }
 0x1a5   :  { %654 = vmatprep.subr.bf16.mxu0 %v2962_v4  ;;  %694 = vmatpush1.bf16.msra.mxu1 %v2972_v7 }
 0x1a6   :  { %695 = vmatprep.subr.bf16.mxu1 %v2974_v8 }
 0x1a8   :  { %655 = vmatpush1.bf16.msra.mxu0 %v2969_v6 }
 0x1a9   :  { %656 = vmatprep.subr.bf16.mxu0 %v2976_v9  ;;  %696 = vmatpush1.bf16.msra.mxu1 %v2980_v10 }
 0x1aa   :  { %697 = vmatprep.subr.bf16.mxu1 %v2983_v11 }
 0x1ac   :  { %657 = vmatpush1.bf16.msra.mxu0 %v2986_v12 }
 0x1ad   :  { %658 = vmatprep.subr.bf16.mxu0 %v2988_v13  ;;  %698 = vmatpush1.bf16.msra.mxu1 %v2992_v14 }
 0x1ae   :  { %699 = vmatprep.subr.bf16.mxu1 %v2995_v16 }
 0x1b0   :  { %659 = vmatpush1.bf16.msra.mxu0 %v2998_v18 }
 0x1b1   :  { %660 = vmatprep.subr.bf16.mxu0 %v3000_v20  ;;  %700 = vmatpush1.bf16.msra.mxu1 %v3004_v22 }
 0x1b2   :  { %701 = vmatprep.subr.bf16.mxu1 %v3007_v23 }
 0x1b4   :  { %661 = vmatpush1.bf16.msra.mxu0 %v3010_v24 }
 0x1b5   :  { %662 = vmatprep.subr.bf16.mxu0 %v3012_v25  ;;  %702 = vmatpush1.bf16.msra.mxu1 %v3016_v26 }
 0x1b6   :  { %703 = vmatprep.subr.bf16.mxu1 %v3019_v27 }
 0x1b8   :  { %663 = vmatpush1.bf16.msra.mxu0 %v3022_v28 }
 0x1b9   :  { %664 = vmatprep.subr.bf16.mxu0 %v3024_v29  ;;  %704 = vmatpush1.bf16.msra.mxu1 %v3028_v30 }
 0x1ba   :  { %705 = vmatprep.subr.bf16.mxu1 %v3031_v31 }
 0x1bc   :  { %665 = vmatpush1.bf16.msra.mxu0 %v3034_v32 }
 0x1bd   :  { %666 = vmatprep.subr.bf16.mxu0 %v3036_v33  ;;  %706 = vmatpush1.bf16.msra.mxu1 %v3040_v34 }
 0x1be   :  { %707 = vmatprep.subr.bf16.mxu1 %v3043_v35 }
 0x1c0   :  { %667 = vmatpush1.bf16.msra.mxu0 %v3046_v36 }
 0x1c1   :  { %668 = vmatprep.subr.bf16.mxu0 %v3048_v37  ;;  %708 = vmatpush1.bf16.msra.mxu1 %v3052_v38 }
 0x1c2   :  { %709 = vmatprep.subr.bf16.mxu1 %v3055_v39 }
 0x1c4   :  { %669 = vmatpush1.bf16.msra.mxu0 %v3058_v40 }
 0x1c5   :  { %670 = vmatprep.subr.bf16.mxu0 %v3060_v41  ;;  %710 = vmatpush1.bf16.msra.mxu1 %v3064_v42 }
 0x1c6   :  { %711 = vmatprep.subr.bf16.mxu1 %v3067_v43 }
 0x1c8   :  { %671 = vmatpush1.bf16.msra.mxu0 %v3070_v44 }
 0x1c9   :  { %672 = vmatprep.subr.bf16.mxu0 %v3072_v45  ;;  %712 = vmatpush1.bf16.msra.mxu1 %v3076_v46 }
 0x1ca   :  { %713 = vmatprep.subr.bf16.mxu1 %v3079_v47 }
 0x1cc   :  { %673 = vmatpush1.bf16.msra.mxu0 %v3082_v48  ;;  %v595_v48 = vld [vmem:[#allocation3 + $0x8] sm:$0xc] }
 0x1cd   :  { %674 = vmatprep.subr.bf16.mxu0 %v3084_v49  ;;  %714 = vmatpush1.bf16.msra.mxu1 %v3088_v50  ;;  %v5056_v49 = vld [vmem:[#allocation36_spill] sm:$0xff] }
 0x1ce   :  { %715 = vmatprep.subr.bf16.mxu1 %v3091_v51  ;;  %v5057_v51 = vld [vmem:[#allocation37_spill] sm:$0xff] }
 0x1d0   :  { %675 = vmatpush1.bf16.msra.mxu0 %v3094_v52  ;;  %v5058_v52 = vld [vmem:[#allocation38_spill] sm:$0xff] }
 0x1d1   :  { %676 = vmatprep.subr.bf16.mxu0 %v3096_v53  ;;  %716 = vmatpush1.bf16.msra.mxu1 %v3100_v54  ;;  %v5059_v53 = vld [vmem:[#allocation39_spill] sm:$0xff]  ;;  %v5060_v54 = vld [vmem:[#allocation40_spill] sm:$0xff] }
 0x1d2   :  { %717 = vmatprep.subr.bf16.mxu1 %v3103_v55  ;;  %v5061_v55 = vld [vmem:[#allocation41_spill] sm:$0xff] }
 0x1d4   :  { %677 = vmatpush1.bf16.msra.mxu0 %v3106_v56  ;;  %v5062_v56 = vld [vmem:[#allocation42_spill] sm:$0xff] }
 0x1d5   :  { %678 = vmatprep.subr.bf16.mxu0 %v3108_v57  ;;  %718 = vmatpush1.bf16.msra.mxu1 %v3112_v58  ;;  %v5063_v57 = vld [vmem:[#allocation43_spill] sm:$0xff]  ;;  %v5064_v58 = vld [vmem:[#allocation44_spill] sm:$0xff] }
 0x1d6   :  { %719 = vmatprep.subr.bf16.mxu1 %v3115_v59  ;;  %v5065_v59 = vld [vmem:[#allocation45_spill] sm:$0xff] }
 0x1d8   :  { %679 = vmatpush1.bf16.msra.mxu0 %v5055_v62  ;;  %v5066_v62 = vld [vmem:[#allocation46_spill] sm:$0xff] }
 0x1d9   :  { %680 = vmatprep.subr.bf16.mxu0 %v5056_v49  ;;  %720 = vmatpush1.bf16.msra.mxu1 %v5057_v51  ;;  %v594_v51 = vld [vmem:[#allocation3] sm:$0xc] }
 0x1da   :  { %721 = vmatprep.subr.bf16.mxu1 %v5058_v52 }
 0x1dc   :  { %681 = vmatpush1.bf16.msra.mxu0 %v5059_v53 }
 0x1dd   :  { %682 = vmatprep.subr.bf16.mxu0 %v5060_v54  ;;  %722 = vmatpush1.bf16.msra.mxu1 %v5061_v55 }
 0x1de   :  { %723 = vmatprep.subr.bf16.mxu1 %v5062_v56 }
 0x1e0   :  { %683 = vmatpush1.bf16.msra.mxu0 %v5063_v57 }
 0x1e1   :  { %734 = vmatprep.subr.bf16.mxu0 %v5064_v58  ;;  %724 = vmatpush1.bf16.msra.mxu1 %v5065_v59  ;;  %v597_v59 = vld [vmem:[#allocation3 + $0x18] sm:$0xc] }
 0x1e2   :  { %775 = vmatprep.subr.bf16.mxu1 %v5066_v62 }
 0x236   :  { %v436_v49 = vpop.f32.mrb[4].mxu0  ;;  %v477_v54 = vpop.f32.mrb[4].mxu1 }
 0x237   :  { %v602_v50 = vrot.slane %v436_v49, 6  ;;  %v438_v52 = vpop.f32.mrb[5].mxu0  ;;  %v479_v46 = vpop.f32.mrb[5].mxu1  ;;  %v604_v42 = vrot.slane %v477_v54, 6  ;;  %v596_v49 = vld [vmem:[#allocation3 + $0x10] sm:$0xc] }
 0x238   :  { %v603_v53 = vrot.slane %v438_v52, 6  ;;  %v440_v47 = vpop.f32.mrb[6].mxu0  ;;  %v481_v44 = vpop.f32.mrb[6].mxu1  ;;  %v605_v43 = vrot.slane %v479_v46, 6  ;;  %v5067_v46 = vld [vmem:[#allocation13_spill] sm:$0xff] }
 0x239   :  { %v610_v45 = vadd.f32 %v602_v50, %v594_v51  ;;  %v441_v55 = vpop.f32.mrb[7].mxu0  ;;  %v482_v58 = vpop.f32.mrb[7].mxu1  ;;  %v612_v39 = vadd.f32 %v604_v42, %v596_v49  ;;  %v5069_v49 = vld [vmem:[#allocation10_spill] sm:$0xff] }
 0x23a   :  { %v611_v56 = vadd.f32 %v603_v53, %v595_v48  ;;  %v613_v62 = vadd.f32 %v605_v43, %v597_v59  ;;  %v634_v48 = vrot.slane %v5067_v46, 6  ;;  %v5068_v58 = vld [vmem:[#allocation9_spill] sm:$0xff] }
 0x23b   :  { %v2291_v57 = vmul.f32 -1.442695, %v610_v45 }
 0x23c   :  { %v2292_v41 = vmul.f32 -1.442695, %v611_v56  ;;  %v2293_v40 = vmul.f32 -1.442695, %v613_v62 }
 0x23d   :  { %2369 = vpow2.f32 %v2291_v57 }
 0x23e   :  { %2371 = vpow2.f32 %v2292_v41 }
 0x23f   :  { %2373 = vpow2.f32 %v2293_v40 }
 0x240   :  { %2375 = vtanh.f32 %v612_v39 }
 0x247   :  { %v2370_v52 = vpop.eup %2369 }
 0x248   :  { %v2372_v47 = vpop.eup %2371  ;;  %v617_v50 = vadd.f32 1.0, %v2370_v52 }
 0x249   :  { %v623_v51 = vadd.f32 1.0, %v2372_v47  ;;  %v2374_v44 = vpop.eup %2373 }
 0x24a   :  { %2377 = vrcp.f32 %v617_v50  ;;  %v2376_v45 = vpop.eup %2375  ;;  %v630_v55 = vadd.f32 1.0, %v2374_v44 }
 0x24b   :  { %2379 = vrcp.f32 %v623_v51 }
 0x24c   :  { %2381 = vrcp.f32 %v630_v55  ;;  %v5070_v55 = vld [vmem:[#allocation12_spill] sm:$0xff] }
 0x254   :  { %v2378_v53 = vpop.eup %2377 }
 0x255   :  { %v2380_v41 = vpop.eup %2379  ;;  %v637_v43 = vmul.f32 %v2378_v53, %v2376_v45 }
 0x256   :  { %v636_v54 = vmul.f32 %v2380_v41, %v634_v48  ;;  %v2382_v40 = vpop.eup %2381 }
 0x258   :  { %v3419_v56 = vadd.f32 %v637_v43, %v636_v54  ;;  %v5071_v54 = vld [vmem:[#allocation11_spill] sm:$0xff] }
 0x25a   :  { %2383 = vtanh.f32 %v3419_v56 }
 0x264   :  { %v2384_v42 = vpop.eup %2383 }
 0x265   :  { %v640_v39 = vmul.f32 %v2384_v42, %v2382_v40 }
 0x276   :  { %v518_v57 = vpop.f32.mrb[8].mxu0 }
 0x277   :  { %v566_v59 = vadd.f32 %v518_v57, %v5068_v58  ;;  %v520_v62 = vpop.f32.mrb[9].mxu0  ;;  %v559_v50 = vpop.f32.mrb[8].mxu1 }
 0x278   :  { %v567_v52 = vadd.f32 %v520_v62, %v5069_v49  ;;  %v522_v47 = vpop.f32.mrb[10].mxu0  ;;  %v561_v45 = vpop.f32.mrb[9].mxu1  ;;  %v568_v40 = vadd.f32 %v559_v50, %v5071_v54 }
 0x279   :  { %v2288_v51 = vmul.f32 -1.442695, %v566_v59  ;;  %v523_v44 = vpop.f32.mrb[11].mxu0  ;;  %v563_v48 = vpop.f32.mrb[10].mxu1  ;;  %v569_v41 = vadd.f32 %v561_v45, %v5070_v55 }
 0x27a   :  { %v2289_v46 = vmul.f32 -1.442695, %v567_v52  ;;  %v564_v53 = vpop.f32.mrb[11].mxu1 }
 0x27b   :  { %2385 = vpow2.f32 %v2288_v51  ;;  %v2290_v43 = vmul.f32 -1.442695, %v569_v41 }
 0x27c   :  { %2387 = vpow2.f32 %v2289_v46 }
 0x27d   :  { %2389 = vpow2.f32 %v2290_v43 }
 0x27e   :  { %2391 = vtanh.f32 %v568_v40  ;;  %v644_v40 = vpack.c.bf16 %v640_v39, %v640_v39  ;;  %v5076_v39 = vld [vmem:[#allocation51_spill] sm:$0xff] }
 0x285   :  { %v2386_v42 = vpop.eup %2385 }
 0x286   :  { %v2388_v57 = vpop.eup %2387  ;;  %v573_v58 = vadd.f32 1.0, %v2386_v42 }
 0x287   :  { %v579_v62 = vadd.f32 1.0, %v2388_v57  ;;  %v2390_v59 = vpop.eup %2389  ;;  %v3429_v57 = vrot.slane %v644_v40, 1  ;;  %v5085_v40 = vld [vmem:[#allocation61_spill] sm:$0xff] }
 0x288   :  { %2393 = vrcp.f32 %v573_v58  ;;  %v2392_v47 = vpop.eup %2391  ;;  %v586_v44 = vadd.f32 1.0, %v2390_v59  ;;  %v5073_v59 = vld [vmem:[#allocation49_spill] sm:$0xff] }
 0x289   :  { %2395 = vrcp.f32 %v579_v62  ;;  %v5072_v62 = vld [vmem:[#allocation47_spill] sm:$0xff] }
 0x28a   :  { %2397 = vrcp.f32 %v586_v44  ;;  %v5077_v44 = vld [vmem:[#allocation53_spill] sm:$0xff] }
 0x292   :  { %v2394_v52 = vpop.eup %2393 }
 0x293   :  { %v2396_v51 = vpop.eup %2395  ;;  %v590_v48 = vmul.f32 %v2394_v52, %v2392_v47  ;;  %v5074_v47 = vld [vmem:[#allocation48_spill] sm:$0xff]  ;;  %v5075_v52 = vld [vmem:[#allocation50_spill] sm:$0xff] }
 0x294   :  { %v589_v46 = vmul.f32 0.0, %v2396_v51  ;;  %v2398_v50 = vpop.eup %2397  ;;  %v5078_v51 = vld [vmem:[#allocation52_spill] sm:$0xff] }
 0x296   :  { %v3426_v53 = vadd.f32 %v590_v48, %v589_v46  ;;  %v5079_v48 = vld [vmem:[#allocation54_spill] sm:$0xff]  ;;  %v5080_v46 = vld [vmem:[#allocation55_spill] sm:$0xff] }
 0x298   :  { %2399 = vtanh.f32 %v3426_v53 }
 0x2a2   :  { %v2400_v45 = vpop.eup %2399 }
 0x2a3   :  { %v593_v41 = vmul.f32 %v2400_v45, %v2398_v50  ;;  %v5081_v50 = vld [vmem:[#allocation57_spill] sm:$0xff]  ;;  %v5082_v45 = vld [vmem:[#allocation56_spill] sm:$0xff] }
 0x2a5   :  { %v642_v43 = vrot.slane %v593_v41, 6  ;;  %v5083_v41 = vld [vmem:[#allocation58_spill] sm:$0xff] }
 0x2a7   :  { %v645_v42 = vpack.c.bf16 %v642_v43, %v642_v43  ;;  %v5084_v43 = vld [vmem:[#allocation59_spill] sm:$0xff] }
 0x2a9   :  { %v649_v58 = vrot.slane %v645_v42, 1  ;;  %v5086_v42 = vld [vmem:[#allocation60_spill] sm:$0xff] }
 0x2ab   :  { %684 = vmatprep.mubr.bf16.mxu0 %v649_v58  ;;  %725 = vmatprep.mubr.bf16.mxu1 %v649_v58 }
 0x2ac   :  { %685 = vmatmul.mubr.bf16.vlgmr.msra.gmra.mrb[12].mxu0 %v3429_v57  ;;  %726 = vmatmul.mubr.bf16.vlgmr.msra.gmra.mrb[12].mxu1 %v3429_v57 }
 0x2ad   :  { %735 = vmatpush1.bf16.msra.mxu0 %v5072_v62  ;;  %776 = vmatpush1.bf16.msra.mxu1 %v5073_v59  ;;  %v5088_v62 = vld [vmem:[#allocation63_spill] sm:$0xff]  ;;  %v5089_v59 = vld [vmem:[#allocation65_spill] sm:$0xff] }
 0x2ae   :  { %766 = vmatprep.mubr.bf16.mxu0 %v649_v58  ;;  %807 = vmatprep.mubr.bf16.mxu1 %v649_v58  ;;  %v5087_v58 = vld [vmem:[#allocation62_spill] sm:$0xff] }
 0x2af   :  { %736 = vmatprep.subr.bf16.mxu0 %v5074_v47  ;;  %777 = vmatprep.subr.bf16.mxu1 %v5075_v52  ;;  %v5090_v47 = vld [vmem:[#allocation64_spill] sm:$0xff]  ;;  %v5091_v52 = vld [vmem:[#allocation66_spill] sm:$0xff] }
 0x2b1   :  { %737 = vmatpush1.bf16.msra.mxu0 %v5076_v39  ;;  %778 = vmatpush1.bf16.msra.mxu1 %v5077_v44  ;;  %v5092_v39 = vld [vmem:[#allocation67_spill] sm:$0xff] }
 0x2b2   :  { %738 = vmatprep.subr.bf16.mxu0 %v5078_v51  ;;  %779 = vmatprep.subr.bf16.mxu1 %v5079_v48  ;;  %v5093_v51 = vld [vmem:[#allocation69_spill] sm:$0xff] }
 0x2b5   :  { %739 = vmatpush1.bf16.msra.mxu0 %v5080_v46  ;;  %780 = vmatpush1.bf16.msra.mxu1 %v5081_v50 }
 0x2b6   :  { %740 = vmatprep.subr.bf16.mxu0 %v5082_v45  ;;  %781 = vmatprep.subr.bf16.mxu1 %v5083_v41  ;;  %v5094_v41 = vld [vmem:[#allocation68_spill] sm:$0xff] }
 0x2b9   :  { %741 = vmatpush1.bf16.msra.mxu0 %v5084_v43  ;;  %782 = vmatpush1.bf16.msra.mxu1 %v5085_v40  ;;  %v5095_v43 = vld [vmem:[#allocation70_spill] sm:$0xff]  ;;  %v5096_v40 = vld [vmem:[#allocation71_spill] sm:$0xff] }
 0x2ba   :  { %742 = vmatprep.subr.bf16.mxu0 %v5086_v42  ;;  %783 = vmatprep.subr.bf16.mxu1 %v5087_v58  ;;  %v5097_v42 = vld [vmem:[#allocation73_spill] sm:$0xff]  ;;  %v5098_v58 = vld [vmem:[#allocation72_spill] sm:$0xff] }
 0x2bd   :  { %743 = vmatpush1.bf16.msra.mxu0 %v5088_v62  ;;  %784 = vmatpush1.bf16.msra.mxu1 %v5089_v59  ;;  %v5099_v62 = vld [vmem:[#allocation74_spill] sm:$0xff]  ;;  %v5100_v59 = vld [vmem:[#allocation75_spill] sm:$0xff] }
 0x2be   :  { %744 = vmatprep.subr.bf16.mxu0 %v5090_v47  ;;  %785 = vmatprep.subr.bf16.mxu1 %v5091_v52  ;;  %v5101_v47 = vld [vmem:[#allocation77_spill] sm:$0xff]  ;;  %v5102_v52 = vld [vmem:[#allocation76_spill] sm:$0xff] }
 0x2c1   :  { %745 = vmatpush1.bf16.msra.mxu0 %v5092_v39  ;;  %786 = vmatpush1.bf16.msra.mxu1 %v5093_v51  ;;  %v5103_v39 = vld [vmem:[#allocation78_spill] sm:$0xff]  ;;  %v5104_v51 = vld [vmem:[#allocation79_spill] sm:$0xff] }
 0x2c2   :  { %746 = vmatprep.subr.bf16.mxu0 %v5094_v41  ;;  %787 = vmatprep.subr.bf16.mxu1 %v5095_v43  ;;  %v5105_v41 = vld [vmem:[#allocation81_spill] sm:$0xff]  ;;  %v5106_v43 = vld [vmem:[#allocation80_spill] sm:$0xff] }
 0x2c5   :  { %747 = vmatpush1.bf16.msra.mxu0 %v5096_v40  ;;  %788 = vmatpush1.bf16.msra.mxu1 %v5097_v42  ;;  %v5107_v40 = vld [vmem:[#allocation82_spill] sm:$0xff]  ;;  %v5108_v42 = vld [vmem:[#allocation83_spill] sm:$0xff] }
 0x2c6   :  { %748 = vmatprep.subr.bf16.mxu0 %v5098_v58  ;;  %789 = vmatprep.subr.bf16.mxu1 %v5099_v62  ;;  %v5109_v58 = vld [vmem:[#allocation85_spill] sm:$0xff]  ;;  %v5110_v62 = vld [vmem:[#allocation84_spill] sm:$0xff] }
 0x2c9   :  { %749 = vmatpush1.bf16.msra.mxu0 %v5100_v59  ;;  %790 = vmatpush1.bf16.msra.mxu1 %v5101_v47  ;;  %v5111_v59 = vld [vmem:[#allocation86_spill] sm:$0xff]  ;;  %v5112_v47 = vld [vmem:[#allocation87_spill] sm:$0xff] }
 0x2ca   :  { %750 = vmatprep.subr.bf16.mxu0 %v5102_v52  ;;  %791 = vmatprep.subr.bf16.mxu1 %v5103_v39  ;;  %v5113_v52 = vld [vmem:[#allocation89_spill] sm:$0xff]  ;;  %v5114_v39 = vld [vmem:[#allocation88_spill] sm:$0xff] }
 0x2cd   :  { %751 = vmatpush1.bf16.msra.mxu0 %v5104_v51  ;;  %792 = vmatpush1.bf16.msra.mxu1 %v5105_v41  ;;  %v5115_v51 = vld [vmem:[#allocation90_spill] sm:$0xff]  ;;  %v5116_v41 = vld [vmem:[#allocation91_spill] sm:$0xff] }
 0x2ce   :  { %752 = vmatprep.subr.bf16.mxu0 %v5106_v43  ;;  %793 = vmatprep.subr.bf16.mxu1 %v5107_v40  ;;  %v5117_v43 = vld [vmem:[#allocation93_spill] sm:$0xff]  ;;  %v5118_v40 = vld [vmem:[#allocation92_spill] sm:$0xff] }
 0x2d1   :  { %753 = vmatpush1.bf16.msra.mxu0 %v5108_v42  ;;  %794 = vmatpush1.bf16.msra.mxu1 %v5109_v58  ;;  %v5119_v42 = vld [vmem:[#allocation94_spill] sm:$0xff]  ;;  %v5120_v58 = vld [vmem:[#allocation95_spill] sm:$0xff] }
 0x2d2   :  { %754 = vmatprep.subr.bf16.mxu0 %v5110_v62  ;;  %795 = vmatprep.subr.bf16.mxu1 %v5111_v59  ;;  %v5121_v59 = vld [vmem:[#allocation96_spill] sm:$0xff] }
 0x2d5   :  { %755 = vmatpush1.bf16.msra.mxu0 %v5112_v47  ;;  %796 = vmatpush1.bf16.msra.mxu1 %v5113_v52  ;;  %v5122_v47 = vld [vmem:[#allocation97_spill] sm:$0xff]  ;;  %v5123_v52 = vld [vmem:[#allocation98_spill] sm:$0xff] }
 0x2d6   :  { %756 = vmatprep.subr.bf16.mxu0 %v5114_v39  ;;  %797 = vmatprep.subr.bf16.mxu1 %v5115_v51  ;;  %v5124_v51 = vld [vmem:[#allocation99_spill] sm:$0xff] }
 0x2d9   :  { %757 = vmatpush1.bf16.msra.mxu0 %v5116_v41  ;;  %798 = vmatpush1.bf16.msra.mxu1 %v5117_v43 }
 0x2da   :  { %758 = vmatprep.subr.bf16.mxu0 %v5118_v40  ;;  %799 = vmatprep.subr.bf16.mxu1 %v5119_v42 }
 0x2dd   :  { %759 = vmatpush1.bf16.msra.mxu0 %v5120_v58  ;;  %800 = vmatpush1.bf16.msra.mxu1 %v3312_v0 }
 0x2de   :  { %760 = vmatprep.subr.bf16.mxu0 %v5121_v59  ;;  %801 = vmatprep.subr.bf16.mxu1 %v5122_v47 }
 0x2e1   :  { %761 = vmatpush1.bf16.msra.mxu0 %v5123_v52  ;;  %802 = vmatpush1.bf16.msra.mxu1 %v3324_v17 }
 0x2e2   :  { %762 = vmatprep.subr.bf16.mxu0 %v5124_v51  ;;  %803 = vmatprep.subr.bf16.mxu1 %v3327_v21 }
 0x2e5   :  { %763 = vmatpush1.bf16.msra.mxu0 %v3330_v63  ;;  %804 = vmatpush1.bf16.msra.mxu1 %v3336_v1 }
 0x2e6   :  { %764 = vmatprep.subr.bf16.mxu0 %v3332_v19  ;;  %805 = vmatprep.subr.bf16.mxu1 %v3339_v61 }
 0x2e9   :  { %765 = vmatpush1.bf16.msra.mxu0 %v3342_v60  ;;  %806 = vmatpush1.bf16.msra.mxu1 %v3346_v15 }
 0x2ea   :  { %902 = vmatprep.subr.bf16.mxu0 %v2958_v2  ;;  %943 = vmatprep.subr.bf16.mxu1 %v2966_v5  ;;  %v5125_v2 = vld [vmem:[#allocation14_spill] sm:$0xff]  ;;  %v5128_v5 = vld [vmem:[#allocation16_spill] sm:$0xff] }
 0x2ec   :  { %767 = vmatmul.mubr.bf16.vlgmr.msra.gmra.mrb[16].mxu0 %v3429_v57  ;;  %808 = vmatmul.mubr.bf16.vlgmr.msra.gmra.mrb[16].mxu1 %v3429_v57 }
 0x2ed   :  { %903 = vmatpush1.bf16.msra.mxu0 %v2960_v3  ;;  %944 = vmatpush1.bf16.msra.mxu1 %v2972_v7  ;;  %v5126_v3 = vld [vmem:[#allocation15_spill] sm:$0xff] }
 0x2ee   :  { %904 = vmatprep.subr.bf16.mxu0 %v2962_v4  ;;  %945 = vmatprep.subr.bf16.mxu1 %v2974_v8  ;;  %v5127_v4 = vld [vmem:[#allocation17_spill] sm:$0xff]  ;;  %v5130_v7 = vld [vmem:[#allocation19_spill] sm:$0xff] }
 0x2ef   :  { %v5131_v8 = vld [vmem:[#allocation21_spill] sm:$0xff] }
 0x2f1   :  { %905 = vmatpush1.bf16.msra.mxu0 %v2969_v6  ;;  %946 = vmatpush1.bf16.msra.mxu1 %v2980_v10  ;;  %v5129_v6 = vld [vmem:[#allocation18_spill] sm:$0xff] }
 0x2f2   :  { %906 = vmatprep.subr.bf16.mxu0 %v2976_v9  ;;  %947 = vmatprep.subr.bf16.mxu1 %v2983_v11  ;;  %v5132_v9 = vld [vmem:[#allocation20_spill] sm:$0xff]  ;;  %v5133_v10 = vld [vmem:[#allocation22_spill] sm:$0xff]  ;;  %v5134_v11 = vld [vmem:[#allocation23_spill] sm:$0xff] }
 0x2f5   :  { %907 = vmatpush1.bf16.msra.mxu0 %v2986_v12  ;;  %948 = vmatpush1.bf16.msra.mxu1 %v2992_v14  ;;  %v5135_v12 = vld [vmem:[#allocation25_spill] sm:$0xff]  ;;  %v5137_v14 = vld [vmem:[#allocation26_spill] sm:$0xff] }
 0x2f6   :  { %908 = vmatprep.subr.bf16.mxu0 %v2988_v13  ;;  %949 = vmatprep.subr.bf16.mxu1 %v2995_v16  ;;  %v5136_v13 = vld [vmem:[#allocation24_spill] sm:$0xff]  ;;  %v5138_v16 = vld [vmem:[#allocation27_spill] sm:$0xff] }
 0x2f9   :  { %909 = vmatpush1.bf16.msra.mxu0 %v2998_v18  ;;  %950 = vmatpush1.bf16.msra.mxu1 %v3004_v22  ;;  %v5139_v18 = vld [vmem:[#allocation29_spill] sm:$0xff]  ;;  %v5141_v22 = vld [vmem:[#allocation30_spill] sm:$0xff] }
 0x2fa   :  { %910 = vmatprep.subr.bf16.mxu0 %v3000_v20  ;;  %951 = vmatprep.subr.bf16.mxu1 %v3007_v23  ;;  %v5140_v20 = vld [vmem:[#allocation28_spill] sm:$0xff]  ;;  %v5142_v23 = vld [vmem:[#allocation31_spill] sm:$0xff] }
 0x2fd   :  { %911 = vmatpush1.bf16.msra.mxu0 %v3010_v24  ;;  %952 = vmatpush1.bf16.msra.mxu1 %v3016_v26  ;;  %v5143_v24 = vld [vmem:[#allocation33_spill] sm:$0xff]  ;;  %v5145_v26 = vld [vmem:[#allocation34_spill] sm:$0xff] }
 0x2fe   :  { %912 = vmatprep.subr.bf16.mxu0 %v3012_v25  ;;  %953 = vmatprep.subr.bf16.mxu1 %v3019_v27  ;;  %v5144_v25 = vld [vmem:[#allocation32_spill] sm:$0xff]  ;;  %v5146_v27 = vld [vmem:[#allocation35_spill] sm:$0xff] }
 0x301   :  { %913 = vmatpush1.bf16.msra.mxu0 %v3022_v28  ;;  %954 = vmatpush1.bf16.msra.mxu1 %v3028_v30  ;;  %v5147_v28 = vld [vmem:[#allocation37_spill] sm:$0xff]  ;;  %v5149_v30 = vld [vmem:[#allocation38_spill] sm:$0xff] }
 0x302   :  { %914 = vmatprep.subr.bf16.mxu0 %v3024_v29  ;;  %955 = vmatprep.subr.bf16.mxu1 %v3031_v31  ;;  %v5148_v29 = vld [vmem:[#allocation36_spill] sm:$0xff]  ;;  %v5150_v31 = vld [vmem:[#allocation39_spill] sm:$0xff] }
 0x305   :  { %915 = vmatpush1.bf16.msra.mxu0 %v3034_v32  ;;  %956 = vmatpush1.bf16.msra.mxu1 %v3040_v34  ;;  %v5151_v32 = vld [vmem:[#allocation41_spill] sm:$0xff]  ;;  %v5153_v34 = vld [vmem:[#allocation42_spill] sm:$0xff] }
 0x306   :  { %916 = vmatprep.subr.bf16.mxu0 %v3036_v33  ;;  %957 = vmatprep.subr.bf16.mxu1 %v3043_v35  ;;  %v5152_v33 = vld [vmem:[#allocation40_spill] sm:$0xff]  ;;  %v5154_v35 = vld [vmem:[#allocation43_spill] sm:$0xff] }
 0x309   :  { %917 = vmatpush1.bf16.msra.mxu0 %v3046_v36  ;;  %958 = vmatpush1.bf16.msra.mxu1 %v3052_v38  ;;  %v5155_v36 = vld [vmem:[#allocation45_spill] sm:$0xff]  ;;  %v5157_v38 = vld [vmem:[#allocation46_spill] sm:$0xff] }
 0x30a   :  { %918 = vmatprep.subr.bf16.mxu0 %v3048_v37  ;;  %959 = vmatprep.subr.bf16.mxu1 %v5125_v2  ;;  %v5156_v37 = vld [vmem:[#allocation44_spill] sm:$0xff]  ;;  %v844_v2 = vld [vmem:[#allocation3] sm:$0x30] }
 0x30d   :  { %919 = vmatpush1.bf16.msra.mxu0 %v5126_v3  ;;  %960 = vmatpush1.bf16.msra.mxu1 %v5127_v4 }
 0x30e   :  { %920 = vmatprep.subr.bf16.mxu0 %v5128_v5  ;;  %961 = vmatprep.subr.bf16.mxu1 %v5129_v6  ;;  %v845_v6 = vld [vmem:[#allocation3 + $0x8] sm:$0x30] }
 0x311   :  { %921 = vmatpush1.bf16.msra.mxu0 %v5130_v7  ;;  %962 = vmatpush1.bf16.msra.mxu1 %v5131_v8 }
 0x312   :  { %922 = vmatprep.subr.bf16.mxu0 %v5132_v9  ;;  %963 = vmatprep.subr.bf16.mxu1 %v5133_v10 }
 0x315   :  { %923 = vmatpush1.bf16.msra.mxu0 %v5134_v11  ;;  %964 = vmatpush1.bf16.msra.mxu1 %v5135_v12 }
 0x316   :  { %924 = vmatprep.subr.bf16.mxu0 %v5136_v13  ;;  %965 = vmatprep.subr.bf16.mxu1 %v5137_v14 }
 0x319   :  { %925 = vmatpush1.bf16.msra.mxu0 %v5138_v16  ;;  %966 = vmatpush1.bf16.msra.mxu1 %v5139_v18 }
 0x31a   :  { %926 = vmatprep.subr.bf16.mxu0 %v5140_v20  ;;  %967 = vmatprep.subr.bf16.mxu1 %v5141_v22  ;;  %v847_v22 = vld [vmem:[#allocation3 + $0x18] sm:$0x30] }
 0x31d   :  { %927 = vmatpush1.bf16.msra.mxu0 %v5142_v23  ;;  %968 = vmatpush1.bf16.msra.mxu1 %v5143_v24 }
 0x31e   :  { %928 = vmatprep.subr.bf16.mxu0 %v5144_v25  ;;  %969 = vmatprep.subr.bf16.mxu1 %v5145_v26  ;;  %v846_v25 = vld [vmem:[#allocation3 + $0x10] sm:$0x30] }
 0x321   :  { %929 = vmatpush1.bf16.msra.mxu0 %v5146_v27  ;;  %970 = vmatpush1.bf16.msra.mxu1 %v5147_v28 }
 0x322   :  { %930 = vmatprep.subr.bf16.mxu0 %v5148_v29  ;;  %971 = vmatprep.subr.bf16.mxu1 %v5149_v30 }
 0x325   :  { %931 = vmatpush1.bf16.msra.mxu0 %v5150_v31  ;;  %972 = vmatpush1.bf16.msra.mxu1 %v5151_v32 }
 0x326   :  { %932 = vmatprep.subr.bf16.mxu0 %v5152_v33  ;;  %973 = vmatprep.subr.bf16.mxu1 %v5153_v34 }
 0x329   :  { %933 = vmatpush1.bf16.msra.mxu0 %v5154_v35  ;;  %974 = vmatpush1.bf16.msra.mxu1 %v5155_v36  ;;  %v884_v35 = vrot.slane %v3419_v56, 6 }
 0x32a   :  { %984 = vmatprep.subr.bf16.mxu0 %v5156_v37  ;;  %1025 = vmatprep.subr.bf16.mxu1 %v5157_v38 }
 0x37f   :  { %v686_v57 = vpop.f32.mrb[12].mxu0  ;;  %v727_v3 = vpop.f32.mrb[12].mxu1 }
 0x380   :  { %v852_v4 = vrot.slane %v686_v57, 4  ;;  %v688_v5 = vpop.f32.mrb[13].mxu0  ;;  %v729_v7 = vpop.f32.mrb[13].mxu1  ;;  %v854_v24 = vrot.slane %v727_v3, 4 }
 0x381   :  { %v853_v8 = vrot.slane %v688_v5, 4  ;;  %v690_v9 = vpop.f32.mrb[14].mxu0  ;;  %v731_v10 = vpop.f32.mrb[14].mxu1  ;;  %v855_v20 = vrot.slane %v729_v7, 4 }
 0x382   :  { %v860_v11 = vadd.f32 %v852_v4, %v844_v2  ;;  %v691_v12 = vpop.f32.mrb[15].mxu0  ;;  %v732_v13 = vpop.f32.mrb[15].mxu1  ;;  %v862_v27 = vadd.f32 %v854_v24, %v846_v25 }
 0x383   :  { %v861_v14 = vadd.f32 %v853_v8, %v845_v6  ;;  %v863_v23 = vadd.f32 %v855_v20, %v847_v22  ;;  %v5158_v8 = vld [vmem:[#allocation9_spill] sm:$0xff] }
 0x384   :  { %v2297_v16 = vmul.f32 -1.442695, %v860_v11 }
 0x385   :  { %v2298_v18 = vmul.f32 -1.442695, %v861_v14  ;;  %v2299_v26 = vmul.f32 -1.442695, %v863_v23 }
 0x386   :  { %2401 = vpow2.f32 %v2297_v16 }
 0x387   :  { %2403 = vpow2.f32 %v2298_v18 }
 0x388   :  { %2405 = vpow2.f32 %v2299_v26 }
 0x389   :  { %2407 = vtanh.f32 %v862_v27 }
 0x390   :  { %v2402_v28 = vpop.eup %2401 }
 0x391   :  { %v2404_v29 = vpop.eup %2403  ;;  %v867_v30 = vadd.f32 1.0, %v2402_v28 }
 0x392   :  { %v873_v31 = vadd.f32 1.0, %v2404_v29  ;;  %v2406_v32 = vpop.eup %2405 }
 0x393   :  { %2409 = vrcp.f32 %v867_v30  ;;  %v2408_v33 = vpop.eup %2407  ;;  %v880_v38 = vadd.f32 1.0, %v2406_v32 }
 0x394   :  { %2411 = vrcp.f32 %v873_v31 }
 0x395   :  { %2413 = vrcp.f32 %v880_v38 }
 0x39d   :  { %v2410_v34 = vpop.eup %2409 }
 0x39e   :  { %v2412_v36 = vpop.eup %2411  ;;  %v887_v37 = vmul.f32 %v2410_v34, %v2408_v33 }
 0x39f   :  { %v886_v57 = vmul.f32 %v2412_v36, %v884_v35  ;;  %v2414_v3 = vpop.eup %2413 }
 0x3a1   :  { %v3564_v2 = vadd.f32 %v887_v37, %v886_v57 }
 0x3a3   :  { %2415 = vtanh.f32 %v3564_v2 }
 0x3ad   :  { %v2416_v4 = vpop.eup %2415 }
 0x3ae   :  { %v890_v5 = vmul.f32 %v2416_v4, %v2414_v3 }
 0x3b0   :  { %v894_v4 = vpack.c.bf16 %v890_v5, %v890_v5  ;;  %v3585_v5 = vld [vmem:[#allocation2 + $0x68] sm:$0xff] }
 0x3bf   :  { %v768_v6 = vpop.f32.mrb[16].mxu0  ;;  %v809_v7 = vpop.f32.mrb[16].mxu1 }
 0x3c0   :  { %v816_v9 = vadd.f32 %v768_v6, %v5158_v8  ;;  %v770_v10 = vpop.f32.mrb[17].mxu0  ;;  %v811_v11 = vpop.f32.mrb[17].mxu1  ;;  %v818_v24 = vadd.f32 %v809_v7, %v5071_v54 }
 0x3c1   :  { %v817_v56 = vadd.f32 %v770_v10, %v5069_v49  ;;  %v772_v12 = vpop.f32.mrb[18].mxu0  ;;  %v813_v13 = vpop.f32.mrb[18].mxu1  ;;  %v819_v22 = vadd.f32 %v811_v11, %v5070_v55  ;;  %v3582_v10 = vld [vmem:[#allocation2 + $0x30] sm:$0xff]  ;;  %v3588_v11 = vld [vmem:[#allocation2 + $0x78] sm:$0xff] }
 0x3c2   :  { %v2294_v14 = vmul.f32 -1.442695, %v816_v9  ;;  %v773_v16 = vpop.f32.mrb[19].mxu0  ;;  %v814_v18 = vpop.f32.mrb[19].mxu1  ;;  %v3575_v9 = vrot.slane %v894_v4, 2  ;;  %v3595_v12 = vld [vmem:[#allocation2 + $0xa8] sm:$0xff] }
 0x3c3   :  { %v2295_v20 = vmul.f32 -1.442695, %v817_v56  ;;  %v2296_v23 = vmul.f32 -1.442695, %v819_v22  ;;  %v3591_v56 = vld [vmem:[#allocation2 + $0x60] sm:$0xff]  ;;  %v5159_v13 = vld [vmem:[#allocation58_spill] sm:$0xff] }
 0x3c4   :  { %2417 = vpow2.f32 %v2294_v14  ;;  %v5160_v14 = vld [vmem:[#allocation59_spill] sm:$0xff]  ;;  %v5161_v16 = vld [vmem:[#allocation61_spill] sm:$0xff]  ;;  %v5162_v18 = vld [vmem:[#allocation60_spill] sm:$0xff] }
 0x3c5   :  { %2419 = vpow2.f32 %v2295_v20  ;;  %v5164_v20 = vld [vmem:[#allocation63_spill] sm:$0xff]  ;;  %v5165_v22 = vld [vmem:[#allocation65_spill] sm:$0xff] }
 0x3c6   :  { %2421 = vpow2.f32 %v2296_v23  ;;  %v5170_v23 = vld [vmem:[#allocation68_spill] sm:$0xff]  ;;  %v5187_v4 = vld [vmem:[#allocation87_spill] sm:$0xff] }
 0x3c7   :  { %2423 = vtanh.f32 %v818_v24  ;;  %v5171_v24 = vld [vmem:[#allocation70_spill] sm:$0xff] }
 0x3ce   :  { %v2418_v25 = vpop.eup %2417 }
 0x3cf   :  { %v2420_v26 = vpop.eup %2419  ;;  %v823_v27 = vadd.f32 1.0, %v2418_v25  ;;  %v5172_v25 = vld [vmem:[#allocation71_spill] sm:$0xff] }
 0x3d0   :  { %v829_v28 = vadd.f32 1.0, %v2420_v26  ;;  %v2422_v29 = vpop.eup %2421  ;;  %v5173_v26 = vld [vmem:[#allocation73_spill] sm:$0xff] }
 0x3d1   :  { %2425 = vrcp.f32 %v823_v27  ;;  %v2424_v30 = vpop.eup %2423  ;;  %v836_v34 = vadd.f32 1.0, %v2422_v29  ;;  %v5174_v27 = vld [vmem:[#allocation72_spill] sm:$0xff]  ;;  %v5176_v29 = vld [vmem:[#allocation75_spill] sm:$0xff] }
 0x3d2   :  { %2427 = vrcp.f32 %v829_v28  ;;  %v5175_v28 = vld [vmem:[#allocation74_spill] sm:$0xff] }
 0x3d3   :  { %2429 = vrcp.f32 %v836_v34  ;;  %v5181_v34 = vld [vmem:[#allocation81_spill] sm:$0xff] }
 0x3db   :  { %v2426_v31 = vpop.eup %2425 }
 0x3dc   :  { %v2428_v32 = vpop.eup %2427  ;;  %v840_v33 = vmul.f32 %v2426_v31, %v2424_v30  ;;  %v5177_v30 = vld [vmem:[#allocation77_spill] sm:$0xff]  ;;  %v5178_v31 = vld [vmem:[#allocation76_spill] sm:$0xff] }
 0x3dd   :  { %v839_v35 = vmul.f32 %v2428_v32, %v3426_v53  ;;  %v2430_v37 = vpop.eup %2429  ;;  %v3579_v53 = vld [vmem:[#allocation2 + $0x20] sm:$0xff]  ;;  %v5179_v32 = vld [vmem:[#allocation78_spill] sm:$0xff] }
 0x3df   :  { %v3572_v36 = vadd.f32 %v840_v33, %v839_v35  ;;  %v5180_v33 = vld [vmem:[#allocation79_spill] sm:$0xff]  ;;  %v5182_v35 = vld [vmem:[#allocation80_spill] sm:$0xff] }
 0x3e1   :  { %2431 = vtanh.f32 %v3572_v36 }
 0x3eb   :  { %v2432_v38 = vpop.eup %2431 }
 0x3ec   :  { %v843_v57 = vmul.f32 %v2432_v38, %v2430_v37  ;;  %v5183_v37 = vld [vmem:[#allocation82_spill] sm:$0xff]  ;;  %v5184_v38 = vld [vmem:[#allocation83_spill] sm:$0xff] }
 0x3ee   :  { %v892_v3 = vrot.slane %v843_v57, 4  ;;  %v5185_v57 = vld [vmem:[#allocation85_spill] sm:$0xff] }
 0x3f0   :  { %v895_v6 = vpack.c.bf16 %v892_v3, %v892_v3  ;;  %v5186_v3 = vld [vmem:[#allocation86_spill] sm:$0xff] }
 0x3f2   :  { %v899_v7 = vrot.slane %v895_v6, 2  ;;  %v5188_v6 = vld [vmem:[#allocation89_spill] sm:$0xff] }
 0x3f4   :  { %934 = vmatprep.mubr.bf16.mxu0 %v899_v7  ;;  %975 = vmatprep.mubr.bf16.mxu1 %v899_v7 }
 0x3f5   :  { %935 = vmatmul.mubr.bf16.vlgmr.msra.gmra.mrb[20].mxu0 %v3575_v9  ;;  %976 = vmatmul.mubr.bf16.vlgmr.msra.gmra.mrb[20].mxu1 %v3575_v9 }
 0x3f6   :  { %985 = vmatpush1.bf16.msra.mxu0 %v3579_v53  ;;  %1026 = vmatpush1.bf16.msra.mxu1 %v3582_v10 }
 0x3f7   :  { %1016 = vmatprep.mubr.bf16.mxu0 %v899_v7  ;;  %1057 = vmatprep.mubr.bf16.mxu1 %v899_v7  ;;  %v5189_v7 = vld [vmem:[#allocation90_spill] sm:$0xff] }
 0x3f8   :  { %986 = vmatprep.subr.bf16.mxu0 %v3585_v5  ;;  %1027 = vmatprep.subr.bf16.mxu1 %v3588_v11 }
 0x3fa   :  { %987 = vmatpush1.bf16.msra.mxu0 %v3591_v56  ;;  %1028 = vmatpush1.bf16.msra.mxu1 %v5077_v44  ;;  %v5163_v44 = vld [vmem:[#allocation62_spill] sm:$0xff] }
 0x3fb   :  { %988 = vmatprep.subr.bf16.mxu0 %v3595_v12  ;;  %1029 = vmatprep.subr.bf16.mxu1 %v5079_v48  ;;  %v5166_v48 = vld [vmem:[#allocation64_spill] sm:$0xff] }
 0x3fe   :  { %989 = vmatpush1.bf16.msra.mxu0 %v5080_v46  ;;  %1030 = vmatpush1.bf16.msra.mxu1 %v5081_v50  ;;  %v5167_v46 = vld [vmem:[#allocation66_spill] sm:$0xff]  ;;  %v5168_v50 = vld [vmem:[#allocation67_spill] sm:$0xff] }
 0x3ff   :  { %990 = vmatprep.subr.bf16.mxu0 %v5082_v45  ;;  %1031 = vmatprep.subr.bf16.mxu1 %v5159_v13  ;;  %v5169_v45 = vld [vmem:[#allocation69_spill] sm:$0xff]  ;;  %v3718_v13 = vld [vmem:[#allocation2 + $0x158] sm:$0xff] }
 0x400   :  { %5204 = vst [vmem:[#allocation91_spill] sm:$0xff] %v3718_v13 }
 0x402   :  { %991 = vmatpush1.bf16.msra.mxu0 %v5160_v14  ;;  %1032 = vmatpush1.bf16.msra.mxu1 %v5161_v16  ;;  %v3721_v14 = vld [vmem:[#allocation2 + $0x140] sm:$0xff]  ;;  %v3724_v16 = vld [vmem:[#allocation2 + $0x150] sm:$0xff] }
 0x403   :  { %992 = vmatprep.subr.bf16.mxu0 %v5162_v18  ;;  %1033 = vmatprep.subr.bf16.mxu1 %v5163_v44  ;;  %5205 = vst [vmem:[#allocation93_spill] sm:$0xff] %v3721_v14  ;;  %5206 = vst [vmem:[#allocation92_spill] sm:$0xff] %v3724_v16  ;;  %v3727_v18 = vld [vmem:[#allocation2 + $0x188] sm:$0xff]  ;;  %v3730_v44 = vld [vmem:[#allocation2 + $0x198] sm:$0xff] }
 0x404   :  { %5207 = vst [vmem:[#allocation94_spill] sm:$0xff] %v3727_v18  ;;  %5208 = vst [vmem:[#allocation95_spill] sm:$0xff] %v3730_v44 }
 0x406   :  { %993 = vmatpush1.bf16.msra.mxu0 %v5164_v20  ;;  %1034 = vmatpush1.bf16.msra.mxu1 %v5165_v22  ;;  %v3733_v20 = vld [vmem:[#allocation2 + $0x180] sm:$0xff]  ;;  %v3736_v22 = vld [vmem:[#allocation2 + $0x190] sm:$0xff] }
 0x407   :  { %994 = vmatprep.subr.bf16.mxu0 %v5166_v48  ;;  %1035 = vmatprep.subr.bf16.mxu1 %v5167_v46  ;;  %5209 = vst [vmem:[#allocation96_spill] sm:$0xff] %v3733_v20  ;;  %5210 = vst [vmem:[#allocation97_spill] sm:$0xff] %v3736_v22  ;;  %v3739_v48 = vld [vmem:[#allocation2 + $0x1c8] sm:$0xff]  ;;  %v3742_v46 = vld [vmem:[#allocation2 + $0x1d8] sm:$0xff] }
 0x408   :  { %5211 = vst [vmem:[#allocation98_spill] sm:$0xff] %v3739_v48  ;;  %5212 = vst [vmem:[#allocation99_spill] sm:$0xff] %v3742_v46 }
 0x40a   :  { %995 = vmatpush1.bf16.msra.mxu0 %v5168_v50  ;;  %1036 = vmatpush1.bf16.msra.mxu1 %v5169_v45  ;;  %v3745_v50 = vld [vmem:[#allocation2 + $0x1c0] sm:$0xff]  ;;  %v3748_v45 = vld [vmem:[#allocation2 + $0x1d0] sm:$0xff] }
 0x40b   :  { %996 = vmatprep.subr.bf16.mxu0 %v5170_v23  ;;  %1037 = vmatprep.subr.bf16.mxu1 %v5171_v24  ;;  %5213 = vst [vmem:[#allocation14_spill] sm:$0xff] %v3745_v50  ;;  %5214 = vst [vmem:[#allocation15_spill] sm:$0xff] %v3748_v45  ;;  %v3751_v23 = vld [vmem:[#allocation2 + $0x208] sm:$0xff]  ;;  %v3754_v24 = vld [vmem:[#allocation2 + $0x218] sm:$0xff] }
 0x40c   :  { %5215 = vst [vmem:[#allocation17_spill] sm:$0xff] %v3751_v23  ;;  %5216 = vst [vmem:[#allocation16_spill] sm:$0xff] %v3754_v24 }
 0x40e   :  { %997 = vmatpush1.bf16.msra.mxu0 %v5172_v25  ;;  %1038 = vmatpush1.bf16.msra.mxu1 %v5173_v26  ;;  %v3757_v25 = vld [vmem:[#allocation2 + $0x200] sm:$0xff]  ;;  %v3760_v26 = vld [vmem:[#allocation2 + $0x210] sm:$0xff] }
 0x40f   :  { %998 = vmatprep.subr.bf16.mxu0 %v5174_v27  ;;  %1039 = vmatprep.subr.bf16.mxu1 %v5175_v28  ;;  %5217 = vst [vmem:[#allocation18_spill] sm:$0xff] %v3757_v25  ;;  %5218 = vst [vmem:[#allocation19_spill] sm:$0xff] %v3760_v26  ;;  %v3763_v27 = vld [vmem:[#allocation2 + $0x248] sm:$0xff]  ;;  %v3766_v28 = vld [vmem:[#allocation2 + $0x258] sm:$0xff] }
 0x410   :  { %5219 = vst [vmem:[#allocation21_spill] sm:$0xff] %v3763_v27  ;;  %5220 = vst [vmem:[#allocation20_spill] sm:$0xff] %v3766_v28 }
 0x412   :  { %999 = vmatpush1.bf16.msra.mxu0 %v5176_v29  ;;  %1040 = vmatpush1.bf16.msra.mxu1 %v5177_v30  ;;  %v3769_v29 = vld [vmem:[#allocation2 + $0x240] sm:$0xff]  ;;  %v3772_v30 = vld [vmem:[#allocation2 + $0x250] sm:$0xff] }
 0x413   :  { %1000 = vmatprep.subr.bf16.mxu0 %v5178_v31  ;;  %1041 = vmatprep.subr.bf16.mxu1 %v5179_v32  ;;  %5221 = vst [vmem:[#allocation22_spill] sm:$0xff] %v3769_v29  ;;  %5222 = vst [vmem:[#allocation23_spill] sm:$0xff] %v3772_v30  ;;  %v3775_v31 = vld [vmem:[#allocation2 + $0x288] sm:$0xff]  ;;  %v3778_v32 = vld [vmem:[#allocation2 + $0x298] sm:$0xff] }
 0x414   :  { %5223 = vst [vmem:[#allocation25_spill] sm:$0xff] %v3775_v31  ;;  %5224 = vst [vmem:[#allocation24_spill] sm:$0xff] %v3778_v32 }
 0x416   :  { %1001 = vmatpush1.bf16.msra.mxu0 %v5180_v33  ;;  %1042 = vmatpush1.bf16.msra.mxu1 %v5181_v34  ;;  %v3781_v33 = vld [vmem:[#allocation2 + $0x280] sm:$0xff]  ;;  %v3784_v34 = vld [vmem:[#allocation2 + $0x290] sm:$0xff] }
 0x417   :  { %1002 = vmatprep.subr.bf16.mxu0 %v5182_v35  ;;  %1043 = vmatprep.subr.bf16.mxu1 %v5183_v37  ;;  %5225 = vst [vmem:[#allocation26_spill] sm:$0xff] %v3781_v33  ;;  %5226 = vst [vmem:[#allocation27_spill] sm:$0xff] %v3784_v34  ;;  %v3787_v35 = vld [vmem:[#allocation2 + $0x2c8] sm:$0xff]  ;;  %v3790_v37 = vld [vmem:[#allocation2 + $0x2d8] sm:$0xff] }
 0x418   :  { %5227 = vst [vmem:[#allocation29_spill] sm:$0xff] %v3787_v35  ;;  %5228 = vst [vmem:[#allocation28_spill] sm:$0xff] %v3790_v37 }
 0x41a   :  { %1003 = vmatpush1.bf16.msra.mxu0 %v5184_v38  ;;  %1044 = vmatpush1.bf16.msra.mxu1 %v5185_v57  ;;  %v3793_v38 = vld [vmem:[#allocation2 + $0x2c0] sm:$0xff]  ;;  %v3796_v57 = vld [vmem:[#allocation2 + $0x2d0] sm:$0xff] }
 0x41b   :  { %1004 = vmatprep.subr.bf16.mxu0 %v5110_v62  ;;  %1045 = vmatprep.subr.bf16.mxu1 %v5186_v3  ;;  %v3697_v62 = vld [vmem:[#allocation2 + $0xc0] sm:$0xff]  ;;  %5229 = vst [vmem:[#allocation30_spill] sm:$0xff] %v3793_v38  ;;  %5230 = vst [vmem:[#allocation31_spill] sm:$0xff] %v3796_v57  ;;  %v3799_v3 = vld [vmem:[#allocation2 + $0x308] sm:$0xff] }
 0x41c   :  { %5197 = vst [vmem:[#allocation52_spill] sm:$0xff] %v3697_v62  ;;  %5231 = vst [vmem:[#allocation33_spill] sm:$0xff] %v3799_v3 }
 0x41e   :  { %1005 = vmatpush1.bf16.msra.mxu0 %v5187_v4  ;;  %1046 = vmatpush1.bf16.msra.mxu1 %v5188_v6  ;;  %v3802_v4 = vld [vmem:[#allocation2 + $0x318] sm:$0xff]  ;;  %v3805_v6 = vld [vmem:[#allocation2 + $0x300] sm:$0xff] }
 0x41f   :  { %1006 = vmatprep.subr.bf16.mxu0 %v5114_v39  ;;  %1047 = vmatprep.subr.bf16.mxu1 %v5189_v7  ;;  %v3709_v39 = vld [vmem:[#allocation2 + $0x100] sm:$0xff]  ;;  %5232 = vst [vmem:[#allocation32_spill] sm:$0xff] %v3802_v4  ;;  %5233 = vst [vmem:[#allocation34_spill] sm:$0xff] %v3805_v6  ;;  %v3808_v7 = vld [vmem:[#allocation2 + $0x310] sm:$0xff] }
 0x420   :  { %5201 = vst [vmem:[#allocation56_spill] sm:$0xff] %v3709_v39  ;;  %5234 = vst [vmem:[#allocation35_spill] sm:$0xff] %v3808_v7 }
 0x422   :  { %1007 = vmatpush1.bf16.msra.mxu0 %v5116_v41  ;;  %1048 = vmatpush1.bf16.msra.mxu1 %v5117_v43  ;;  %v3682_v41 = vld [vmem:[#allocation2 + $0x98] sm:$0xff]  ;;  %v3685_v43 = vld [vmem:[#allocation2 + $0x80] sm:$0xff] }
 0x423   :  { %1008 = vmatprep.subr.bf16.mxu0 %v5118_v40  ;;  %1049 = vmatprep.subr.bf16.mxu1 %v5119_v42  ;;  %5192 = vst [vmem:[#allocation49_spill] sm:$0xff] %v3682_v41  ;;  %5193 = vst [vmem:[#allocation48_spill] sm:$0xff] %v3685_v43  ;;  %v3688_v40 = vld [vmem:[#allocation2 + $0x90] sm:$0xff]  ;;  %v3691_v42 = vld [vmem:[#allocation2 + $0xc8] sm:$0xff] }
 0x424   :  { %5194 = vst [vmem:[#allocation50_spill] sm:$0xff] %v3688_v40  ;;  %5195 = vst [vmem:[#allocation51_spill] sm:$0xff] %v3691_v42 }
 0x426   :  { %1009 = vmatpush1.bf16.msra.mxu0 %v5120_v58  ;;  %1050 = vmatpush1.bf16.msra.mxu1 %v3312_v0  ;;  %v3653_v0 = vld [vmem:[#allocation2 + $0x8] sm:$0xff]  ;;  %v3694_v58 = vld [vmem:[#allocation2 + $0xd8] sm:$0xff] }
 0x427   :  { %1010 = vmatprep.subr.bf16.mxu0 %v5121_v59  ;;  %1051 = vmatprep.subr.bf16.mxu1 %v5122_v47  ;;  %5196 = vst [vmem:[#allocation53_spill] sm:$0xff] %v3694_v58  ;;  %v3700_v59 = vld [vmem:[#allocation2 + $0xd0] sm:$0xff]  ;;  %v3703_v47 = vld [vmem:[#allocation2 + $0x108] sm:$0xff] }
 0x428   :  { %5198 = vst [vmem:[#allocation54_spill] sm:$0xff] %v3700_v59  ;;  %5199 = vst [vmem:[#allocation55_spill] sm:$0xff] %v3703_v47 }
 0x42a   :  { %1011 = vmatpush1.bf16.msra.mxu0 %v5123_v52  ;;  %1052 = vmatpush1.bf16.msra.mxu1 %v3324_v17  ;;  %v3656_v17 = vld [vmem:[#allocation2 + $0x18] sm:$0xff] }
 0x42b   :  { %1012 = vmatprep.subr.bf16.mxu0 %v5124_v51  ;;  %1053 = vmatprep.subr.bf16.mxu1 %v3327_v21  ;;  %v3661_v21 = vld [vmem:[#allocation2] sm:$0xff]  ;;  %v3706_v52 = vld [vmem:[#allocation2 + $0x118] sm:$0xff]  ;;  %v3712_v51 = vld [vmem:[#allocation2 + $0x110] sm:$0xff] }
 0x42c   :  { %5200 = vst [vmem:[#allocation57_spill] sm:$0xff] %v3706_v52  ;;  %5202 = vst [vmem:[#allocation84_spill] sm:$0xff] %v3712_v51 }
 0x42e   :  { %1013 = vmatpush1.bf16.msra.mxu0 %v3330_v63  ;;  %1054 = vmatpush1.bf16.msra.mxu1 %v3336_v1  ;;  %v3670_v1 = vld [vmem:[#allocation2 + $0x58] sm:$0xff]  ;;  %v3676_v63 = vld [vmem:[#allocation2 + $0x50] sm:$0xff] }
 0x42f   :  { %1014 = vmatprep.subr.bf16.mxu0 %v3332_v19  ;;  %1055 = vmatprep.subr.bf16.mxu1 %v3339_v61  ;;  %v3664_v19 = vld [vmem:[#allocation2 + $0x10] sm:$0xff]  ;;  %5190 = vst [vmem:[#allocation13_spill] sm:$0xff] %v3676_v63  ;;  %v3679_v61 = vld [vmem:[#allocation2 + $0x88] sm:$0xff] }
 0x430   :  { %5191 = vst [vmem:[#allocation47_spill] sm:$0xff] %v3679_v61 }
 0x432   :  { %1015 = vmatpush1.bf16.msra.mxu0 %v3342_v60  ;;  %1056 = vmatpush1.bf16.msra.mxu1 %v3346_v15  ;;  %v3667_v15 = vld [vmem:[#allocation2 + $0x48] sm:$0xff]  ;;  %v3673_v60 = vld [vmem:[#allocation2 + $0x40] sm:$0xff] }
 0x433   :  { %1152 = vmatprep.subr.bf16.mxu0 %v3653_v0  ;;  %1193 = vmatprep.subr.bf16.mxu1 %v3656_v17 }
 0x435   :  { %1017 = vmatmul.mubr.bf16.vlgmr.msra.gmra.mrb[24].mxu0 %v3575_v9  ;;  %1058 = vmatmul.mubr.bf16.vlgmr.msra.gmra.mrb[24].mxu1 %v3575_v9  ;;  %v3715_v9 = vld [vmem:[#allocation2 + $0x148] sm:$0xff] }
 0x436   :  { %1153 = vmatpush1.bf16.msra.mxu0 %v3661_v21  ;;  %1194 = vmatpush1.bf16.msra.mxu1 %v3664_v19  ;;  %5203 = vst [vmem:[#allocation88_spill] sm:$0xff] %v3715_v9 }
 0x437   :  { %1154 = vmatprep.subr.bf16.mxu0 %v3667_v15  ;;  %1195 = vmatprep.subr.bf16.mxu1 %v3670_v1 }
 0x43a   :  { %1155 = vmatpush1.bf16.msra.mxu0 %v3673_v60  ;;  %1196 = vmatpush1.bf16.msra.mxu1 %v3676_v63 }
 0x43b   :  { %1156 = vmatprep.subr.bf16.mxu0 %v3679_v61  ;;  %1197 = vmatprep.subr.bf16.mxu1 %v3682_v41 }
 0x43e   :  { %1157 = vmatpush1.bf16.msra.mxu0 %v3685_v43  ;;  %1198 = vmatpush1.bf16.msra.mxu1 %v3688_v40 }
 0x43f   :  { %1158 = vmatprep.subr.bf16.mxu0 %v3691_v42  ;;  %1199 = vmatprep.subr.bf16.mxu1 %v3694_v58 }
 0x442   :  { %1159 = vmatpush1.bf16.msra.mxu0 %v3697_v62  ;;  %1200 = vmatpush1.bf16.msra.mxu1 %v3700_v59 }
 0x443   :  { %1160 = vmatprep.subr.bf16.mxu0 %v3703_v47  ;;  %1201 = vmatprep.subr.bf16.mxu1 %v3706_v52 }
 0x446   :  { %1161 = vmatpush1.bf16.msra.mxu0 %v3709_v39  ;;  %1202 = vmatpush1.bf16.msra.mxu1 %v3712_v51 }
 0x447   :  { %1162 = vmatprep.subr.bf16.mxu0 %v3715_v9  ;;  %1203 = vmatprep.subr.bf16.mxu1 %v3718_v13 }
 0x44a   :  { %1163 = vmatpush1.bf16.msra.mxu0 %v3721_v14  ;;  %1204 = vmatpush1.bf16.msra.mxu1 %v3724_v16 }
 0x44b   :  { %1164 = vmatprep.subr.bf16.mxu0 %v3727_v18  ;;  %1205 = vmatprep.subr.bf16.mxu1 %v3730_v44 }
 0x44e   :  { %1165 = vmatpush1.bf16.msra.mxu0 %v3733_v20  ;;  %1206 = vmatpush1.bf16.msra.mxu1 %v3736_v22 }
 0x44f   :  { %1166 = vmatprep.subr.bf16.mxu0 %v3739_v48  ;;  %1207 = vmatprep.subr.bf16.mxu1 %v3742_v46 }
 0x452   :  { %1167 = vmatpush1.bf16.msra.mxu0 %v3745_v50  ;;  %1208 = vmatpush1.bf16.msra.mxu1 %v3748_v45  ;;  %v1096_v45 = vld [vmem:[#allocation3 + $0x10] sm:$0xc0] }
 0x453   :  { %1168 = vmatprep.subr.bf16.mxu0 %v3751_v23  ;;  %1209 = vmatprep.subr.bf16.mxu1 %v3754_v24  ;;  %v1097_v24 = vld [vmem:[#allocation3 + $0x18] sm:$0xc0] }
 0x456   :  { %1169 = vmatpush1.bf16.msra.mxu0 %v3757_v25  ;;  %1210 = vmatpush1.bf16.msra.mxu1 %v3760_v26 }
 0x457   :  { %1170 = vmatprep.subr.bf16.mxu0 %v3763_v27  ;;  %1211 = vmatprep.subr.bf16.mxu1 %v3766_v28 }
 0x45a   :  { %1171 = vmatpush1.bf16.msra.mxu0 %v3769_v29  ;;  %1212 = vmatpush1.bf16.msra.mxu1 %v3772_v30 }
 0x45b   :  { %1172 = vmatprep.subr.bf16.mxu0 %v3775_v31  ;;  %1213 = vmatprep.subr.bf16.mxu1 %v3778_v32 }
 0x45e   :  { %1173 = vmatpush1.bf16.msra.mxu0 %v3781_v33  ;;  %1214 = vmatpush1.bf16.msra.mxu1 %v3784_v34  ;;  %v1095_v33 = vld [vmem:[#allocation3 + $0x8] sm:$0xc0] }
 0x45f   :  { %1174 = vmatprep.subr.bf16.mxu0 %v3787_v35  ;;  %1215 = vmatprep.subr.bf16.mxu1 %v3790_v37  ;;  %v1094_v37 = vld [vmem:[#allocation3] sm:$0xc0] }
 0x462   :  { %1175 = vmatpush1.bf16.msra.mxu0 %v3793_v38  ;;  %1216 = vmatpush1.bf16.msra.mxu1 %v3796_v57  ;;  %v3811_v38 = vld [vmem:[#allocation2 + $0x348] sm:$0xff]  ;;  %v3814_v57 = vld [vmem:[#allocation2 + $0x358] sm:$0xff] }
 0x463   :  { %1176 = vmatprep.subr.bf16.mxu0 %v3799_v3  ;;  %1217 = vmatprep.subr.bf16.mxu1 %v3802_v4  ;;  %5235 = vst [vmem:[#allocation37_spill] sm:$0xff] %v3811_v38  ;;  %5236 = vst [vmem:[#allocation36_spill] sm:$0xff] %v3814_v57  ;;  %v3817_v3 = vld [vmem:[#allocation2 + $0x340] sm:$0xff]  ;;  %v3820_v4 = vld [vmem:[#allocation2 + $0x350] sm:$0xff] }
 0x464   :  { %5237 = vst [vmem:[#allocation38_spill] sm:$0xff] %v3817_v3  ;;  %5238 = vst [vmem:[#allocation39_spill] sm:$0xff] %v3820_v4 }
 0x466   :  { %1177 = vmatpush1.bf16.msra.mxu0 %v3805_v6  ;;  %1218 = vmatpush1.bf16.msra.mxu1 %v3808_v7  ;;  %v3823_v6 = vld [vmem:[#allocation2 + $0x388] sm:$0xff]  ;;  %v3826_v7 = vld [vmem:[#allocation2 + $0x398] sm:$0xff] }
 0x467   :  { %1178 = vmatprep.subr.bf16.mxu0 %v3811_v38  ;;  %1219 = vmatprep.subr.bf16.mxu1 %v3814_v57  ;;  %5239 = vst [vmem:[#allocation41_spill] sm:$0xff] %v3823_v6  ;;  %5240 = vst [vmem:[#allocation40_spill] sm:$0xff] %v3826_v7  ;;  %v3829_v38 = vld [vmem:[#allocation2 + $0x380] sm:$0xff]  ;;  %v3832_v57 = vld [vmem:[#allocation2 + $0x390] sm:$0xff] }
 0x468   :  { %5241 = vst [vmem:[#allocation42_spill] sm:$0xff] %v3829_v38  ;;  %5242 = vst [vmem:[#allocation43_spill] sm:$0xff] %v3832_v57 }
 0x46a   :  { %1179 = vmatpush1.bf16.msra.mxu0 %v3817_v3  ;;  %1220 = vmatpush1.bf16.msra.mxu1 %v3820_v4  ;;  %v3835_v3 = vld [vmem:[#allocation2 + $0x3c8] sm:$0xff]  ;;  %v3838_v4 = vld [vmem:[#allocation2 + $0x3d8] sm:$0xff] }
 0x46b   :  { %1180 = vmatprep.subr.bf16.mxu0 %v3823_v6  ;;  %1221 = vmatprep.subr.bf16.mxu1 %v3826_v7  ;;  %5243 = vst [vmem:[#allocation45_spill] sm:$0xff] %v3835_v3  ;;  %5244 = vst [vmem:[#allocation44_spill] sm:$0xff] %v3838_v4  ;;  %v3841_v6 = vld [vmem:[#allocation2 + $0x3c0] sm:$0xff]  ;;  %v3844_v7 = vld [vmem:[#allocation2 + $0x3d0] sm:$0xff] }
 0x46c   :  { %5245 = vst [vmem:[#allocation46_spill] sm:$0xff] %v3841_v6  ;;  %5246 = vst [vmem:[#allocation58_spill] sm:$0xff] %v3844_v7 }
 0x46e   :  { %1181 = vmatpush1.bf16.msra.mxu0 %v3829_v38  ;;  %1222 = vmatpush1.bf16.msra.mxu1 %v3832_v57  ;;  %v3847_v38 = vld [vmem:[#allocation2 + $0x28] sm:$0xff]  ;;  %v3850_v57 = vld [vmem:[#allocation2 + $0x38] sm:$0xff] }
 0x46f   :  { %1182 = vmatprep.subr.bf16.mxu0 %v3835_v3  ;;  %1223 = vmatprep.subr.bf16.mxu1 %v3838_v4  ;;  %5247 = vst [vmem:[#allocation59_spill] sm:$0xff] %v3847_v38  ;;  %5248 = vst [vmem:[#allocation61_spill] sm:$0xff] %v3850_v57 }
 0x472   :  { %1183 = vmatpush1.bf16.msra.mxu0 %v3841_v6  ;;  %1224 = vmatpush1.bf16.msra.mxu1 %v3844_v7 }
 0x473   :  { %1234 = vmatprep.subr.bf16.mxu0 %v3847_v38  ;;  %1275 = vmatprep.subr.bf16.mxu1 %v3850_v57 }
 0x4c8   :  { %v936_v3 = vpop.f32.mrb[20].mxu0  ;;  %v977_v35 = vpop.f32.mrb[20].mxu1 }
 0x4c9   :  { %v1102_v4 = vrot.slane %v936_v3, 2  ;;  %v938_v34 = vpop.f32.mrb[21].mxu0  ;;  %v979_v32 = vpop.f32.mrb[21].mxu1  ;;  %v1104_v23 = vrot.slane %v977_v35, 2 }
 0x4ca   :  { %v1103_v6 = vrot.slane %v938_v34, 2  ;;  %v940_v31 = vpop.f32.mrb[22].mxu0  ;;  %v981_v30 = vpop.f32.mrb[22].mxu1  ;;  %v1105_v25 = vrot.slane %v979_v32, 2 }
 0x4cb   :  { %v1110_v29 = vadd.f32 %v1102_v4, %v1094_v37  ;;  %v941_v7 = vpop.f32.mrb[23].mxu0  ;;  %v982_v28 = vpop.f32.mrb[23].mxu1  ;;  %v1112_v50 = vadd.f32 %v1104_v23, %v1096_v45 }
 0x4cc   :  { %v1111_v27 = vadd.f32 %v1103_v6, %v1095_v33  ;;  %v1113_v57 = vadd.f32 %v1105_v25, %v1097_v24 }
 0x4cd   :  { %v2303_v26 = vmul.f32 -1.442695, %v1110_v29 }
 0x4ce   :  { %v2304_v38 = vmul.f32 -1.442695, %v1111_v27  ;;  %v2305_v3 = vmul.f32 -1.442695, %v1113_v57 }
 0x4cf   :  { %2433 = vpow2.f32 %v2303_v26  ;;  %v1134_v26 = vrot.slane %v3564_v2, 6 }
 0x4d0   :  { %2435 = vpow2.f32 %v2304_v38 }
 0x4d1   :  { %2437 = vpow2.f32 %v2305_v3 }
 0x4d2   :  { %2439 = vtanh.f32 %v1112_v50 }
 0x4d9   :  { %v2434_v46 = vpop.eup %2433 }
 0x4da   :  { %v2436_v48 = vpop.eup %2435  ;;  %v1117_v34 = vadd.f32 1.0, %v2434_v46 }
 0x4db   :  { %v1123_v30 = vadd.f32 1.0, %v2436_v48  ;;  %v2438_v28 = vpop.eup %2437 }
 0x4dc   :  { %2441 = vrcp.f32 %v1117_v34  ;;  %v2440_v29 = vpop.eup %2439  ;;  %v1130_v24 = vadd.f32 1.0, %v2438_v28 }
 0x4dd   :  { %2443 = vrcp.f32 %v1123_v30 }
 0x4de   :  { %2445 = vrcp.f32 %v1130_v24 }
 0x4e6   :  { %v2442_v27 = vpop.eup %2441 }
 0x4e7   :  { %v2444_v31 = vpop.eup %2443  ;;  %v1137_v32 = vmul.f32 %v2442_v27, %v2440_v29 }
 0x4e8   :  { %v1136_v25 = vmul.f32 %v2444_v31, %v1134_v26  ;;  %v2446_v46 = vpop.eup %2445 }
 0x4ea   :  { %v3854_v33 = vadd.f32 %v1137_v32, %v1136_v25 }
 0x4ec   :  { %2447 = vtanh.f32 %v3854_v33 }
 0x4f6   :  { %v2448_v45 = vpop.eup %2447 }
 0x4f7   :  { %v1140_v50 = vmul.f32 %v2448_v45, %v2446_v46 }
 0x508   :  { %v1018_v48 = vpop.f32.mrb[24].mxu0  ;;  %v1059_v23 = vpop.f32.mrb[24].mxu1 }
 0x509   :  { %v1066_v35 = vadd.f32 %v1018_v48, %v5158_v8  ;;  %v1020_v37 = vpop.f32.mrb[25].mxu0  ;;  %v1061_v38 = vpop.f32.mrb[25].mxu1  ;;  %v1068_v29 = vadd.f32 %v1059_v23, %v5071_v54 }
 0x50a   :  { %v1067_v2 = vadd.f32 %v1020_v37, %v5069_v49  ;;  %v1022_v57 = vpop.f32.mrb[26].mxu0  ;;  %v1063_v4 = vpop.f32.mrb[26].mxu1  ;;  %v1069_v30 = vadd.f32 %v1061_v38, %v5070_v55 }
 0x50b   :  { %v2300_v6 = vmul.f32 -1.442695, %v1066_v35  ;;  %v1023_v7 = vpop.f32.mrb[27].mxu0  ;;  %v1064_v3 = vpop.f32.mrb[27].mxu1 }
 0x50c   :  { %v2301_v34 = vmul.f32 -1.442695, %v1067_v2  ;;  %v2302_v28 = vmul.f32 -1.442695, %v1069_v30  ;;  %v3881_v30 = vld [vmem:[#allocation2 + $0xa0] sm:$0xff] }
 0x50d   :  { %2449 = vpow2.f32 %v2300_v6  ;;  %v1144_v6 = vpack.c.bf16 %v1140_v50, %v1140_v50  ;;  %v3878_v50 = vld [vmem:[#allocation2 + $0xb8] sm:$0xff] }
 0x50e   :  { %2451 = vpow2.f32 %v2301_v34 }
 0x50f   :  { %2453 = vpow2.f32 %v2302_v28  ;;  %v3865_v34 = vrot.slane %v1144_v6, 3  ;;  %v3884_v28 = vld [vmem:[#allocation2 + $0xb0] sm:$0xff]  ;;  %v3935_v6 = vld [vmem:[#allocation2 + $0x1e8] sm:$0xff] }
 0x510   :  { %2455 = vtanh.f32 %v1068_v29  ;;  %v3887_v29 = vld [vmem:[#allocation2 + $0xe8] sm:$0xff]  ;;  %5252 = vst [vmem:[#allocation65_spill] sm:$0xff] %v3935_v6 }
 0x517   :  { %v2450_v27 = vpop.eup %2449 }
 0x518   :  { %v2452_v26 = vpop.eup %2451  ;;  %v1073_v31 = vadd.f32 1.0, %v2450_v27  ;;  %v3890_v27 = vld [vmem:[#allocation2 + $0xf8] sm:$0xff] }
 0x519   :  { %v1079_v32 = vadd.f32 1.0, %v2452_v26  ;;  %v2454_v24 = vpop.eup %2453  ;;  %v3893_v26 = vld [vmem:[#allocation2 + $0xe0] sm:$0xff] }
 0x51a   :  { %2457 = vrcp.f32 %v1073_v31  ;;  %v2456_v25 = vpop.eup %2455  ;;  %v1086_v35 = vadd.f32 1.0, %v2454_v24  ;;  %v3896_v31 = vld [vmem:[#allocation2 + $0xf0] sm:$0xff]  ;;  %v3902_v24 = vld [vmem:[#allocation2 + $0x138] sm:$0xff] }
 0x51b   :  { %2459 = vrcp.f32 %v1079_v32  ;;  %v3899_v32 = vld [vmem:[#allocation2 + $0x128] sm:$0xff] }
 0x51c   :  { %2461 = vrcp.f32 %v1086_v35  ;;  %v3917_v35 = vld [vmem:[#allocation2 + $0x160] sm:$0xff] }
 0x524   :  { %v2458_v46 = vpop.eup %2457 }
 0x525   :  { %v2460_v45 = vpop.eup %2459  ;;  %v1090_v48 = vmul.f32 %v2458_v46, %v2456_v25  ;;  %v3905_v25 = vld [vmem:[#allocation2 + $0x120] sm:$0xff]  ;;  %v3908_v46 = vld [vmem:[#allocation2 + $0x130] sm:$0xff] }
 0x526   :  { %v1089_v37 = vmul.f32 %v2460_v45, %v3572_v36  ;;  %v2462_v23 = vpop.eup %2461  ;;  %v3874_v36 = vld [vmem:[#allocation2 + $0x70] sm:$0xff]  ;;  %v3911_v45 = vld [vmem:[#allocation2 + $0x168] sm:$0xff] }
 0x528   :  { %v3862_v38 = vadd.f32 %v1090_v48, %v1089_v37  ;;  %v3914_v48 = vld [vmem:[#allocation2 + $0x178] sm:$0xff]  ;;  %v3920_v37 = vld [vmem:[#allocation2 + $0x170] sm:$0xff] }
 0x52a   :  { %2463 = vtanh.f32 %v3862_v38 }
 0x534   :  { %v2464_v2 = vpop.eup %2463 }
 0x535   :  { %v1093_v57 = vmul.f32 %v2464_v2, %v2462_v23  ;;  %v3923_v23 = vld [vmem:[#allocation2 + $0x1a8] sm:$0xff]  ;;  %v3926_v2 = vld [vmem:[#allocation2 + $0x1b8] sm:$0xff] }
 0x536   :  { %5249 = vst [vmem:[#allocation60_spill] sm:$0xff] %v3926_v2 }
 0x537   :  { %v1142_v4 = vrot.slane %v1093_v57, 2  ;;  %v3929_v57 = vld [vmem:[#allocation2 + $0x1a0] sm:$0xff] }
 0x538   :  { %5250 = vst [vmem:[#allocation62_spill] sm:$0xff] %v3929_v57 }
 0x539   :  { %v1145_v7 = vpack.c.bf16 %v1142_v4, %v1142_v4  ;;  %v3932_v4 = vld [vmem:[#allocation2 + $0x1b0] sm:$0xff] }
 0x53a   :  { %5251 = vst [vmem:[#allocation63_spill] sm:$0xff] %v3932_v4 }
 0x53b   :  { %v1149_v3 = vrot.slane %v1145_v7, 3  ;;  %v3938_v7 = vld [vmem:[#allocation2 + $0x1f8] sm:$0xff] }
 0x53c   :  { %5253 = vst [vmem:[#allocation64_spill] sm:$0xff] %v3938_v7 }
 0x53d   :  { %1184 = vmatprep.mubr.bf16.mxu0 %v1149_v3  ;;  %1225 = vmatprep.mubr.bf16.mxu1 %v1149_v3 }
 0x53e   :  { %1185 = vmatmul.mubr.bf16.vlgmr.msra.gmra.mrb[28].mxu0 %v3865_v34  ;;  %1226 = vmatmul.mubr.bf16.vlgmr.msra.gmra.mrb[28].mxu1 %v3865_v34 }
 0x53f   :  { %1235 = vmatpush1.bf16.msra.mxu0 %v3579_v53  ;;  %1276 = vmatpush1.bf16.msra.mxu1 %v3582_v10 }
 0x540   :  { %1266 = vmatprep.mubr.bf16.mxu0 %v1149_v3  ;;  %1307 = vmatprep.mubr.bf16.mxu1 %v1149_v3  ;;  %v3941_v3 = vld [vmem:[#allocation2 + $0x1e0] sm:$0xff] }
 0x541   :  { %1236 = vmatprep.subr.bf16.mxu0 %v3585_v5  ;;  %1277 = vmatprep.subr.bf16.mxu1 %v3588_v11  ;;  %5254 = vst [vmem:[#allocation66_spill] sm:$0xff] %v3941_v3 }
 0x543   :  { %1237 = vmatpush1.bf16.msra.mxu0 %v3591_v56  ;;  %1278 = vmatpush1.bf16.msra.mxu1 %v3874_v36 }
 0x544   :  { %1238 = vmatprep.subr.bf16.mxu0 %v3595_v12  ;;  %1279 = vmatprep.subr.bf16.mxu1 %v3878_v50 }
 0x547   :  { %1239 = vmatpush1.bf16.msra.mxu0 %v3881_v30  ;;  %1280 = vmatpush1.bf16.msra.mxu1 %v3884_v28 }
 0x548   :  { %1240 = vmatprep.subr.bf16.mxu0 %v3887_v29  ;;  %1281 = vmatprep.subr.bf16.mxu1 %v3890_v27 }
 0x54b   :  { %1241 = vmatpush1.bf16.msra.mxu0 %v3893_v26  ;;  %1282 = vmatpush1.bf16.msra.mxu1 %v3896_v31 }
 0x54c   :  { %1242 = vmatprep.subr.bf16.mxu0 %v3899_v32  ;;  %1283 = vmatprep.subr.bf16.mxu1 %v3902_v24 }
 0x54f   :  { %1243 = vmatpush1.bf16.msra.mxu0 %v3905_v25  ;;  %1284 = vmatpush1.bf16.msra.mxu1 %v3908_v46 }
 0x550   :  { %1244 = vmatprep.subr.bf16.mxu0 %v3911_v45  ;;  %1285 = vmatprep.subr.bf16.mxu1 %v3914_v48 }
 0x553   :  { %1245 = vmatpush1.bf16.msra.mxu0 %v3917_v35  ;;  %1286 = vmatpush1.bf16.msra.mxu1 %v3920_v37 }
 0x554   :  { %1246 = vmatprep.subr.bf16.mxu0 %v3923_v23  ;;  %1287 = vmatprep.subr.bf16.mxu1 %v3926_v2  ;;  %v3944_v2 = vld [vmem:[#allocation2 + $0x1f0] sm:$0xff] }
 0x555   :  { %5255 = vst [vmem:[#allocation67_spill] sm:$0xff] %v3944_v2 }
 0x557   :  { %1247 = vmatpush1.bf16.msra.mxu0 %v3929_v57  ;;  %1288 = vmatpush1.bf16.msra.mxu1 %v3932_v4  ;;  %v3947_v57 = vld [vmem:[#allocation2 + $0x228] sm:$0xff]  ;;  %v3950_v4 = vld [vmem:[#allocation2 + $0x238] sm:$0xff] }
 0x558   :  { %1248 = vmatprep.subr.bf16.mxu0 %v3935_v6  ;;  %1289 = vmatprep.subr.bf16.mxu1 %v3938_v7  ;;  %5256 = vst [vmem:[#allocation69_spill] sm:$0xff] %v3947_v57  ;;  %5257 = vst [vmem:[#allocation68_spill] sm:$0xff] %v3950_v4  ;;  %v3953_v6 = vld [vmem:[#allocation2 + $0x220] sm:$0xff]  ;;  %v3956_v7 = vld [vmem:[#allocation2 + $0x230] sm:$0xff] }
 0x559   :  { %5258 = vst [vmem:[#allocation70_spill] sm:$0xff] %v3953_v6  ;;  %5259 = vst [vmem:[#allocation71_spill] sm:$0xff] %v3956_v7 }
 0x55b   :  { %1249 = vmatpush1.bf16.msra.mxu0 %v3941_v3  ;;  %1290 = vmatpush1.bf16.msra.mxu1 %v3944_v2  ;;  %v3959_v3 = vld [vmem:[#allocation2 + $0x268] sm:$0xff]  ;;  %v3962_v2 = vld [vmem:[#allocation2 + $0x278] sm:$0xff] }
 0x55c   :  { %1250 = vmatprep.subr.bf16.mxu0 %v3947_v57  ;;  %1291 = vmatprep.subr.bf16.mxu1 %v3950_v4  ;;  %5260 = vst [vmem:[#allocation73_spill] sm:$0xff] %v3959_v3  ;;  %5261 = vst [vmem:[#allocation72_spill] sm:$0xff] %v3962_v2  ;;  %v3965_v57 = vld [vmem:[#allocation2 + $0x260] sm:$0xff]  ;;  %v3968_v4 = vld [vmem:[#allocation2 + $0x270] sm:$0xff] }
 0x55d   :  { %5262 = vst [vmem:[#allocation74_spill] sm:$0xff] %v3965_v57  ;;  %5263 = vst [vmem:[#allocation75_spill] sm:$0xff] %v3968_v4 }
 0x55f   :  { %1251 = vmatpush1.bf16.msra.mxu0 %v3953_v6  ;;  %1292 = vmatpush1.bf16.msra.mxu1 %v3956_v7  ;;  %v3971_v6 = vld [vmem:[#allocation2 + $0x2a8] sm:$0xff]  ;;  %v3974_v7 = vld [vmem:[#allocation2 + $0x2b8] sm:$0xff] }
 0x560   :  { %1252 = vmatprep.subr.bf16.mxu0 %v3959_v3  ;;  %1293 = vmatprep.subr.bf16.mxu1 %v3962_v2  ;;  %5264 = vst [vmem:[#allocation77_spill] sm:$0xff] %v3971_v6  ;;  %5265 = vst [vmem:[#allocation76_spill] sm:$0xff] %v3974_v7  ;;  %v3977_v3 = vld [vmem:[#allocation2 + $0x2a0] sm:$0xff]  ;;  %v3980_v2 = vld [vmem:[#allocation2 + $0x2b0] sm:$0xff] }
 0x561   :  { %5266 = vst [vmem:[#allocation78_spill] sm:$0xff] %v3977_v3  ;;  %5267 = vst [vmem:[#allocation79_spill] sm:$0xff] %v3980_v2 }
 0x563   :  { %1253 = vmatpush1.bf16.msra.mxu0 %v3965_v57  ;;  %1294 = vmatpush1.bf16.msra.mxu1 %v3968_v4  ;;  %v3983_v57 = vld [vmem:[#allocation2 + $0x2e8] sm:$0xff]  ;;  %v3986_v4 = vld [vmem:[#allocation2 + $0x2f8] sm:$0xff] }
 0x564   :  { %1254 = vmatprep.subr.bf16.mxu0 %v3971_v6  ;;  %1295 = vmatprep.subr.bf16.mxu1 %v3974_v7  ;;  %5268 = vst [vmem:[#allocation81_spill] sm:$0xff] %v3983_v57  ;;  %5269 = vst [vmem:[#allocation80_spill] sm:$0xff] %v3986_v4  ;;  %v3989_v6 = vld [vmem:[#allocation2 + $0x2e0] sm:$0xff]  ;;  %v3992_v7 = vld [vmem:[#allocation2 + $0x2f0] sm:$0xff] }
 0x565   :  { %5270 = vst [vmem:[#allocation82_spill] sm:$0xff] %v3989_v6  ;;  %5271 = vst [vmem:[#allocation83_spill] sm:$0xff] %v3992_v7 }
 0x567   :  { %1255 = vmatpush1.bf16.msra.mxu0 %v3977_v3  ;;  %1296 = vmatpush1.bf16.msra.mxu1 %v3980_v2  ;;  %v3995_v3 = vld [vmem:[#allocation2 + $0x328] sm:$0xff]  ;;  %v3998_v2 = vld [vmem:[#allocation2 + $0x338] sm:$0xff] }
 0x568   :  { %1256 = vmatprep.subr.bf16.mxu0 %v3983_v57  ;;  %1297 = vmatprep.subr.bf16.mxu1 %v3986_v4  ;;  %5272 = vst [vmem:[#allocation85_spill] sm:$0xff] %v3995_v3  ;;  %5273 = vst [vmem:[#allocation86_spill] sm:$0xff] %v3998_v2  ;;  %v4001_v57 = vld [vmem:[#allocation2 + $0x320] sm:$0xff]  ;;  %v4004_v4 = vld [vmem:[#allocation2 + $0x330] sm:$0xff] }
 0x569   :  { %5274 = vst [vmem:[#allocation87_spill] sm:$0xff] %v4001_v57  ;;  %5275 = vst [vmem:[#allocation89_spill] sm:$0xff] %v4004_v4 }
 0x56b   :  { %1257 = vmatpush1.bf16.msra.mxu0 %v3989_v6  ;;  %1298 = vmatpush1.bf16.msra.mxu1 %v3992_v7  ;;  %v4007_v6 = vld [vmem:[#allocation2 + $0x368] sm:$0xff]  ;;  %v4010_v7 = vld [vmem:[#allocation2 + $0x378] sm:$0xff] }
 0x56c   :  { %1258 = vmatprep.subr.bf16.mxu0 %v3995_v3  ;;  %1299 = vmatprep.subr.bf16.mxu1 %v3998_v2  ;;  %5276 = vst [vmem:[#allocation90_spill] sm:$0xff] %v4007_v6  ;;  %5277 = vst [vmem:[#allocation100_spill] sm:$0xff] %v4010_v7  ;;  %v4013_v3 = vld [vmem:[#allocation2 + $0x360] sm:$0xff]  ;;  %v4016_v2 = vld [vmem:[#allocation2 + $0x370] sm:$0xff] }
 0x56d   :  { %5278 = vst [vmem:[#allocation101_spill] sm:$0xff] %v4013_v3  ;;  %5279 = vst [vmem:[#allocation102_spill] sm:$0xff] %v4016_v2 }
 0x56f   :  { %1259 = vmatpush1.bf16.msra.mxu0 %v4001_v57  ;;  %1300 = vmatpush1.bf16.msra.mxu1 %v4004_v4  ;;  %v4019_v57 = vld [vmem:[#allocation2 + $0x3a8] sm:$0xff]  ;;  %v4022_v4 = vld [vmem:[#allocation2 + $0x3b8] sm:$0xff] }
 0x570   :  { %1260 = vmatprep.subr.bf16.mxu0 %v4007_v6  ;;  %1301 = vmatprep.subr.bf16.mxu1 %v4010_v7  ;;  %5280 = vst [vmem:[#allocation103_spill] sm:$0xff] %v4019_v57  ;;  %5281 = vst [vmem:[#allocation104_spill] sm:$0xff] %v4022_v4  ;;  %v4025_v6 = vld [vmem:[#allocation2 + $0x3a0] sm:$0xff]  ;;  %v4028_v7 = vld [vmem:[#allocation2 + $0x3b0] sm:$0xff] }
 0x571   :  { %5282 = vst [vmem:[#allocation105_spill] sm:$0xff] %v4025_v6  ;;  %5283 = vst [vmem:[#allocation106_spill] sm:$0xff] %v4028_v7 }
 0x573   :  { %1261 = vmatpush1.bf16.msra.mxu0 %v4013_v3  ;;  %1302 = vmatpush1.bf16.msra.mxu1 %v4016_v2  ;;  %v4031_v3 = vld [vmem:[#allocation2 + $0x3e8] sm:$0xff]  ;;  %v4034_v2 = vld [vmem:[#allocation2 + $0x3f8] sm:$0xff] }
 0x574   :  { %1262 = vmatprep.subr.bf16.mxu0 %v4019_v57  ;;  %1303 = vmatprep.subr.bf16.mxu1 %v4022_v4  ;;  %5284 = vst [vmem:[#allocation107_spill] sm:$0xff] %v4031_v3  ;;  %5285 = vst [vmem:[#allocation108_spill] sm:$0xff] %v4034_v2  ;;  %v4037_v57 = vld [vmem:[#allocation2 + $0x3e0] sm:$0xff]  ;;  %v4040_v4 = vld [vmem:[#allocation2 + $0x3f0] sm:$0xff] }
 0x575   :  { %5286 = vst [vmem:[#allocation109_spill] sm:$0xff] %v4037_v57  ;;  %5287 = vst [vmem:[#allocation110_spill] sm:$0xff] %v4040_v4 }
 0x577   :  { %1263 = vmatpush1.bf16.msra.mxu0 %v4025_v6  ;;  %1304 = vmatpush1.bf16.msra.mxu1 %v4028_v7 }
 0x578   :  { %1264 = vmatprep.subr.bf16.mxu0 %v4031_v3  ;;  %1305 = vmatprep.subr.bf16.mxu1 %v4034_v2 }
 0x57b   :  { %1265 = vmatpush1.bf16.msra.mxu0 %v4037_v57  ;;  %1306 = vmatpush1.bf16.msra.mxu1 %v4040_v4 }
 0x57c   :  { %1381 = vmatprep.subr.bf16.mxu0 %v3653_v0  ;;  %1422 = vmatprep.subr.bf16.mxu1 %v3656_v17 }
 0x57e   :  { %1267 = vmatmul.mubr.bf16.vlgmr.msra.gmra.mrb[32].mxu0 %v3865_v34  ;;  %1308 = vmatmul.mubr.bf16.vlgmr.msra.gmra.mrb[32].mxu1 %v3865_v34  ;;  %v5288_v34 = vld [vmem:[#allocation98_spill] sm:$0xff] }
 0x57f   :  { %1382 = vmatpush1.bf16.msra.mxu0 %v3661_v21  ;;  %1423 = vmatpush1.bf16.msra.mxu1 %v3664_v19 }
 0x580   :  { %1383 = vmatprep.subr.bf16.mxu0 %v3667_v15  ;;  %1424 = vmatprep.subr.bf16.mxu1 %v3670_v1 }
 0x583   :  { %1384 = vmatpush1.bf16.msra.mxu0 %v3673_v60  ;;  %1425 = vmatpush1.bf16.msra.mxu1 %v3676_v63 }
 0x584   :  { %1385 = vmatprep.subr.bf16.mxu0 %v3679_v61  ;;  %1426 = vmatprep.subr.bf16.mxu1 %v3682_v41 }
 0x587   :  { %1386 = vmatpush1.bf16.msra.mxu0 %v3685_v43  ;;  %1427 = vmatpush1.bf16.msra.mxu1 %v3688_v40  ;;  %v1346_v40 = vld [vmem:[#allocation3 + $0x30] sm:$0x3] }
 0x588   :  { %1387 = vmatprep.subr.bf16.mxu0 %v3691_v42  ;;  %1428 = vmatprep.subr.bf16.mxu1 %v3694_v58 }
 0x58b   :  { %1388 = vmatpush1.bf16.msra.mxu0 %v3697_v62  ;;  %1429 = vmatpush1.bf16.msra.mxu1 %v3700_v59 }
 0x58c   :  { %1389 = vmatprep.subr.bf16.mxu0 %v3703_v47  ;;  %1430 = vmatprep.subr.bf16.mxu1 %v3706_v52 }
 0x58f   :  { %1390 = vmatpush1.bf16.msra.mxu0 %v3709_v39  ;;  %1431 = vmatpush1.bf16.msra.mxu1 %v3712_v51  ;;  %v5289_v39 = vld [vmem:[#allocation99_spill] sm:$0xff]  ;;  %v5290_v51 = vld [vmem:[#allocation14_spill] sm:$0xff] }
 0x590   :  { %1391 = vmatprep.subr.bf16.mxu0 %v3715_v9  ;;  %1432 = vmatprep.subr.bf16.mxu1 %v3718_v13  ;;  %v5291_v9 = vld [vmem:[#allocation15_spill] sm:$0xff]  ;;  %v5292_v13 = vld [vmem:[#allocation17_spill] sm:$0xff] }
 0x593   :  { %1392 = vmatpush1.bf16.msra.mxu0 %v3721_v14  ;;  %1433 = vmatpush1.bf16.msra.mxu1 %v3724_v16  ;;  %v5293_v14 = vld [vmem:[#allocation16_spill] sm:$0xff]  ;;  %v5294_v16 = vld [vmem:[#allocation18_spill] sm:$0xff] }
 0x594   :  { %1393 = vmatprep.subr.bf16.mxu0 %v3727_v18  ;;  %1434 = vmatprep.subr.bf16.mxu1 %v3730_v44  ;;  %v5295_v18 = vld [vmem:[#allocation19_spill] sm:$0xff]  ;;  %v5296_v44 = vld [vmem:[#allocation21_spill] sm:$0xff] }
 0x597   :  { %1394 = vmatpush1.bf16.msra.mxu0 %v3733_v20  ;;  %1435 = vmatpush1.bf16.msra.mxu1 %v3736_v22  ;;  %v5297_v20 = vld [vmem:[#allocation20_spill] sm:$0xff]  ;;  %v5298_v22 = vld [vmem:[#allocation22_spill] sm:$0xff] }
 0x598   :  { %1395 = vmatprep.subr.bf16.mxu0 %v5288_v34  ;;  %1436 = vmatprep.subr.bf16.mxu1 %v5289_v39  ;;  %v5299_v34 = vld [vmem:[#allocation23_spill] sm:$0xff]  ;;  %v5300_v39 = vld [vmem:[#allocation25_spill] sm:$0xff] }
 0x59b   :  { %1396 = vmatpush1.bf16.msra.mxu0 %v5290_v51  ;;  %1437 = vmatpush1.bf16.msra.mxu1 %v5291_v9  ;;  %v5301_v51 = vld [vmem:[#allocation24_spill] sm:$0xff]  ;;  %v5302_v9 = vld [vmem:[#allocation26_spill] sm:$0xff] }
 0x59c   :  { %1397 = vmatprep.subr.bf16.mxu0 %v5292_v13  ;;  %1438 = vmatprep.subr.bf16.mxu1 %v5293_v14  ;;  %v5303_v13 = vld [vmem:[#allocation27_spill] sm:$0xff]  ;;  %v5304_v14 = vld [vmem:[#allocation29_spill] sm:$0xff] }
 0x59f   :  { %1398 = vmatpush1.bf16.msra.mxu0 %v5294_v16  ;;  %1439 = vmatpush1.bf16.msra.mxu1 %v5295_v18  ;;  %v5305_v16 = vld [vmem:[#allocation28_spill] sm:$0xff]  ;;  %v5306_v18 = vld [vmem:[#allocation30_spill] sm:$0xff] }
 0x5a0   :  { %1399 = vmatprep.subr.bf16.mxu0 %v5296_v44  ;;  %1440 = vmatprep.subr.bf16.mxu1 %v5297_v20  ;;  %v5307_v44 = vld [vmem:[#allocation31_spill] sm:$0xff]  ;;  %v5308_v20 = vld [vmem:[#allocation33_spill] sm:$0xff] }
 0x5a3   :  { %1400 = vmatpush1.bf16.msra.mxu0 %v5298_v22  ;;  %1441 = vmatpush1.bf16.msra.mxu1 %v5299_v34  ;;  %v5309_v22 = vld [vmem:[#allocation32_spill] sm:$0xff]  ;;  %v5310_v34 = vld [vmem:[#allocation34_spill] sm:$0xff] }
 0x5a4   :  { %1401 = vmatprep.subr.bf16.mxu0 %v5300_v39  ;;  %1442 = vmatprep.subr.bf16.mxu1 %v5301_v51  ;;  %v5311_v39 = vld [vmem:[#allocation35_spill] sm:$0xff]  ;;  %v5312_v51 = vld [vmem:[#allocation37_spill] sm:$0xff] }
 0x5a7   :  { %1402 = vmatpush1.bf16.msra.mxu0 %v5302_v9  ;;  %1443 = vmatpush1.bf16.msra.mxu1 %v5303_v13  ;;  %v5313_v9 = vld [vmem:[#allocation36_spill] sm:$0xff]  ;;  %v5314_v13 = vld [vmem:[#allocation38_spill] sm:$0xff] }
 0x5a8   :  { %1403 = vmatprep.subr.bf16.mxu0 %v5304_v14  ;;  %1444 = vmatprep.subr.bf16.mxu1 %v5305_v16  ;;  %v5315_v14 = vld [vmem:[#allocation39_spill] sm:$0xff]  ;;  %v5316_v16 = vld [vmem:[#allocation41_spill] sm:$0xff] }
 0x5ab   :  { %1404 = vmatpush1.bf16.msra.mxu0 %v5306_v18  ;;  %1445 = vmatpush1.bf16.msra.mxu1 %v5307_v44  ;;  %v5317_v18 = vld [vmem:[#allocation40_spill] sm:$0xff]  ;;  %v5318_v44 = vld [vmem:[#allocation42_spill] sm:$0xff] }
 0x5ac   :  { %1405 = vmatprep.subr.bf16.mxu0 %v5308_v20  ;;  %1446 = vmatprep.subr.bf16.mxu1 %v5309_v22  ;;  %v5319_v20 = vld [vmem:[#allocation43_spill] sm:$0xff]  ;;  %v5320_v22 = vld [vmem:[#allocation45_spill] sm:$0xff] }
 0x5af   :  { %1406 = vmatpush1.bf16.msra.mxu0 %v5310_v34  ;;  %1447 = vmatpush1.bf16.msra.mxu1 %v5311_v39  ;;  %v5321_v34 = vld [vmem:[#allocation44_spill] sm:$0xff]  ;;  %v5322_v39 = vld [vmem:[#allocation46_spill] sm:$0xff] }
 0x5b0   :  { %1407 = vmatprep.subr.bf16.mxu0 %v5312_v51  ;;  %1448 = vmatprep.subr.bf16.mxu1 %v5313_v9  ;;  %v5323_v51 = vld [vmem:[#allocation58_spill] sm:$0xff]  ;;  %v5324_v9 = vld [vmem:[#allocation59_spill] sm:$0xff] }
 0x5b3   :  { %1408 = vmatpush1.bf16.msra.mxu0 %v5314_v13  ;;  %1449 = vmatpush1.bf16.msra.mxu1 %v5315_v14  ;;  %v5325_v13 = vld [vmem:[#allocation61_spill] sm:$0xff] }
 0x5b4   :  { %1409 = vmatprep.subr.bf16.mxu0 %v5316_v16  ;;  %1450 = vmatprep.subr.bf16.mxu1 %v5317_v18  ;;  %v1344_v14 = vld [vmem:[#allocation3 + $0x20] sm:$0x3]  ;;  %v1345_v16 = vld [vmem:[#allocation3 + $0x28] sm:$0x3] }
 0x5b7   :  { %1410 = vmatpush1.bf16.msra.mxu0 %v5318_v44  ;;  %1451 = vmatpush1.bf16.msra.mxu1 %v5319_v20 }
 0x5b8   :  { %1411 = vmatprep.subr.bf16.mxu0 %v5320_v22  ;;  %1452 = vmatprep.subr.bf16.mxu1 %v5321_v34 }
 0x5bb   :  { %1412 = vmatpush1.bf16.msra.mxu0 %v5322_v39  ;;  %1453 = vmatpush1.bf16.msra.mxu1 %v5323_v51  ;;  %v1347_v51 = vld [vmem:[#allocation3 + $0x38] sm:$0x3] }
 0x5bc   :  { %1463 = vmatprep.subr.bf16.mxu0 %v5324_v9  ;;  %1504 = vmatprep.subr.bf16.mxu1 %v5325_v13 }
 0x611   :  { %v1186_v52 = vpop.f32.mrb[28].mxu0  ;;  %v1227_v18 = vpop.f32.mrb[28].mxu1 }
 0x612   :  { %v1348_v47 = vadd.f32 %v1344_v14, %v1186_v52  ;;  %v1188_v44 = vpop.f32.mrb[29].mxu0  ;;  %v1229_v59 = vpop.f32.mrb[29].mxu1  ;;  %v1350_v43 = vadd.f32 %v1346_v40, %v1227_v18 }
 0x613   :  { %v1349_v20 = vadd.f32 %v1345_v16, %v1188_v44  ;;  %v1190_v62 = vpop.f32.mrb[30].mxu0  ;;  %v1231_v22 = vpop.f32.mrb[30].mxu1  ;;  %v1351_v9 = vadd.f32 %v1347_v51, %v1229_v59 }
 0x614   :  { %v2309_v58 = vmul.f32 -1.442695, %v1348_v47  ;;  %v1191_v34 = vpop.f32.mrb[31].mxu0  ;;  %v1232_v42 = vpop.f32.mrb[31].mxu1 }
 0x615   :  { %v2310_v39 = vmul.f32 -1.442695, %v1349_v20  ;;  %v2311_v13 = vmul.f32 -1.442695, %v1351_v9  ;;  %v1372_v42 = vrot.slane %v3854_v33, 6 }
 0x616   :  { %2465 = vpow2.f32 %v2309_v58 }
 0x617   :  { %2467 = vpow2.f32 %v2310_v39 }
 0x618   :  { %2469 = vpow2.f32 %v2311_v13 }
 0x619   :  { %2471 = vtanh.f32 %v1350_v43 }
 0x620   :  { %v2466_v41 = vpop.eup %2465 }
 0x621   :  { %v2468_v61 = vpop.eup %2467  ;;  %v1355_v63 = vadd.f32 1.0, %v2466_v41 }
 0x622   :  { %v1361_v52 = vadd.f32 1.0, %v2468_v61  ;;  %v2470_v62 = vpop.eup %2469 }
 0x623   :  { %2473 = vrcp.f32 %v1355_v63  ;;  %v2472_v47 = vpop.eup %2471  ;;  %v1368_v39 = vadd.f32 1.0, %v2470_v62 }
 0x624   :  { %2475 = vrcp.f32 %v1361_v52 }
 0x625   :  { %2477 = vrcp.f32 %v1368_v39 }
 0x62d   :  { %v2474_v14 = vpop.eup %2473 }
 0x62e   :  { %v2476_v58 = vpop.eup %2475  ;;  %v1375_v16 = vmul.f32 %v2474_v14, %v2472_v47 }
 0x62f   :  { %v1374_v59 = vmul.f32 %v2476_v58, %v1372_v42  ;;  %v2478_v41 = vpop.eup %2477 }
 0x631   :  { %v4112_v51 = vadd.f32 %v1375_v16, %v1374_v59 }
 0x633   :  { %2479 = vtanh.f32 %v4112_v51 }
 0x63d   :  { %v2480_v40 = vpop.eup %2479 }
 0x63e   :  { %v1378_v43 = vmul.f32 %v2480_v40, %v2478_v41 }
 0x651   :  { %v1268_v61 = vpop.f32.mrb[32].mxu0  ;;  %v1309_v63 = vpop.f32.mrb[32].mxu1 }
 0x652   :  { %v1316_v9 = vadd.f32 %v1268_v61, %v5158_v8  ;;  %v1270_v13 = vpop.f32.mrb[33].mxu0  ;;  %v1311_v18 = vpop.f32.mrb[33].mxu1  ;;  %v1318_v42 = vadd.f32 %v1309_v63, %v5071_v54 }
 0x653   :  { %v1317_v44 = vadd.f32 %v1270_v13, %v5069_v49  ;;  %v1272_v20 = vpop.f32.mrb[34].mxu0  ;;  %v1313_v22 = vpop.f32.mrb[34].mxu1  ;;  %v1319_v47 = vadd.f32 %v1311_v18, %v5070_v55 }
 0x654   :  { %v2306_v33 = vmul.f32 -1.442695, %v1316_v9  ;;  %v1273_v34 = vpop.f32.mrb[35].mxu0  ;;  %v1314_v52 = vpop.f32.mrb[35].mxu1 }
 0x655   :  { %v2307_v62 = vmul.f32 -1.442695, %v1317_v44  ;;  %v2308_v14 = vmul.f32 -1.442695, %v1319_v47  ;;  %v4123_v52 = vpack.c.bf16 %v1378_v43, %v1378_v43  ;;  %v5333_v43 = vld [vmem:[#allocation69_spill] sm:$0xff]  ;;  %v5335_v47 = vld [vmem:[#allocation70_spill] sm:$0xff] }
 0x656   :  { %2481 = vpow2.f32 %v2306_v33 }
 0x657   :  { %2483 = vpow2.f32 %v2307_v62  ;;  %v5334_v62 = vld [vmem:[#allocation68_spill] sm:$0xff] }
 0x658   :  { %2485 = vpow2.f32 %v2308_v14  ;;  %v5336_v14 = vld [vmem:[#allocation71_spill] sm:$0xff] }
 0x659   :  { %2487 = vtanh.f32 %v1318_v42  ;;  %v5337_v42 = vld [vmem:[#allocation73_spill] sm:$0xff] }
 0x660   :  { %v2482_v58 = vpop.eup %2481 }
 0x661   :  { %v2484_v16 = vpop.eup %2483  ;;  %v1323_v39 = vadd.f32 1.0, %v2482_v58  ;;  %v5338_v58 = vld [vmem:[#allocation72_spill] sm:$0xff] }
 0x662   :  { %v1329_v59 = vadd.f32 1.0, %v2484_v16  ;;  %v2486_v41 = vpop.eup %2485  ;;  %v5339_v16 = vld [vmem:[#allocation74_spill] sm:$0xff] }
 0x663   :  { %2489 = vrcp.f32 %v1323_v39  ;;  %v2488_v40 = vpop.eup %2487  ;;  %v1336_v44 = vadd.f32 1.0, %v2486_v41  ;;  %v5340_v39 = vld [vmem:[#allocation75_spill] sm:$0xff]  ;;  %v5342_v41 = vld [vmem:[#allocation76_spill] sm:$0xff] }
 0x664   :  { %2491 = vrcp.f32 %v1329_v59  ;;  %v5341_v59 = vld [vmem:[#allocation77_spill] sm:$0xff] }
 0x665   :  { %2493 = vrcp.f32 %v1336_v44  ;;  %v5347_v44 = vld [vmem:[#allocation82_spill] sm:$0xff] }
 0x66d   :  { %v2490_v61 = vpop.eup %2489 }
 0x66e   :  { %v2492_v9 = vpop.eup %2491  ;;  %v1340_v13 = vmul.f32 %v2490_v61, %v2488_v40  ;;  %v5343_v40 = vld [vmem:[#allocation78_spill] sm:$0xff]  ;;  %v5344_v61 = vld [vmem:[#allocation79_spill] sm:$0xff] }
 0x66f   :  { %v1339_v20 = vmul.f32 %v2492_v9, %v3862_v38  ;;  %v2494_v63 = vpop.eup %2493  ;;  %v5332_v38 = vld [vmem:[#allocation67_spill] sm:$0xff]  ;;  %v5345_v9 = vld [vmem:[#allocation81_spill] sm:$0xff] }
 0x671   :  { %v4120_v18 = vadd.f32 %v1340_v13, %v1339_v20  ;;  %v5346_v13 = vld [vmem:[#allocation80_spill] sm:$0xff]  ;;  %v5348_v20 = vld [vmem:[#allocation83_spill] sm:$0xff] }
 0x673   :  { %2495 = vtanh.f32 %v4120_v18 }
 0x67d   :  { %v2496_v22 = vpop.eup %2495 }
 0x67e   :  { %v1343_v33 = vmul.f32 %v2496_v22, %v2494_v63  ;;  %v5349_v63 = vld [vmem:[#allocation85_spill] sm:$0xff]  ;;  %v5350_v22 = vld [vmem:[#allocation86_spill] sm:$0xff] }
 0x680   :  { %v1380_v34 = vpack.c.bf16 %v1343_v33, %v1343_v33  ;;  %v5351_v33 = vld [vmem:[#allocation87_spill] sm:$0xff] }
 0x682   :  { %1413 = vmatprep.mubr.bf16.mxu0 %v1380_v34  ;;  %1454 = vmatprep.mubr.bf16.mxu1 %v1380_v34 }
 0x683   :  { %1414 = vmatmul.mubr.bf16.vlgmr.msra.gmra.mrb[36].mxu0 %v4123_v52  ;;  %1455 = vmatmul.mubr.bf16.vlgmr.msra.gmra.mrb[36].mxu1 %v4123_v52 }
 0x684   :  { %1464 = vmatpush1.bf16.msra.mxu0 %v3579_v53  ;;  %1505 = vmatpush1.bf16.msra.mxu1 %v3582_v10  ;;  %v5326_v53 = vld [vmem:[#allocation60_spill] sm:$0xff]  ;;  %v5327_v10 = vld [vmem:[#allocation62_spill] sm:$0xff] }
 0x685   :  { %1495 = vmatprep.mubr.bf16.mxu0 %v1380_v34  ;;  %1536 = vmatprep.mubr.bf16.mxu1 %v1380_v34  ;;  %v5352_v34 = vld [vmem:[#allocation89_spill] sm:$0xff] }
 0x686   :  { %1465 = vmatprep.subr.bf16.mxu0 %v3585_v5  ;;  %1506 = vmatprep.subr.bf16.mxu1 %v3588_v11  ;;  %v5328_v5 = vld [vmem:[#allocation63_spill] sm:$0xff]  ;;  %v5329_v11 = vld [vmem:[#allocation65_spill] sm:$0xff] }
 0x688   :  { %1466 = vmatpush1.bf16.msra.mxu0 %v3591_v56  ;;  %1507 = vmatpush1.bf16.msra.mxu1 %v3874_v36  ;;  %v5330_v56 = vld [vmem:[#allocation64_spill] sm:$0xff] }
 0x689   :  { %1467 = vmatprep.subr.bf16.mxu0 %v3595_v12  ;;  %1508 = vmatprep.subr.bf16.mxu1 %v3878_v50  ;;  %v5331_v12 = vld [vmem:[#allocation66_spill] sm:$0xff] }
 0x68c   :  { %1468 = vmatpush1.bf16.msra.mxu0 %v3881_v30  ;;  %1509 = vmatpush1.bf16.msra.mxu1 %v3884_v28 }
 0x68d   :  { %1469 = vmatprep.subr.bf16.mxu0 %v3887_v29  ;;  %1510 = vmatprep.subr.bf16.mxu1 %v3890_v27 }
 0x690   :  { %1470 = vmatpush1.bf16.msra.mxu0 %v3893_v26  ;;  %1511 = vmatpush1.bf16.msra.mxu1 %v3896_v31 }
 0x691   :  { %1471 = vmatprep.subr.bf16.mxu0 %v3899_v32  ;;  %1512 = vmatprep.subr.bf16.mxu1 %v3902_v24 }
 0x694   :  { %1472 = vmatpush1.bf16.msra.mxu0 %v3905_v25  ;;  %1513 = vmatpush1.bf16.msra.mxu1 %v3908_v46 }
 0x695   :  { %1473 = vmatprep.subr.bf16.mxu0 %v3911_v45  ;;  %1514 = vmatprep.subr.bf16.mxu1 %v3914_v48 }
 0x698   :  { %1474 = vmatpush1.bf16.msra.mxu0 %v3917_v35  ;;  %1515 = vmatpush1.bf16.msra.mxu1 %v3920_v37 }
 0x699   :  { %1475 = vmatprep.subr.bf16.mxu0 %v3923_v23  ;;  %1516 = vmatprep.subr.bf16.mxu1 %v5326_v53 }
 0x69c   :  { %1476 = vmatpush1.bf16.msra.mxu0 %v5327_v10  ;;  %1517 = vmatpush1.bf16.msra.mxu1 %v5328_v5 }
 0x69d   :  { %1477 = vmatprep.subr.bf16.mxu0 %v5329_v11  ;;  %1518 = vmatprep.subr.bf16.mxu1 %v5330_v56 }
 0x6a0   :  { %1478 = vmatpush1.bf16.msra.mxu0 %v5331_v12  ;;  %1519 = vmatpush1.bf16.msra.mxu1 %v5332_v38 }
 0x6a1   :  { %1479 = vmatprep.subr.bf16.mxu0 %v5333_v43  ;;  %1520 = vmatprep.subr.bf16.mxu1 %v5334_v62 }
 0x6a4   :  { %1480 = vmatpush1.bf16.msra.mxu0 %v5335_v47  ;;  %1521 = vmatpush1.bf16.msra.mxu1 %v5336_v14 }
 0x6a5   :  { %1481 = vmatprep.subr.bf16.mxu0 %v5337_v42  ;;  %1522 = vmatprep.subr.bf16.mxu1 %v5338_v58 }
 0x6a8   :  { %1482 = vmatpush1.bf16.msra.mxu0 %v5339_v16  ;;  %1523 = vmatpush1.bf16.msra.mxu1 %v5340_v39 }
 0x6a9   :  { %1483 = vmatprep.subr.bf16.mxu0 %v5341_v59  ;;  %1524 = vmatprep.subr.bf16.mxu1 %v5342_v41  ;;  %v5353_v41 = vld [vmem:[#allocation90_spill] sm:$0xff] }
 0x6ac   :  { %1484 = vmatpush1.bf16.msra.mxu0 %v5343_v40  ;;  %1525 = vmatpush1.bf16.msra.mxu1 %v5344_v61  ;;  %v5354_v40 = vld [vmem:[#allocation100_spill] sm:$0xff]  ;;  %v5355_v61 = vld [vmem:[#allocation101_spill] sm:$0xff] }
 0x6ad   :  { %1485 = vmatprep.subr.bf16.mxu0 %v5345_v9  ;;  %1526 = vmatprep.subr.bf16.mxu1 %v5346_v13  ;;  %v5356_v9 = vld [vmem:[#allocation102_spill] sm:$0xff]  ;;  %v5357_v13 = vld [vmem:[#allocation103_spill] sm:$0xff] }
 0x6b0   :  { %1486 = vmatpush1.bf16.msra.mxu0 %v5347_v44  ;;  %1527 = vmatpush1.bf16.msra.mxu1 %v5348_v20  ;;  %v5358_v44 = vld [vmem:[#allocation104_spill] sm:$0xff] }
 0x6b1   :  { %1487 = vmatprep.subr.bf16.mxu0 %v5349_v63  ;;  %1528 = vmatprep.subr.bf16.mxu1 %v5350_v22 }
 0x6b4   :  { %1488 = vmatpush1.bf16.msra.mxu0 %v5351_v33  ;;  %1529 = vmatpush1.bf16.msra.mxu1 %v5352_v34  ;;  %v1575_v34 = vld [vmem:[#allocation3 + $0x30] sm:$0xc] }
 0x6b5   :  { %1489 = vmatprep.subr.bf16.mxu0 %v5353_v41  ;;  %1530 = vmatprep.subr.bf16.mxu1 %v5354_v40 }
 0x6b8   :  { %1490 = vmatpush1.bf16.msra.mxu0 %v5355_v61  ;;  %1531 = vmatpush1.bf16.msra.mxu1 %v5356_v9 }
 0x6b9   :  { %1491 = vmatprep.subr.bf16.mxu0 %v5357_v13  ;;  %1532 = vmatprep.subr.bf16.mxu1 %v5358_v44 }
 0x6bc   :  { %1492 = vmatpush1.bf16.msra.mxu0 %v4025_v6  ;;  %1533 = vmatpush1.bf16.msra.mxu1 %v4028_v7 }
 0x6bd   :  { %1493 = vmatprep.subr.bf16.mxu0 %v4031_v3  ;;  %1534 = vmatprep.subr.bf16.mxu1 %v4034_v2  ;;  %v5363_v2 = vld [vmem:[#allocation50_spill] sm:$0xff] }
 0x6c0   :  { %1494 = vmatpush1.bf16.msra.mxu0 %v4037_v57  ;;  %1535 = vmatpush1.bf16.msra.mxu1 %v4040_v4  ;;  %v5359_v57 = vld [vmem:[#allocation13_spill] sm:$0xff]  ;;  %v5360_v4 = vld [vmem:[#allocation47_spill] sm:$0xff] }
 0x6c1   :  { %1631 = vmatprep.subr.bf16.mxu0 %v3653_v0  ;;  %1672 = vmatprep.subr.bf16.mxu1 %v3656_v17  ;;  %v5361_v0 = vld [vmem:[#allocation49_spill] sm:$0xff]  ;;  %v5362_v17 = vld [vmem:[#allocation48_spill] sm:$0xff] }
 0x6c3   :  { %1496 = vmatmul.mubr.bf16.vlgmr.msra.gmra.mrb[40].mxu0 %v4123_v52  ;;  %1537 = vmatmul.mubr.bf16.vlgmr.msra.gmra.mrb[40].mxu1 %v4123_v52  ;;  %v5364_v52 = vld [vmem:[#allocation51_spill] sm:$0xff] }
 0x6c4   :  { %1632 = vmatpush1.bf16.msra.mxu0 %v3661_v21  ;;  %1673 = vmatpush1.bf16.msra.mxu1 %v3664_v19  ;;  %v5365_v21 = vld [vmem:[#allocation53_spill] sm:$0xff]  ;;  %v5366_v19 = vld [vmem:[#allocation52_spill] sm:$0xff] }
 0x6c5   :  { %1633 = vmatprep.subr.bf16.mxu0 %v3667_v15  ;;  %1674 = vmatprep.subr.bf16.mxu1 %v3670_v1  ;;  %v5367_v15 = vld [vmem:[#allocation54_spill] sm:$0xff]  ;;  %v5368_v1 = vld [vmem:[#allocation55_spill] sm:$0xff] }
 0x6c8   :  { %1634 = vmatpush1.bf16.msra.mxu0 %v3673_v60  ;;  %1675 = vmatpush1.bf16.msra.mxu1 %v5359_v57  ;;  %v5369_v60 = vld [vmem:[#allocation57_spill] sm:$0xff]  ;;  %v5370_v57 = vld [vmem:[#allocation56_spill] sm:$0xff] }
 0x6c9   :  { %1635 = vmatprep.subr.bf16.mxu0 %v5360_v4  ;;  %1676 = vmatprep.subr.bf16.mxu1 %v5361_v0  ;;  %v5371_v4 = vld [vmem:[#allocation84_spill] sm:$0xff] }
 0x6ca   :  { %v5372_v0 = vld [vmem:[#allocation88_spill] sm:$0xff] }
 0x6cc   :  { %1636 = vmatpush1.bf16.msra.mxu0 %v5362_v17  ;;  %1677 = vmatpush1.bf16.msra.mxu1 %v5363_v2  ;;  %v5373_v17 = vld [vmem:[#allocation91_spill] sm:$0xff]  ;;  %v5374_v2 = vld [vmem:[#allocation93_spill] sm:$0xff] }
 0x6cd   :  { %1637 = vmatprep.subr.bf16.mxu0 %v5364_v52  ;;  %1678 = vmatprep.subr.bf16.mxu1 %v5365_v21  ;;  %v5375_v52 = vld [vmem:[#allocation92_spill] sm:$0xff]  ;;  %v5376_v21 = vld [vmem:[#allocation94_spill] sm:$0xff] }
 0x6d0   :  { %1638 = vmatpush1.bf16.msra.mxu0 %v5366_v19  ;;  %1679 = vmatpush1.bf16.msra.mxu1 %v5367_v15  ;;  %v5377_v19 = vld [vmem:[#allocation95_spill] sm:$0xff]  ;;  %v5378_v15 = vld [vmem:[#allocation96_spill] sm:$0xff] }
 0x6d1   :  { %1639 = vmatprep.subr.bf16.mxu0 %v5368_v1  ;;  %1680 = vmatprep.subr.bf16.mxu1 %v5369_v60  ;;  %v5379_v1 = vld [vmem:[#allocation97_spill] sm:$0xff]  ;;  %v5380_v60 = vld [vmem:[#allocation98_spill] sm:$0xff] }
 0x6d4   :  { %1640 = vmatpush1.bf16.msra.mxu0 %v5370_v57  ;;  %1681 = vmatpush1.bf16.msra.mxu1 %v5371_v4  ;;  %v5381_v57 = vld [vmem:[#allocation99_spill] sm:$0xff]  ;;  %v5382_v4 = vld [vmem:[#allocation14_spill] sm:$0xff] }
 0x6d5   :  { %1641 = vmatprep.subr.bf16.mxu0 %v5372_v0  ;;  %1682 = vmatprep.subr.bf16.mxu1 %v5373_v17  ;;  %v5383_v0 = vld [vmem:[#allocation15_spill] sm:$0xff]  ;;  %v5384_v17 = vld [vmem:[#allocation17_spill] sm:$0xff] }
 0x6d8   :  { %1642 = vmatpush1.bf16.msra.mxu0 %v5374_v2  ;;  %1683 = vmatpush1.bf16.msra.mxu1 %v5375_v52  ;;  %v5385_v2 = vld [vmem:[#allocation16_spill] sm:$0xff]  ;;  %v5386_v52 = vld [vmem:[#allocation18_spill] sm:$0xff] }
 0x6d9   :  { %1643 = vmatprep.subr.bf16.mxu0 %v5376_v21  ;;  %1684 = vmatprep.subr.bf16.mxu1 %v5377_v19  ;;  %v5387_v21 = vld [vmem:[#allocation19_spill] sm:$0xff]  ;;  %v5388_v19 = vld [vmem:[#allocation21_spill] sm:$0xff] }
 0x6dc   :  { %1644 = vmatpush1.bf16.msra.mxu0 %v5378_v15  ;;  %1685 = vmatpush1.bf16.msra.mxu1 %v5379_v1  ;;  %v5389_v15 = vld [vmem:[#allocation20_spill] sm:$0xff]  ;;  %v5390_v1 = vld [vmem:[#allocation22_spill] sm:$0xff] }
 0x6dd   :  { %1645 = vmatprep.subr.bf16.mxu0 %v5380_v60  ;;  %1686 = vmatprep.subr.bf16.mxu1 %v5381_v57  ;;  %v5391_v60 = vld [vmem:[#allocation23_spill] sm:$0xff]  ;;  %v5392_v57 = vld [vmem:[#allocation25_spill] sm:$0xff] }
 0x6e0   :  { %1646 = vmatpush1.bf16.msra.mxu0 %v5382_v4  ;;  %1687 = vmatpush1.bf16.msra.mxu1 %v5383_v0  ;;  %v5393_v4 = vld [vmem:[#allocation24_spill] sm:$0xff]  ;;  %v5394_v0 = vld [vmem:[#allocation26_spill] sm:$0xff] }
 0x6e1   :  { %1647 = vmatprep.subr.bf16.mxu0 %v5384_v17  ;;  %1688 = vmatprep.subr.bf16.mxu1 %v5385_v2  ;;  %v5395_v17 = vld [vmem:[#allocation27_spill] sm:$0xff]  ;;  %v5396_v2 = vld [vmem:[#allocation29_spill] sm:$0xff] }
 0x6e4   :  { %1648 = vmatpush1.bf16.msra.mxu0 %v5386_v52  ;;  %1689 = vmatpush1.bf16.msra.mxu1 %v5387_v21  ;;  %v5397_v52 = vld [vmem:[#allocation28_spill] sm:$0xff]  ;;  %v5398_v21 = vld [vmem:[#allocation30_spill] sm:$0xff] }
 0x6e5   :  { %1649 = vmatprep.subr.bf16.mxu0 %v5388_v19  ;;  %1690 = vmatprep.subr.bf16.mxu1 %v5389_v15  ;;  %v5399_v19 = vld [vmem:[#allocation31_spill] sm:$0xff]  ;;  %v5400_v15 = vld [vmem:[#allocation33_spill] sm:$0xff] }
 0x6e8   :  { %1650 = vmatpush1.bf16.msra.mxu0 %v5390_v1  ;;  %1691 = vmatpush1.bf16.msra.mxu1 %v5391_v60  ;;  %v5401_v1 = vld [vmem:[#allocation32_spill] sm:$0xff]  ;;  %v5402_v60 = vld [vmem:[#allocation34_spill] sm:$0xff] }
 0x6e9   :  { %1651 = vmatprep.subr.bf16.mxu0 %v5392_v57  ;;  %1692 = vmatprep.subr.bf16.mxu1 %v5393_v4  ;;  %v5403_v57 = vld [vmem:[#allocation35_spill] sm:$0xff]  ;;  %v5404_v4 = vld [vmem:[#allocation37_spill] sm:$0xff] }
 0x6ec   :  { %1652 = vmatpush1.bf16.msra.mxu0 %v5394_v0  ;;  %1693 = vmatpush1.bf16.msra.mxu1 %v5395_v17  ;;  %v5405_v0 = vld [vmem:[#allocation36_spill] sm:$0xff]  ;;  %v5406_v17 = vld [vmem:[#allocation38_spill] sm:$0xff] }
 0x6ed   :  { %1653 = vmatprep.subr.bf16.mxu0 %v5396_v2  ;;  %1694 = vmatprep.subr.bf16.mxu1 %v5397_v52  ;;  %v5407_v2 = vld [vmem:[#allocation39_spill] sm:$0xff]  ;;  %v5408_v52 = vld [vmem:[#allocation41_spill] sm:$0xff] }
 0x6f0   :  { %1654 = vmatpush1.bf16.msra.mxu0 %v5398_v21  ;;  %1695 = vmatpush1.bf16.msra.mxu1 %v5399_v19  ;;  %v5409_v21 = vld [vmem:[#allocation40_spill] sm:$0xff]  ;;  %v5410_v19 = vld [vmem:[#allocation42_spill] sm:$0xff] }
 0x6f1   :  { %1655 = vmatprep.subr.bf16.mxu0 %v5400_v15  ;;  %1696 = vmatprep.subr.bf16.mxu1 %v5401_v1  ;;  %v5411_v15 = vld [vmem:[#allocation43_spill] sm:$0xff]  ;;  %v5412_v1 = vld [vmem:[#allocation45_spill] sm:$0xff] }
 0x6f4   :  { %1656 = vmatpush1.bf16.msra.mxu0 %v5402_v60  ;;  %1697 = vmatpush1.bf16.msra.mxu1 %v5403_v57  ;;  %v5413_v60 = vld [vmem:[#allocation44_spill] sm:$0xff]  ;;  %v5414_v57 = vld [vmem:[#allocation46_spill] sm:$0xff] }
 0x6f5   :  { %1657 = vmatprep.subr.bf16.mxu0 %v5404_v4  ;;  %1698 = vmatprep.subr.bf16.mxu1 %v5405_v0  ;;  %v5415_v4 = vld [vmem:[#allocation58_spill] sm:$0xff]  ;;  %v5416_v0 = vld [vmem:[#allocation59_spill] sm:$0xff] }
 0x6f8   :  { %1658 = vmatpush1.bf16.msra.mxu0 %v5406_v17  ;;  %1699 = vmatpush1.bf16.msra.mxu1 %v5407_v2  ;;  %v5417_v17 = vld [vmem:[#allocation61_spill] sm:$0xff] }
 0x6f9   :  { %1659 = vmatprep.subr.bf16.mxu0 %v5408_v52  ;;  %1700 = vmatprep.subr.bf16.mxu1 %v5409_v21  ;;  %v1573_v52 = vld [vmem:[#allocation3 + $0x20] sm:$0xc] }
 0x6fc   :  { %1660 = vmatpush1.bf16.msra.mxu0 %v5410_v19  ;;  %1701 = vmatpush1.bf16.msra.mxu1 %v5411_v15  ;;  %v1574_v19 = vld [vmem:[#allocation3 + $0x28] sm:$0xc] }
 0x6fd   :  { %1661 = vmatprep.subr.bf16.mxu0 %v5412_v1  ;;  %1702 = vmatprep.subr.bf16.mxu1 %v5413_v60 }
 0x700   :  { %1662 = vmatpush1.bf16.msra.mxu0 %v5414_v57  ;;  %1703 = vmatpush1.bf16.msra.mxu1 %v5415_v4 }
 0x701   :  { %1713 = vmatprep.subr.bf16.mxu0 %v5416_v0  ;;  %1754 = vmatprep.subr.bf16.mxu1 %v5417_v17  ;;  %v1576_v0 = vld [vmem:[#allocation3 + $0x38] sm:$0xc] }
 0x756   :  { %v1415_v2 = vpop.f32.mrb[36].mxu0  ;;  %v1456_v3 = vpop.f32.mrb[36].mxu1 }
 0x757   :  { %v1581_v21 = vrot.slane %v1415_v2, 6  ;;  %v1417_v7 = vpop.f32.mrb[37].mxu0  ;;  %v1458_v6 = vpop.f32.mrb[37].mxu1  ;;  %v1583_v41 = vrot.slane %v1456_v3, 6 }
 0x758   :  { %v1582_v15 = vrot.slane %v1417_v7, 6  ;;  %v1419_v44 = vpop.f32.mrb[38].mxu0  ;;  %v1460_v1 = vpop.f32.mrb[38].mxu1  ;;  %v1584_v40 = vrot.slane %v1458_v6, 6  ;;  %v1613_v6 = vrot.slane %v4112_v51, 6 }
 0x759   :  { %v1589_v13 = vadd.f32 %v1581_v21, %v1573_v52  ;;  %v1420_v60 = vpop.f32.mrb[39].mxu0  ;;  %v1461_v9 = vpop.f32.mrb[39].mxu1  ;;  %v1591_v33 = vadd.f32 %v1583_v41, %v1575_v34 }
 0x75a   :  { %v1590_v57 = vadd.f32 %v1582_v15, %v1574_v19  ;;  %v1592_v17 = vadd.f32 %v1584_v40, %v1576_v0 }
 0x75b   :  { %v2315_v61 = vmul.f32 -1.442695, %v1589_v13 }
 0x75c   :  { %v2316_v4 = vmul.f32 -1.442695, %v1590_v57  ;;  %v2317_v2 = vmul.f32 -1.442695, %v1592_v17 }
 0x75d   :  { %2497 = vpow2.f32 %v2315_v61 }
 0x75e   :  { %2499 = vpow2.f32 %v2316_v4 }
 0x75f   :  { %2501 = vpow2.f32 %v2317_v2 }
 0x760   :  { %2503 = vtanh.f32 %v1591_v33 }
 0x767   :  { %v2498_v22 = vpop.eup %2497 }
 0x768   :  { %v2500_v63 = vpop.eup %2499  ;;  %v1596_v7 = vadd.f32 1.0, %v2498_v22 }
 0x769   :  { %v1602_v44 = vadd.f32 1.0, %v2500_v63  ;;  %v2502_v9 = vpop.eup %2501 }
 0x76a   :  { %2505 = vrcp.f32 %v1596_v7  ;;  %v2504_v13 = vpop.eup %2503  ;;  %v1609_v40 = vadd.f32 1.0, %v2502_v9 }
 0x76b   :  { %2507 = vrcp.f32 %v1602_v44 }
 0x76c   :  { %2509 = vrcp.f32 %v1609_v40 }
 0x774   :  { %v2506_v52 = vpop.eup %2505 }
 0x775   :  { %v2508_v61 = vpop.eup %2507  ;;  %v1616_v21 = vmul.f32 %v2506_v52, %v2504_v13 }
 0x776   :  { %v1615_v3 = vmul.f32 %v2508_v61, %v1613_v6  ;;  %v2510_v41 = vpop.eup %2509 }
 0x778   :  { %v4258_v19 = vadd.f32 %v1616_v21, %v1615_v3 }
 0x77a   :  { %2511 = vtanh.f32 %v4258_v19 }
 0x784   :  { %v2512_v22 = vpop.eup %2511 }
 0x785   :  { %v1619_v33 = vmul.f32 %v2512_v22, %v2510_v41 }
 0x796   :  { %v1497_v63 = vpop.f32.mrb[40].mxu0  ;;  %v1538_v34 = vpop.f32.mrb[40].mxu1 }
 0x797   :  { %v1545_v15 = vadd.f32 %v1497_v63, %v5158_v8  ;;  %v1499_v1 = vpop.f32.mrb[41].mxu0  ;;  %v1540_v60 = vpop.f32.mrb[41].mxu1  ;;  %v1547_v13 = vadd.f32 %v1538_v34, %v5071_v54 }
 0x798   :  { %v1546_v51 = vadd.f32 %v1499_v1, %v5069_v49  ;;  %v1501_v57 = vpop.f32.mrb[42].mxu0  ;;  %v1542_v4 = vpop.f32.mrb[42].mxu1  ;;  %v1548_v44 = vadd.f32 %v1540_v60, %v5070_v55 }
 0x799   :  { %v2312_v0 = vmul.f32 -1.442695, %v1545_v15  ;;  %v1502_v17 = vpop.f32.mrb[43].mxu0  ;;  %v1543_v2 = vpop.f32.mrb[43].mxu1 }
 0x79a   :  { %v2313_v7 = vmul.f32 -1.442695, %v1546_v51  ;;  %v2314_v9 = vmul.f32 -1.442695, %v1548_v44  ;;  %v4276_v44 = vld [vmem:[#allocation2 + $0x30] sm:$0xff] }
 0x79b   :  { %2513 = vpow2.f32 %v2312_v0  ;;  %v1623_v0 = vpack.c.bf16 %v1619_v33, %v1619_v33  ;;  %v4279_v33 = vld [vmem:[#allocation2 + $0x68] sm:$0xff] }
 0x79c   :  { %2515 = vpow2.f32 %v2313_v7 }
 0x79d   :  { %2517 = vpow2.f32 %v2314_v9  ;;  %v4269_v7 = vrot.slane %v1623_v0, 1  ;;  %v4282_v9 = vld [vmem:[#allocation2 + $0x78] sm:$0xff]  ;;  %v2769_v0 = vld [vmem:[#allocation2 + $0x180] sm:$0xff] }
 0x79e   :  { %2519 = vtanh.f32 %v1547_v13  ;;  %v4285_v13 = vld [vmem:[#allocation2 + $0x60] sm:$0xff] }
 0x7a5   :  { %v2514_v52 = vpop.eup %2513 }
 0x7a6   :  { %v2516_v6 = vpop.eup %2515  ;;  %v1552_v61 = vadd.f32 1.0, %v2514_v52  ;;  %v4289_v52 = vld [vmem:[#allocation2 + $0xa8] sm:$0xff] }
 0x7a7   :  { %v1558_v21 = vadd.f32 1.0, %v2516_v6  ;;  %v2518_v40 = vpop.eup %2517  ;;  %v2755_v6 = vld [vmem:[#allocation2 + $0xc8] sm:$0xff] }
 0x7a8   :  { %2521 = vrcp.f32 %v1552_v61  ;;  %v2520_v3 = vpop.eup %2519  ;;  %v1565_v15 = vadd.f32 1.0, %v2518_v40  ;;  %v2756_v61 = vld [vmem:[#allocation2 + $0xd8] sm:$0xff]  ;;  %v2758_v40 = vld [vmem:[#allocation2 + $0xd0] sm:$0xff] }
 0x7a9   :  { %2523 = vrcp.f32 %v1558_v21  ;;  %v2757_v21 = vld [vmem:[#allocation2 + $0xc0] sm:$0xff] }
 0x7aa   :  { %2525 = vrcp.f32 %v1565_v15  ;;  %v2763_v15 = vld [vmem:[#allocation2 + $0x148] sm:$0xff] }
 0x7b2   :  { %v2522_v41 = vpop.eup %2521 }
 0x7b3   :  { %v2524_v22 = vpop.eup %2523  ;;  %v1569_v63 = vmul.f32 %v2522_v41, %v2520_v3  ;;  %v2759_v3 = vld [vmem:[#allocation2 + $0x108] sm:$0xff]  ;;  %v2760_v41 = vld [vmem:[#allocation2 + $0x118] sm:$0xff] }
 0x7b4   :  { %v1568_v1 = vmul.f32 %v2524_v22, %v4120_v18  ;;  %v2526_v34 = vpop.eup %2525  ;;  %v4273_v18 = vld [vmem:[#allocation2 + $0x20] sm:$0xff] }
 0x7b5   :  { %v2761_v22 = vld [vmem:[#allocation2 + $0x100] sm:$0xff] }
 0x7b6   :  { %v4266_v60 = vadd.f32 %v1569_v63, %v1568_v1  ;;  %v2762_v63 = vld [vmem:[#allocation2 + $0x110] sm:$0xff]  ;;  %v2764_v1 = vld [vmem:[#allocation2 + $0x158] sm:$0xff] }
 0x7b8   :  { %2527 = vtanh.f32 %v4266_v60 }
 0x7c2   :  { %v2528_v51 = vpop.eup %2527 }
 0x7c3   :  { %v1572_v57 = vmul.f32 %v2528_v51, %v2526_v34  ;;  %v2765_v34 = vld [vmem:[#allocation2 + $0x140] sm:$0xff]  ;;  %v2766_v51 = vld [vmem:[#allocation2 + $0x150] sm:$0xff] }
 0x7c5   :  { %v1621_v4 = vrot.slane %v1572_v57, 6  ;;  %v2767_v57 = vld [vmem:[#allocation2 + $0x188] sm:$0xff] }
 0x7c7   :  { %v1624_v17 = vpack.c.bf16 %v1621_v4, %v1621_v4  ;;  %v2768_v4 = vld [vmem:[#allocation2 + $0x198] sm:$0xff] }
 0x7c9   :  { %v1628_v2 = vrot.slane %v1624_v17, 1  ;;  %v2770_v17 = vld [vmem:[#allocation2 + $0x190] sm:$0xff] }
 0x7cb   :  { %1663 = vmatprep.mubr.bf16.mxu0 %v1628_v2  ;;  %1704 = vmatprep.mubr.bf16.mxu1 %v1628_v2 }
 0x7cc   :  { %1664 = vmatmul.mubr.bf16.vlgmr.msra.gmra.mrb[44].mxu0 %v4269_v7  ;;  %1705 = vmatmul.mubr.bf16.vlgmr.msra.gmra.mrb[44].mxu1 %v4269_v7 }
 0x7cd   :  { %1714 = vmatpush1.bf16.msra.mxu0 %v4273_v18  ;;  %1755 = vmatpush1.bf16.msra.mxu1 %v4276_v44 }
 0x7ce   :  { %1745 = vmatprep.mubr.bf16.mxu0 %v1628_v2  ;;  %1786 = vmatprep.mubr.bf16.mxu1 %v1628_v2  ;;  %v2771_v2 = vld [vmem:[#allocation2 + $0x1c8] sm:$0xff] }
 0x7cf   :  { %1715 = vmatprep.subr.bf16.mxu0 %v4279_v33  ;;  %1756 = vmatprep.subr.bf16.mxu1 %v4282_v9 }
 0x7d1   :  { %1716 = vmatpush1.bf16.msra.mxu0 %v4285_v13  ;;  %1757 = vmatpush1.bf16.msra.mxu1 %v3874_v36  ;;  %v5418_v36 = vld [vmem:[#allocation76_spill] sm:$0xff] }
 0x7d2   :  { %1717 = vmatprep.subr.bf16.mxu0 %v4289_v52  ;;  %1758 = vmatprep.subr.bf16.mxu1 %v3878_v50  ;;  %v5419_v50 = vld [vmem:[#allocation78_spill] sm:$0xff] }
 0x7d5   :  { %1718 = vmatpush1.bf16.msra.mxu0 %v3881_v30  ;;  %1759 = vmatpush1.bf16.msra.mxu1 %v3884_v28  ;;  %v5420_v30 = vld [vmem:[#allocation79_spill] sm:$0xff]  ;;  %v5421_v28 = vld [vmem:[#allocation81_spill] sm:$0xff] }
 0x7d6   :  { %1719 = vmatprep.subr.bf16.mxu0 %v3887_v29  ;;  %1760 = vmatprep.subr.bf16.mxu1 %v3890_v27  ;;  %v5422_v29 = vld [vmem:[#allocation80_spill] sm:$0xff]  ;;  %v5423_v27 = vld [vmem:[#allocation82_spill] sm:$0xff] }
 0x7d9   :  { %1720 = vmatpush1.bf16.msra.mxu0 %v3893_v26  ;;  %1761 = vmatpush1.bf16.msra.mxu1 %v3896_v31  ;;  %v5424_v26 = vld [vmem:[#allocation85_spill] sm:$0xff]  ;;  %v5425_v31 = vld [vmem:[#allocation86_spill] sm:$0xff] }
 0x7da   :  { %1721 = vmatprep.subr.bf16.mxu0 %v3899_v32  ;;  %1762 = vmatprep.subr.bf16.mxu1 %v3902_v24  ;;  %v5426_v32 = vld [vmem:[#allocation87_spill] sm:$0xff]  ;;  %v5427_v24 = vld [vmem:[#allocation89_spill] sm:$0xff] }
 0x7dd   :  { %1722 = vmatpush1.bf16.msra.mxu0 %v3905_v25  ;;  %1763 = vmatpush1.bf16.msra.mxu1 %v3908_v46  ;;  %v5428_v25 = vld [vmem:[#allocation90_spill] sm:$0xff]  ;;  %v5429_v46 = vld [vmem:[#allocation100_spill] sm:$0xff] }
 0x7de   :  { %1723 = vmatprep.subr.bf16.mxu0 %v3911_v45  ;;  %1764 = vmatprep.subr.bf16.mxu1 %v3914_v48  ;;  %v5430_v45 = vld [vmem:[#allocation101_spill] sm:$0xff]  ;;  %v5431_v48 = vld [vmem:[#allocation102_spill] sm:$0xff] }
 0x7e1   :  { %1724 = vmatpush1.bf16.msra.mxu0 %v3917_v35  ;;  %1765 = vmatpush1.bf16.msra.mxu1 %v3920_v37  ;;  %v5432_v35 = vld [vmem:[#allocation103_spill] sm:$0xff]  ;;  %v5433_v37 = vld [vmem:[#allocation104_spill] sm:$0xff] }
 0x7e2   :  { %1725 = vmatprep.subr.bf16.mxu0 %v3923_v23  ;;  %1766 = vmatprep.subr.bf16.mxu1 %v5326_v53  ;;  %v5434_v23 = vld [vmem:[#allocation105_spill] sm:$0xff]  ;;  %v5435_v53 = vld [vmem:[#allocation106_spill] sm:$0xff] }
 0x7e5   :  { %1726 = vmatpush1.bf16.msra.mxu0 %v5327_v10  ;;  %1767 = vmatpush1.bf16.msra.mxu1 %v5328_v5  ;;  %v5436_v10 = vld [vmem:[#allocation107_spill] sm:$0xff]  ;;  %v5437_v5 = vld [vmem:[#allocation108_spill] sm:$0xff] }
 0x7e6   :  { %1727 = vmatprep.subr.bf16.mxu0 %v5329_v11  ;;  %1768 = vmatprep.subr.bf16.mxu1 %v5330_v56  ;;  %v5438_v11 = vld [vmem:[#allocation109_spill] sm:$0xff]  ;;  %v5439_v56 = vld [vmem:[#allocation110_spill] sm:$0xff] }
 0x7e9   :  { %1728 = vmatpush1.bf16.msra.mxu0 %v5331_v12  ;;  %1769 = vmatpush1.bf16.msra.mxu1 %v5332_v38  ;;  %v2743_v12 = vld [vmem:[#allocation2 + $0x8] sm:$0xff]  ;;  %v2744_v38 = vld [vmem:[#allocation2 + $0x18] sm:$0xff] }
 0x7ea   :  { %1729 = vmatprep.subr.bf16.mxu0 %v5333_v43  ;;  %1770 = vmatprep.subr.bf16.mxu1 %v5334_v62  ;;  %v2745_v43 = vld [vmem:[#allocation2] sm:$0xff]  ;;  %v2746_v62 = vld [vmem:[#allocation2 + $0x10] sm:$0xff] }
 0x7ed   :  { %1730 = vmatpush1.bf16.msra.mxu0 %v5335_v47  ;;  %1771 = vmatpush1.bf16.msra.mxu1 %v5336_v14  ;;  %v2747_v47 = vld [vmem:[#allocation2 + $0x48] sm:$0xff]  ;;  %v2748_v14 = vld [vmem:[#allocation2 + $0x58] sm:$0xff] }
 0x7ee   :  { %1731 = vmatprep.subr.bf16.mxu0 %v5337_v42  ;;  %1772 = vmatprep.subr.bf16.mxu1 %v5338_v58  ;;  %v2749_v42 = vld [vmem:[#allocation2 + $0x40] sm:$0xff]  ;;  %v2750_v58 = vld [vmem:[#allocation2 + $0x50] sm:$0xff] }
 0x7f1   :  { %1732 = vmatpush1.bf16.msra.mxu0 %v5339_v16  ;;  %1773 = vmatpush1.bf16.msra.mxu1 %v5340_v39  ;;  %v2751_v16 = vld [vmem:[#allocation2 + $0x88] sm:$0xff]  ;;  %v2752_v39 = vld [vmem:[#allocation2 + $0x98] sm:$0xff] }
 0x7f2   :  { %1733 = vmatprep.subr.bf16.mxu0 %v5341_v59  ;;  %1774 = vmatprep.subr.bf16.mxu1 %v5418_v36  ;;  %v2753_v59 = vld [vmem:[#allocation2 + $0x80] sm:$0xff] }
 0x7f3   :  { %v2773_v36 = vld [vmem:[#allocation2 + $0x1c0] sm:$0xff] }
 0x7f5   :  { %1734 = vmatpush1.bf16.msra.mxu0 %v5419_v50  ;;  %1775 = vmatpush1.bf16.msra.mxu1 %v5420_v30  ;;  %v2774_v50 = vld [vmem:[#allocation2 + $0x1d0] sm:$0xff]  ;;  %v2775_v30 = vld [vmem:[#allocation2 + $0x208] sm:$0xff] }
 0x7f6   :  { %1735 = vmatprep.subr.bf16.mxu0 %v5421_v28  ;;  %1776 = vmatprep.subr.bf16.mxu1 %v5422_v29  ;;  %v2776_v28 = vld [vmem:[#allocation2 + $0x218] sm:$0xff]  ;;  %v2777_v29 = vld [vmem:[#allocation2 + $0x200] sm:$0xff] }
 0x7f9   :  { %1736 = vmatpush1.bf16.msra.mxu0 %v5423_v27  ;;  %1777 = vmatpush1.bf16.msra.mxu1 %v5348_v20  ;;  %v2754_v20 = vld [vmem:[#allocation2 + $0x90] sm:$0xff] }
 0x7fa   :  { %1737 = vmatprep.subr.bf16.mxu0 %v5424_v26  ;;  %1778 = vmatprep.subr.bf16.mxu1 %v5425_v31  ;;  %v2778_v27 = vld [vmem:[#allocation2 + $0x210] sm:$0xff]  ;;  %v2779_v26 = vld [vmem:[#allocation2 + $0x248] sm:$0xff]  ;;  %v2780_v31 = vld [vmem:[#allocation2 + $0x258] sm:$0xff] }
 0x7fd   :  { %1738 = vmatpush1.bf16.msra.mxu0 %v5426_v32  ;;  %1779 = vmatpush1.bf16.msra.mxu1 %v5427_v24  ;;  %v2781_v32 = vld [vmem:[#allocation2 + $0x240] sm:$0xff]  ;;  %v2782_v24 = vld [vmem:[#allocation2 + $0x250] sm:$0xff] }
 0x7fe   :  { %1739 = vmatprep.subr.bf16.mxu0 %v5428_v25  ;;  %1780 = vmatprep.subr.bf16.mxu1 %v5429_v46  ;;  %v2783_v25 = vld [vmem:[#allocation2 + $0x288] sm:$0xff]  ;;  %v2784_v46 = vld [vmem:[#allocation2 + $0x298] sm:$0xff] }
 0x801   :  { %1740 = vmatpush1.bf16.msra.mxu0 %v5430_v45  ;;  %1781 = vmatpush1.bf16.msra.mxu1 %v5431_v48  ;;  %v2785_v45 = vld [vmem:[#allocation2 + $0x280] sm:$0xff]  ;;  %v2786_v48 = vld [vmem:[#allocation2 + $0x290] sm:$0xff] }
 0x802   :  { %1741 = vmatprep.subr.bf16.mxu0 %v5432_v35  ;;  %1782 = vmatprep.subr.bf16.mxu1 %v5433_v37  ;;  %v2787_v35 = vld [vmem:[#allocation2 + $0x2c8] sm:$0xff]  ;;  %v2788_v37 = vld [vmem:[#allocation2 + $0x2d8] sm:$0xff] }
 0x805   :  { %1742 = vmatpush1.bf16.msra.mxu0 %v5434_v23  ;;  %1783 = vmatpush1.bf16.msra.mxu1 %v5435_v53  ;;  %v2789_v23 = vld [vmem:[#allocation2 + $0x2c0] sm:$0xff]  ;;  %v2790_v53 = vld [vmem:[#allocation2 + $0x2d0] sm:$0xff] }
 0x806   :  { %1743 = vmatprep.subr.bf16.mxu0 %v5436_v10  ;;  %1784 = vmatprep.subr.bf16.mxu1 %v5437_v5  ;;  %v2791_v10 = vld [vmem:[#allocation2 + $0x308] sm:$0xff]  ;;  %v2792_v5 = vld [vmem:[#allocation2 + $0x318] sm:$0xff] }
 0x809   :  { %1744 = vmatpush1.bf16.msra.mxu0 %v5438_v11  ;;  %1785 = vmatpush1.bf16.msra.mxu1 %v5439_v56  ;;  %v2793_v11 = vld [vmem:[#allocation2 + $0x300] sm:$0xff]  ;;  %v2794_v56 = vld [vmem:[#allocation2 + $0x310] sm:$0xff] }
 0x80a   :  { %1881 = vmatprep.subr.bf16.mxu0 %v2743_v12  ;;  %1922 = vmatprep.subr.bf16.mxu1 %v2744_v38  ;;  %v2795_v12 = vld [vmem:[#allocation2 + $0x348] sm:$0xff]  ;;  %v2796_v38 = vld [vmem:[#allocation2 + $0x358] sm:$0xff] }
 0x80c   :  { %1746 = vmatmul.mubr.bf16.vlgmr.msra.gmra.mrb[48].mxu0 %v4269_v7  ;;  %1787 = vmatmul.mubr.bf16.vlgmr.msra.gmra.mrb[48].mxu1 %v4269_v7  ;;  %v2772_v7 = vld [vmem:[#allocation2 + $0x1d8] sm:$0xff] }
 0x80d   :  { %1882 = vmatpush1.bf16.msra.mxu0 %v2745_v43  ;;  %1923 = vmatpush1.bf16.msra.mxu1 %v2746_v62  ;;  %v2797_v43 = vld [vmem:[#allocation2 + $0x340] sm:$0xff]  ;;  %v2798_v62 = vld [vmem:[#allocation2 + $0x350] sm:$0xff] }
 0x80e   :  { %1883 = vmatprep.subr.bf16.mxu0 %v2747_v47  ;;  %1924 = vmatprep.subr.bf16.mxu1 %v2748_v14  ;;  %v2799_v47 = vld [vmem:[#allocation2 + $0x388] sm:$0xff]  ;;  %v2800_v14 = vld [vmem:[#allocation2 + $0x398] sm:$0xff] }
 0x811   :  { %1884 = vmatpush1.bf16.msra.mxu0 %v2749_v42  ;;  %1925 = vmatpush1.bf16.msra.mxu1 %v2750_v58  ;;  %v2801_v42 = vld [vmem:[#allocation2 + $0x380] sm:$0xff]  ;;  %v2802_v58 = vld [vmem:[#allocation2 + $0x390] sm:$0xff] }
 0x812   :  { %1885 = vmatprep.subr.bf16.mxu0 %v2751_v16  ;;  %1926 = vmatprep.subr.bf16.mxu1 %v2752_v39  ;;  %v2803_v16 = vld [vmem:[#allocation2 + $0x3c8] sm:$0xff]  ;;  %v2804_v39 = vld [vmem:[#allocation2 + $0x3d8] sm:$0xff] }
 0x815   :  { %1886 = vmatpush1.bf16.msra.mxu0 %v2753_v59  ;;  %1927 = vmatpush1.bf16.msra.mxu1 %v2754_v20  ;;  %v2805_v59 = vld [vmem:[#allocation2 + $0x3c0] sm:$0xff]  ;;  %v2806_v20 = vld [vmem:[#allocation2 + $0x3d0] sm:$0xff] }
 0x816   :  { %1887 = vmatprep.subr.bf16.mxu0 %v2755_v6  ;;  %1928 = vmatprep.subr.bf16.mxu1 %v2756_v61  ;;  %v4349_v6 = vld [vmem:[#allocation2 + $0x28] sm:$0xff]  ;;  %v4352_v61 = vld [vmem:[#allocation2 + $0x38] sm:$0xff] }
 0x819   :  { %1888 = vmatpush1.bf16.msra.mxu0 %v2757_v21  ;;  %1929 = vmatpush1.bf16.msra.mxu1 %v2758_v40  ;;  %v1823_v40 = vld [vmem:[#allocation3 + $0x20] sm:$0x30] }
 0x81a   :  { %1889 = vmatprep.subr.bf16.mxu0 %v2759_v3  ;;  %1930 = vmatprep.subr.bf16.mxu1 %v2760_v41 }
 0x81d   :  { %1890 = vmatpush1.bf16.msra.mxu0 %v2761_v22  ;;  %1931 = vmatpush1.bf16.msra.mxu1 %v2762_v63  ;;  %v1824_v63 = vld [vmem:[#allocation3 + $0x28] sm:$0x30] }
 0x81e   :  { %1891 = vmatprep.subr.bf16.mxu0 %v2763_v15  ;;  %1932 = vmatprep.subr.bf16.mxu1 %v2764_v1 }
 0x821   :  { %1892 = vmatpush1.bf16.msra.mxu0 %v2765_v34  ;;  %1933 = vmatpush1.bf16.msra.mxu1 %v2766_v51 }
 0x822   :  { %1893 = vmatprep.subr.bf16.mxu0 %v2767_v57  ;;  %1934 = vmatprep.subr.bf16.mxu1 %v2768_v4 }
 0x825   :  { %1894 = vmatpush1.bf16.msra.mxu0 %v2769_v0  ;;  %1935 = vmatpush1.bf16.msra.mxu1 %v2770_v17 }
 0x826   :  { %1895 = vmatprep.subr.bf16.mxu0 %v2771_v2  ;;  %1936 = vmatprep.subr.bf16.mxu1 %v2772_v7 }
 0x829   :  { %1896 = vmatpush1.bf16.msra.mxu0 %v2773_v36  ;;  %1937 = vmatpush1.bf16.msra.mxu1 %v2774_v50  ;;  %v1826_v50 = vld [vmem:[#allocation3 + $0x38] sm:$0x30] }
 0x82a   :  { %1897 = vmatprep.subr.bf16.mxu0 %v2775_v30  ;;  %1938 = vmatprep.subr.bf16.mxu1 %v2776_v28 }
 0x82d   :  { %1898 = vmatpush1.bf16.msra.mxu0 %v2777_v29  ;;  %1939 = vmatpush1.bf16.msra.mxu1 %v2778_v27  ;;  %v1825_v29 = vld [vmem:[#allocation3 + $0x30] sm:$0x30] }
 0x82e   :  { %1899 = vmatprep.subr.bf16.mxu0 %v2779_v26  ;;  %1940 = vmatprep.subr.bf16.mxu1 %v2780_v31 }
 0x831   :  { %1900 = vmatpush1.bf16.msra.mxu0 %v2781_v32  ;;  %1941 = vmatpush1.bf16.msra.mxu1 %v2782_v24 }
 0x832   :  { %1901 = vmatprep.subr.bf16.mxu0 %v2783_v25  ;;  %1942 = vmatprep.subr.bf16.mxu1 %v2784_v46 }
 0x835   :  { %1902 = vmatpush1.bf16.msra.mxu0 %v2785_v45  ;;  %1943 = vmatpush1.bf16.msra.mxu1 %v2786_v48 }
 0x836   :  { %1903 = vmatprep.subr.bf16.mxu0 %v2787_v35  ;;  %1944 = vmatprep.subr.bf16.mxu1 %v2788_v37  ;;  %v1863_v35 = vrot.slane %v4258_v19, 6 }
 0x839   :  { %1904 = vmatpush1.bf16.msra.mxu0 %v2789_v23  ;;  %1945 = vmatpush1.bf16.msra.mxu1 %v2790_v53 }
 0x83a   :  { %1905 = vmatprep.subr.bf16.mxu0 %v2791_v10  ;;  %1946 = vmatprep.subr.bf16.mxu1 %v2792_v5 }
 0x83d   :  { %1906 = vmatpush1.bf16.msra.mxu0 %v2793_v11  ;;  %1947 = vmatpush1.bf16.msra.mxu1 %v2794_v56 }
 0x83e   :  { %1907 = vmatprep.subr.bf16.mxu0 %v2795_v12  ;;  %1948 = vmatprep.subr.bf16.mxu1 %v2796_v38 }
 0x841   :  { %1908 = vmatpush1.bf16.msra.mxu0 %v2797_v43  ;;  %1949 = vmatpush1.bf16.msra.mxu1 %v2798_v62 }
 0x842   :  { %1909 = vmatprep.subr.bf16.mxu0 %v2799_v47  ;;  %1950 = vmatprep.subr.bf16.mxu1 %v2800_v14 }
 0x845   :  { %1910 = vmatpush1.bf16.msra.mxu0 %v2801_v42  ;;  %1951 = vmatpush1.bf16.msra.mxu1 %v2802_v58 }
 0x846   :  { %1911 = vmatprep.subr.bf16.mxu0 %v2803_v16  ;;  %1952 = vmatprep.subr.bf16.mxu1 %v2804_v39 }
 0x849   :  { %1912 = vmatpush1.bf16.msra.mxu0 %v2805_v59  ;;  %1953 = vmatpush1.bf16.msra.mxu1 %v2806_v20 }
 0x84a   :  { %1963 = vmatprep.subr.bf16.mxu0 %v4349_v6  ;;  %2004 = vmatprep.subr.bf16.mxu1 %v4352_v61 }
 0x89f   :  { %v1665_v21 = vpop.f32.mrb[44].mxu0  ;;  %v1706_v3 = vpop.f32.mrb[44].mxu1 }
 0x8a0   :  { %v1831_v41 = vrot.slane %v1665_v21, 4  ;;  %v1667_v22 = vpop.f32.mrb[45].mxu0  ;;  %v1708_v15 = vpop.f32.mrb[45].mxu1  ;;  %v1833_v28 = vrot.slane %v1706_v3, 4 }
 0x8a1   :  { %v1832_v1 = vrot.slane %v1667_v22, 4  ;;  %v1669_v34 = vpop.f32.mrb[46].mxu0  ;;  %v1710_v51 = vpop.f32.mrb[46].mxu1  ;;  %v1834_v36 = vrot.slane %v1708_v15, 4 }
 0x8a2   :  { %v1839_v57 = vadd.f32 %v1831_v41, %v1823_v40  ;;  %v1670_v4 = vpop.f32.mrb[47].mxu0  ;;  %v1711_v0 = vpop.f32.mrb[47].mxu1  ;;  %v1841_v26 = vadd.f32 %v1833_v28, %v1825_v29 }
 0x8a3   :  { %v1840_v17 = vadd.f32 %v1832_v1, %v1824_v63  ;;  %v1842_v30 = vadd.f32 %v1834_v36, %v1826_v50 }
 0x8a4   :  { %v2321_v2 = vmul.f32 -1.442695, %v1839_v57 }
 0x8a5   :  { %v2322_v7 = vmul.f32 -1.442695, %v1840_v17  ;;  %v2323_v27 = vmul.f32 -1.442695, %v1842_v30 }
 0x8a6   :  { %2529 = vpow2.f32 %v2321_v2 }
 0x8a7   :  { %2531 = vpow2.f32 %v2322_v7 }
 0x8a8   :  { %2533 = vpow2.f32 %v2323_v27 }
 0x8a9   :  { %2535 = vtanh.f32 %v1841_v26 }
 0x8b0   :  { %v2530_v31 = vpop.eup %2529 }
 0x8b1   :  { %v2532_v32 = vpop.eup %2531  ;;  %v1846_v24 = vadd.f32 1.0, %v2530_v31  ;;  %v4380_v31 = vld [vmem:[#allocation2 + $0xb8] sm:$0xff] }
 0x8b2   :  { %v1852_v25 = vadd.f32 1.0, %v2532_v32  ;;  %v2534_v46 = vpop.eup %2533  ;;  %v4383_v32 = vld [vmem:[#allocation2 + $0xa0] sm:$0xff] }
 0x8b3   :  { %2537 = vrcp.f32 %v1846_v24  ;;  %v2536_v45 = vpop.eup %2535  ;;  %v1859_v53 = vadd.f32 1.0, %v2534_v46  ;;  %v4386_v24 = vld [vmem:[#allocation2 + $0xb0] sm:$0xff]  ;;  %v4392_v46 = vld [vmem:[#allocation2 + $0xf8] sm:$0xff] }
 0x8b4   :  { %2539 = vrcp.f32 %v1852_v25  ;;  %v4389_v25 = vld [vmem:[#allocation2 + $0xe8] sm:$0xff] }
 0x8b5   :  { %2541 = vrcp.f32 %v1859_v53  ;;  %v4410_v53 = vld [vmem:[#allocation2 + $0x130] sm:$0xff] }
 0x8bd   :  { %v2538_v48 = vpop.eup %2537 }
 0x8be   :  { %v2540_v37 = vpop.eup %2539  ;;  %v1866_v23 = vmul.f32 %v2538_v48, %v2536_v45  ;;  %v4395_v45 = vld [vmem:[#allocation2 + $0xe0] sm:$0xff]  ;;  %v4398_v48 = vld [vmem:[#allocation2 + $0xf0] sm:$0xff] }
 0x8bf   :  { %v1865_v10 = vmul.f32 %v2540_v37, %v1863_v35  ;;  %v2542_v11 = vpop.eup %2541  ;;  %v4401_v35 = vld [vmem:[#allocation2 + $0x128] sm:$0xff]  ;;  %v4404_v37 = vld [vmem:[#allocation2 + $0x138] sm:$0xff] }
 0x8c1   :  { %v4356_v5 = vadd.f32 %v1866_v23, %v1865_v10  ;;  %v4407_v23 = vld [vmem:[#allocation2 + $0x120] sm:$0xff]  ;;  %v4413_v10 = vld [vmem:[#allocation2 + $0x168] sm:$0xff] }
 0x8c3   :  { %5440 = vst [vmem:[#allocation60_spill] sm:$0xff] %v4356_v5  ;;  %2543 = vtanh.f32 %v4356_v5  ;;  %v4539_v5 = vld [vmem:[#allocation2 + $0x3e0] sm:$0xff] }
 0x8cd   :  { %v2544_v56 = vpop.eup %2543 }
 0x8ce   :  { %v1869_v12 = vmul.f32 %v2544_v56, %v2542_v11  ;;  %v4416_v11 = vld [vmem:[#allocation2 + $0x178] sm:$0xff]  ;;  %v4419_v56 = vld [vmem:[#allocation2 + $0x160] sm:$0xff] }
 0x8d0   :  { %v1873_v28 = vpack.c.bf16 %v1869_v12, %v1869_v12  ;;  %v4422_v12 = vld [vmem:[#allocation2 + $0x170] sm:$0xff] }
 0x8d2   :  { %v4367_v26 = vrot.slane %v1873_v28, 2  ;;  %v4515_v28 = vld [vmem:[#allocation2 + $0x360] sm:$0xff] }
 0x8df   :  { %v1747_v38 = vpop.f32.mrb[48].mxu0  ;;  %v1788_v43 = vpop.f32.mrb[48].mxu1 }
 0x8e0   :  { %v1795_v62 = vadd.f32 %v1747_v38, %v5158_v8  ;;  %v1749_v47 = vpop.f32.mrb[49].mxu0  ;;  %v1790_v14 = vpop.f32.mrb[49].mxu1  ;;  %v1797_v3 = vadd.f32 %v1788_v43, %v5071_v54  ;;  %v4425_v38 = vld [vmem:[#allocation2 + $0x1a8] sm:$0xff]  ;;  %v4428_v43 = vld [vmem:[#allocation2 + $0x1b8] sm:$0xff]  ;;  %v4527_v54 = vld [vmem:[#allocation2 + $0x3a0] sm:$0xff] }
 0x8e1   :  { %v1796_v19 = vadd.f32 %v1749_v47, %v5069_v49  ;;  %v1751_v42 = vpop.f32.mrb[50].mxu0  ;;  %v1792_v58 = vpop.f32.mrb[50].mxu1  ;;  %v1798_v21 = vadd.f32 %v1790_v14, %v5070_v55  ;;  %v4434_v47 = vld [vmem:[#allocation2 + $0x1b0] sm:$0xff]  ;;  %v4437_v14 = vld [vmem:[#allocation2 + $0x1e8] sm:$0xff]  ;;  %v4536_v8 = vld [vmem:[#allocation2 + $0x3f8] sm:$0xff] }
 0x8e2   :  { %v2318_v16 = vmul.f32 -1.442695, %v1795_v62  ;;  %v1752_v39 = vpop.f32.mrb[51].mxu0  ;;  %v1793_v59 = vpop.f32.mrb[51].mxu1  ;;  %v4431_v62 = vld [vmem:[#allocation2 + $0x1a0] sm:$0xff]  ;;  %v4446_v58 = vld [vmem:[#allocation2 + $0x1f0] sm:$0xff] }
 0x8e3   :  { %v2319_v20 = vmul.f32 -1.442695, %v1796_v19  ;;  %v2320_v40 = vmul.f32 -1.442695, %v1798_v21  ;;  %v4440_v19 = vld [vmem:[#allocation2 + $0x1f8] sm:$0xff]  ;;  %v4443_v42 = vld [vmem:[#allocation2 + $0x1e0] sm:$0xff] }
 0x8e4   :  { %2545 = vpow2.f32 %v2318_v16  ;;  %v4449_v16 = vld [vmem:[#allocation2 + $0x228] sm:$0xff]  ;;  %v4452_v39 = vld [vmem:[#allocation2 + $0x238] sm:$0xff]  ;;  %v4455_v59 = vld [vmem:[#allocation2 + $0x220] sm:$0xff] }
 0x8e5   :  { %2547 = vpow2.f32 %v2319_v20  ;;  %v4458_v20 = vld [vmem:[#allocation2 + $0x230] sm:$0xff]  ;;  %v4461_v21 = vld [vmem:[#allocation2 + $0x268] sm:$0xff] }
 0x8e6   :  { %2549 = vpow2.f32 %v2320_v40  ;;  %v4464_v40 = vld [vmem:[#allocation2 + $0x278] sm:$0xff]  ;;  %v4530_v55 = vld [vmem:[#allocation2 + $0x3b0] sm:$0xff]  ;;  %v4533_v49 = vld [vmem:[#allocation2 + $0x3e8] sm:$0xff] }
 0x8e7   :  { %2551 = vtanh.f32 %v1797_v3  ;;  %v4467_v3 = vld [vmem:[#allocation2 + $0x260] sm:$0xff] }
 0x8ee   :  { %v2546_v41 = vpop.eup %2545 }
 0x8ef   :  { %v2548_v22 = vpop.eup %2547  ;;  %v1802_v63 = vadd.f32 1.0, %v2546_v41  ;;  %v4470_v41 = vld [vmem:[#allocation2 + $0x270] sm:$0xff] }
 0x8f0   :  { %v1808_v15 = vadd.f32 1.0, %v2548_v22  ;;  %v2550_v1 = vpop.eup %2549  ;;  %v4473_v22 = vld [vmem:[#allocation2 + $0x2a8] sm:$0xff] }
 0x8f1   :  { %2553 = vrcp.f32 %v1802_v63  ;;  %v2552_v34 = vpop.eup %2551  ;;  %v1815_v0 = vadd.f32 1.0, %v2550_v1  ;;  %v4476_v63 = vld [vmem:[#allocation2 + $0x2b8] sm:$0xff]  ;;  %v4482_v1 = vld [vmem:[#allocation2 + $0x2b0] sm:$0xff] }
 0x8f2   :  { %2555 = vrcp.f32 %v1808_v15  ;;  %v4479_v15 = vld [vmem:[#allocation2 + $0x2a0] sm:$0xff] }
 0x8f3   :  { %2557 = vrcp.f32 %v1815_v0  ;;  %v4497_v0 = vld [vmem:[#allocation2 + $0x328] sm:$0xff] }
 0x8fb   :  { %v2554_v51 = vpop.eup %2553 }
 0x8fc   :  { %v2556_v57 = vpop.eup %2555  ;;  %v1819_v4 = vmul.f32 %v2554_v51, %v2552_v34  ;;  %v4485_v34 = vld [vmem:[#allocation2 + $0x2e8] sm:$0xff]  ;;  %v4488_v51 = vld [vmem:[#allocation2 + $0x2f8] sm:$0xff] }
 0x8fd   :  { %v1818_v17 = vmul.f32 %v2556_v57, %v4266_v60  ;;  %v2558_v7 = vpop.eup %2557  ;;  %v4376_v60 = vld [vmem:[#allocation2 + $0x70] sm:$0xff]  ;;  %v4491_v57 = vld [vmem:[#allocation2 + $0x2e0] sm:$0xff] }
 0x8ff   :  { %v4364_v2 = vadd.f32 %v1819_v4, %v1818_v17  ;;  %v4494_v4 = vld [vmem:[#allocation2 + $0x2f0] sm:$0xff]  ;;  %v4500_v17 = vld [vmem:[#allocation2 + $0x338] sm:$0xff] }
 0x901   :  { %5441 = vst [vmem:[#allocation62_spill] sm:$0xff] %v4364_v2  ;;  %2559 = vtanh.f32 %v4364_v2  ;;  %v4524_v2 = vld [vmem:[#allocation2 + $0x3b8] sm:$0xff] }
 0x902   :  { %5442 = vst [vmem:[#allocation63_spill] sm:$0xff] %v4524_v2 }
 0x90b   :  { %v2560_v36 = vpop.eup %2559 }
 0x90c   :  { %v1822_v50 = vmul.f32 %v2560_v36, %v2558_v7  ;;  %v4503_v7 = vld [vmem:[#allocation2 + $0x320] sm:$0xff]  ;;  %v4506_v36 = vld [vmem:[#allocation2 + $0x330] sm:$0xff] }
 0x90e   :  { %v1871_v30 = vrot.slane %v1822_v50, 4  ;;  %v4509_v50 = vld [vmem:[#allocation2 + $0x368] sm:$0xff] }
 0x910   :  { %v1874_v29 = vpack.c.bf16 %v1871_v30, %v1871_v30  ;;  %v4512_v30 = vld [vmem:[#allocation2 + $0x378] sm:$0xff] }
 0x912   :  { %v1878_v27 = vrot.slane %v1874_v29, 2  ;;  %v4518_v29 = vld [vmem:[#allocation2 + $0x370] sm:$0xff] }
 0x914   :  { %1913 = vmatprep.mubr.bf16.mxu0 %v1878_v27  ;;  %1954 = vmatprep.mubr.bf16.mxu1 %v1878_v27 }
 0x915   :  { %1914 = vmatmul.mubr.bf16.vlgmr.msra.gmra.mrb[52].mxu0 %v4367_v26  ;;  %1955 = vmatmul.mubr.bf16.vlgmr.msra.gmra.mrb[52].mxu1 %v4367_v26 }
 0x916   :  { %1964 = vmatpush1.bf16.msra.mxu0 %v4273_v18  ;;  %2005 = vmatpush1.bf16.msra.mxu1 %v4276_v44 }
 0x917   :  { %1995 = vmatprep.mubr.bf16.mxu0 %v1878_v27  ;;  %2036 = vmatprep.mubr.bf16.mxu1 %v1878_v27  ;;  %v4521_v27 = vld [vmem:[#allocation2 + $0x3a8] sm:$0xff] }
 0x918   :  { %1965 = vmatprep.subr.bf16.mxu0 %v4279_v33  ;;  %2006 = vmatprep.subr.bf16.mxu1 %v4282_v9 }
 0x91a   :  { %1966 = vmatpush1.bf16.msra.mxu0 %v4285_v13  ;;  %2007 = vmatpush1.bf16.msra.mxu1 %v4376_v60 }
 0x91b   :  { %1967 = vmatprep.subr.bf16.mxu0 %v4289_v52  ;;  %2008 = vmatprep.subr.bf16.mxu1 %v4380_v31 }
 0x91e   :  { %1968 = vmatpush1.bf16.msra.mxu0 %v4383_v32  ;;  %2009 = vmatpush1.bf16.msra.mxu1 %v4386_v24 }
 0x91f   :  { %1969 = vmatprep.subr.bf16.mxu0 %v4389_v25  ;;  %2010 = vmatprep.subr.bf16.mxu1 %v4392_v46 }
 0x922   :  { %1970 = vmatpush1.bf16.msra.mxu0 %v4395_v45  ;;  %2011 = vmatpush1.bf16.msra.mxu1 %v4398_v48 }
 0x923   :  { %1971 = vmatprep.subr.bf16.mxu0 %v4401_v35  ;;  %2012 = vmatprep.subr.bf16.mxu1 %v4404_v37 }
 0x926   :  { %1972 = vmatpush1.bf16.msra.mxu0 %v4407_v23  ;;  %2013 = vmatpush1.bf16.msra.mxu1 %v4410_v53 }
 0x927   :  { %1973 = vmatprep.subr.bf16.mxu0 %v4413_v10  ;;  %2014 = vmatprep.subr.bf16.mxu1 %v4416_v11 }
 0x92a   :  { %1974 = vmatpush1.bf16.msra.mxu0 %v4419_v56  ;;  %2015 = vmatpush1.bf16.msra.mxu1 %v4422_v12 }
 0x92b   :  { %1975 = vmatprep.subr.bf16.mxu0 %v4425_v38  ;;  %2016 = vmatprep.subr.bf16.mxu1 %v4428_v43 }
 0x92e   :  { %1976 = vmatpush1.bf16.msra.mxu0 %v4431_v62  ;;  %2017 = vmatpush1.bf16.msra.mxu1 %v4434_v47 }
 0x92f   :  { %1977 = vmatprep.subr.bf16.mxu0 %v4437_v14  ;;  %2018 = vmatprep.subr.bf16.mxu1 %v4440_v19 }
 0x932   :  { %1978 = vmatpush1.bf16.msra.mxu0 %v4443_v42  ;;  %2019 = vmatpush1.bf16.msra.mxu1 %v4446_v58 }
 0x933   :  { %1979 = vmatprep.subr.bf16.mxu0 %v4449_v16  ;;  %2020 = vmatprep.subr.bf16.mxu1 %v4452_v39 }
 0x936   :  { %1980 = vmatpush1.bf16.msra.mxu0 %v4455_v59  ;;  %2021 = vmatpush1.bf16.msra.mxu1 %v4458_v20 }
 0x937   :  { %1981 = vmatprep.subr.bf16.mxu0 %v4461_v21  ;;  %2022 = vmatprep.subr.bf16.mxu1 %v4464_v40 }
 0x93a   :  { %1982 = vmatpush1.bf16.msra.mxu0 %v4467_v3  ;;  %2023 = vmatpush1.bf16.msra.mxu1 %v4470_v41 }
 0x93b   :  { %1983 = vmatprep.subr.bf16.mxu0 %v4473_v22  ;;  %2024 = vmatprep.subr.bf16.mxu1 %v4476_v63 }
 0x93e   :  { %1984 = vmatpush1.bf16.msra.mxu0 %v4479_v15  ;;  %2025 = vmatpush1.bf16.msra.mxu1 %v4482_v1 }
 0x93f   :  { %1985 = vmatprep.subr.bf16.mxu0 %v4485_v34  ;;  %2026 = vmatprep.subr.bf16.mxu1 %v4488_v51 }
 0x942   :  { %1986 = vmatpush1.bf16.msra.mxu0 %v4491_v57  ;;  %2027 = vmatpush1.bf16.msra.mxu1 %v4494_v4 }
 0x943   :  { %1987 = vmatprep.subr.bf16.mxu0 %v4497_v0  ;;  %2028 = vmatprep.subr.bf16.mxu1 %v4500_v17 }
 0x946   :  { %1988 = vmatpush1.bf16.msra.mxu0 %v4503_v7  ;;  %2029 = vmatpush1.bf16.msra.mxu1 %v4506_v36 }
 0x947   :  { %1989 = vmatprep.subr.bf16.mxu0 %v4509_v50  ;;  %2030 = vmatprep.subr.bf16.mxu1 %v4512_v30 }
 0x94a   :  { %1990 = vmatpush1.bf16.msra.mxu0 %v4515_v28  ;;  %2031 = vmatpush1.bf16.msra.mxu1 %v4518_v29 }
 0x94b   :  { %1991 = vmatprep.subr.bf16.mxu0 %v4521_v27  ;;  %2032 = vmatprep.subr.bf16.mxu1 %v4524_v2  ;;  %v4542_v2 = vld [vmem:[#allocation2 + $0x3f0] sm:$0xff] }
 0x94e   :  { %1992 = vmatpush1.bf16.msra.mxu0 %v4527_v54  ;;  %2033 = vmatpush1.bf16.msra.mxu1 %v4530_v55 }
 0x94f   :  { %1993 = vmatprep.subr.bf16.mxu0 %v4533_v49  ;;  %2034 = vmatprep.subr.bf16.mxu1 %v4536_v8 }
 0x952   :  { %1994 = vmatpush1.bf16.msra.mxu0 %v4539_v5  ;;  %2035 = vmatpush1.bf16.msra.mxu1 %v4542_v2 }
 0x953   :  { %2131 = vmatprep.subr.bf16.mxu0 %v4349_v6  ;;  %2172 = vmatprep.subr.bf16.mxu1 %v4352_v61  ;;  %v2074_v6 = vld [vmem:[#allocation3 + $0x28] sm:$0xc0] }
 0x955   :  { %1996 = vmatmul.mubr.bf16.vlgmr.msra.gmra.mrb[56].mxu0 %v4367_v26  ;;  %2037 = vmatmul.mubr.bf16.vlgmr.msra.gmra.mrb[56].mxu1 %v4367_v26 }
 0x956   :  { %2132 = vmatpush1.bf16.msra.mxu0 %v4273_v18  ;;  %2173 = vmatpush1.bf16.msra.mxu1 %v4276_v44  ;;  %v5443_v18 = vld [vmem:[#allocation63_spill] sm:$0xff] }
 0x957   :  { %2133 = vmatprep.subr.bf16.mxu0 %v4279_v33  ;;  %2174 = vmatprep.subr.bf16.mxu1 %v4282_v9  ;;  %v2073_v33 = vld [vmem:[#allocation3 + $0x20] sm:$0xc0] }
 0x95a   :  { %2134 = vmatpush1.bf16.msra.mxu0 %v4285_v13  ;;  %2175 = vmatpush1.bf16.msra.mxu1 %v4376_v60 }
 0x95b   :  { %2135 = vmatprep.subr.bf16.mxu0 %v4289_v52  ;;  %2176 = vmatprep.subr.bf16.mxu1 %v4380_v31 }
 0x95e   :  { %2136 = vmatpush1.bf16.msra.mxu0 %v4383_v32  ;;  %2177 = vmatpush1.bf16.msra.mxu1 %v4386_v24 }
 0x95f   :  { %2137 = vmatprep.subr.bf16.mxu0 %v4389_v25  ;;  %2178 = vmatprep.subr.bf16.mxu1 %v4392_v46 }
 0x962   :  { %2138 = vmatpush1.bf16.msra.mxu0 %v4395_v45  ;;  %2179 = vmatpush1.bf16.msra.mxu1 %v4398_v48  ;;  %v2075_v45 = vld [vmem:[#allocation3 + $0x30] sm:$0xc0] }
 0x963   :  { %2139 = vmatprep.subr.bf16.mxu0 %v4401_v35  ;;  %2180 = vmatprep.subr.bf16.mxu1 %v4404_v37 }
 0x966   :  { %2140 = vmatpush1.bf16.msra.mxu0 %v4407_v23  ;;  %2181 = vmatpush1.bf16.msra.mxu1 %v4410_v53 }
 0x967   :  { %2141 = vmatprep.subr.bf16.mxu0 %v4413_v10  ;;  %2182 = vmatprep.subr.bf16.mxu1 %v4416_v11 }
 0x96a   :  { %2142 = vmatpush1.bf16.msra.mxu0 %v4419_v56  ;;  %2183 = vmatpush1.bf16.msra.mxu1 %v4422_v12 }
 0x96b   :  { %2143 = vmatprep.subr.bf16.mxu0 %v4425_v38  ;;  %2184 = vmatprep.subr.bf16.mxu1 %v4428_v43  ;;  %v5444_v38 = vld [vmem:[#allocation60_spill] sm:$0xff] }
 0x96c   :  { %v2113_v43 = vrot.slane %v5444_v38, 6 }
 0x96e   :  { %2144 = vmatpush1.bf16.msra.mxu0 %v4431_v62  ;;  %2185 = vmatpush1.bf16.msra.mxu1 %v4434_v47 }
 0x96f   :  { %2145 = vmatprep.subr.bf16.mxu0 %v4437_v14  ;;  %2186 = vmatprep.subr.bf16.mxu1 %v4440_v19 }
 0x972   :  { %2146 = vmatpush1.bf16.msra.mxu0 %v4443_v42  ;;  %2187 = vmatpush1.bf16.msra.mxu1 %v4446_v58 }
 0x973   :  { %2147 = vmatprep.subr.bf16.mxu0 %v4449_v16  ;;  %2188 = vmatprep.subr.bf16.mxu1 %v4452_v39 }
 0x976   :  { %2148 = vmatpush1.bf16.msra.mxu0 %v4455_v59  ;;  %2189 = vmatpush1.bf16.msra.mxu1 %v4458_v20 }
 0x977   :  { %2149 = vmatprep.subr.bf16.mxu0 %v4461_v21  ;;  %2190 = vmatprep.subr.bf16.mxu1 %v4464_v40  ;;  %v5445_v21 = vld [vmem:[#allocation9_spill] sm:$0xff] }
 0x97a   :  { %2150 = vmatpush1.bf16.msra.mxu0 %v4467_v3  ;;  %2191 = vmatpush1.bf16.msra.mxu1 %v4470_v41 }
 0x97b   :  { %2151 = vmatprep.subr.bf16.mxu0 %v4473_v22  ;;  %2192 = vmatprep.subr.bf16.mxu1 %v4476_v63  ;;  %v5446_v22 = vld [vmem:[#allocation10_spill] sm:$0xff] }
 0x97e   :  { %2152 = vmatpush1.bf16.msra.mxu0 %v4479_v15  ;;  %2193 = vmatpush1.bf16.msra.mxu1 %v4482_v1 }
 0x97f   :  { %2153 = vmatprep.subr.bf16.mxu0 %v4485_v34  ;;  %2194 = vmatprep.subr.bf16.mxu1 %v4488_v51 }
 0x982   :  { %2154 = vmatpush1.bf16.msra.mxu0 %v4491_v57  ;;  %2195 = vmatpush1.bf16.msra.mxu1 %v4494_v4 }
 0x983   :  { %2155 = vmatprep.subr.bf16.mxu0 %v4497_v0  ;;  %2196 = vmatprep.subr.bf16.mxu1 %v4500_v17  ;;  %v5447_v0 = vld [vmem:[#allocation12_spill] sm:$0xff] }
 0x986   :  { %2156 = vmatpush1.bf16.msra.mxu0 %v4503_v7  ;;  %2197 = vmatpush1.bf16.msra.mxu1 %v4506_v36  ;;  %v5448_v36 = vld [vmem:[#allocation11_spill] sm:$0xff] }
 0x987   :  { %2157 = vmatprep.subr.bf16.mxu0 %v4509_v50  ;;  %2198 = vmatprep.subr.bf16.mxu1 %v4512_v30 }
 0x98a   :  { %2158 = vmatpush1.bf16.msra.mxu0 %v4515_v28  ;;  %2199 = vmatpush1.bf16.msra.mxu1 %v4518_v29 }
 0x98b   :  { %2159 = vmatprep.subr.bf16.mxu0 %v4521_v27  ;;  %2200 = vmatprep.subr.bf16.mxu1 %v5443_v18 }
 0x98e   :  { %2160 = vmatpush1.bf16.msra.mxu0 %v4527_v54  ;;  %2201 = vmatpush1.bf16.msra.mxu1 %v4530_v55 }
 0x98f   :  { %2161 = vmatprep.subr.bf16.mxu0 %v4533_v49  ;;  %2202 = vmatprep.subr.bf16.mxu1 %v4536_v8 }
 0x992   :  { %2162 = vmatpush1.bf16.msra.mxu0 %v4539_v5  ;;  %2203 = vmatpush1.bf16.msra.mxu1 %v4542_v2  ;;  %v2076_v5 = vld [vmem:[#allocation3 + $0x38] sm:$0xc0] }
 0x9e8   :  { %v1915_v44 = vpop.f32.mrb[52].mxu0  ;;  %v1956_v9 = vpop.f32.mrb[52].mxu1 }
 0x9e9   :  { %v2081_v13 = vrot.slane %v1915_v44, 2  ;;  %v1917_v52 = vpop.f32.mrb[53].mxu0  ;;  %v1958_v61 = vpop.f32.mrb[53].mxu1  ;;  %v2083_v46 = vrot.slane %v1956_v9, 2 }
 0x9ea   :  { %v2082_v26 = vrot.slane %v1917_v52, 2  ;;  %v1919_v60 = vpop.f32.mrb[54].mxu0  ;;  %v1960_v54 = vpop.f32.mrb[54].mxu1  ;;  %v2084_v25 = vrot.slane %v1958_v61, 2 }
 0x9eb   :  { %v2089_v31 = vadd.f32 %v2081_v13, %v2073_v33  ;;  %v1920_v55 = vpop.f32.mrb[55].mxu0  ;;  %v1961_v32 = vpop.f32.mrb[55].mxu1  ;;  %v2091_v35 = vadd.f32 %v2083_v46, %v2075_v45 }
 0x9ec   :  { %v2090_v49 = vadd.f32 %v2082_v26, %v2074_v6  ;;  %v2092_v2 = vadd.f32 %v2084_v25, %v2076_v5  ;;  %v5449_v6 = vld [vmem:[#allocation62_spill] sm:$0xff] }
 0x9ed   :  { %v2327_v24 = vmul.f32 -1.442695, %v2089_v31 }
 0x9ee   :  { %v2328_v8 = vmul.f32 -1.442695, %v2090_v49  ;;  %v2329_v48 = vmul.f32 -1.442695, %v2092_v2 }
 0x9ef   :  { %2561 = vpow2.f32 %v2327_v24 }
 0x9f0   :  { %2563 = vpow2.f32 %v2328_v8 }
 0x9f1   :  { %2565 = vpow2.f32 %v2329_v48 }
 0x9f2   :  { %2567 = vtanh.f32 %v2091_v35 }
 0x9f9   :  { %v2562_v37 = vpop.eup %2561 }
 0x9fa   :  { %v2564_v23 = vpop.eup %2563  ;;  %v2096_v53 = vadd.f32 1.0, %v2562_v37 }
 0x9fb   :  { %v2102_v10 = vadd.f32 1.0, %v2564_v23  ;;  %v2566_v11 = vpop.eup %2565 }
 0x9fc   :  { %2569 = vrcp.f32 %v2096_v53  ;;  %v2568_v56 = vpop.eup %2567  ;;  %v2109_v14 = vadd.f32 1.0, %v2566_v11 }
 0x9fd   :  { %2571 = vrcp.f32 %v2102_v10 }
 0x9fe   :  { %2573 = vrcp.f32 %v2109_v14 }
 0xa06   :  { %v2570_v12 = vpop.eup %2569 }
 0xa07   :  { %v2572_v62 = vpop.eup %2571  ;;  %v2116_v47 = vmul.f32 %v2570_v12, %v2568_v56 }
 0xa08   :  { %v2115_v19 = vmul.f32 %v2572_v62, %v2113_v43  ;;  %v2574_v58 = vpop.eup %2573 }
 0xa0a   :  { %v2117_v42 = vadd.f32 %v2116_v47, %v2115_v19 }
 0xa0c   :  { %2575 = vtanh.f32 %v2117_v42 }
 0xa16   :  { %v2576_v16 = vpop.eup %2575 }
 0xa17   :  { %v2119_v39 = vmul.f32 %v2576_v16, %v2574_v58 }
 0xa19   :  { %v2123_v32 = vpack.c.bf16 %v2119_v39, %v2119_v39 }
 0xa1b   :  { %v2127_v8 = vrot.slane %v2123_v32, 3 }
 0xa28   :  { %v1997_v59 = vpop.f32.mrb[56].mxu0  ;;  %v2038_v20 = vpop.f32.mrb[56].mxu1 }
 0xa29   :  { %v2045_v40 = vadd.f32 %v1997_v59, %v5445_v21  ;;  %v1999_v3 = vpop.f32.mrb[57].mxu0  ;;  %v2040_v41 = vpop.f32.mrb[57].mxu1  ;;  %v2047_v50 = vadd.f32 %v2038_v20, %v5448_v36 }
 0xa2a   :  { %v2046_v63 = vadd.f32 %v1999_v3, %v5446_v22  ;;  %v2001_v15 = vpop.f32.mrb[58].mxu0  ;;  %v2042_v1 = vpop.f32.mrb[58].mxu1  ;;  %v2048_v17 = vadd.f32 %v2040_v41, %v5447_v0  ;;  %v2333_v41 = vld [vmem:[%s4632_s5] ss:$0 sm:$0xff] }
 0xa2b   :  { %v2324_v34 = vmul.f32 -1.442695, %v2045_v40  ;;  %v2002_v51 = vpop.f32.mrb[59].mxu0  ;;  %v2043_v57 = vpop.f32.mrb[59].mxu1  ;;  %v2334_v1 = vld [vmem:[#allocation5] ss:$0 sm:$0xff] }
 0xa2c   :  { %v2325_v4 = vmul.f32 -1.442695, %v2046_v63  ;;  %v2326_v7 = vmul.f32 -1.442695, %v2048_v17 }
 0xa2d   :  { %2577 = vpow2.f32 %v2324_v34 }
 0xa2e   :  { %2579 = vpow2.f32 %v2325_v4 }
 0xa2f   :  { %2581 = vpow2.f32 %v2326_v7 }
 0xa30   :  { %2583 = vtanh.f32 %v2047_v50 }
 0xa37   :  { %v2578_v30 = vpop.eup %2577 }
 0xa38   :  { %v2580_v28 = vpop.eup %2579  ;;  %v2052_v29 = vadd.f32 1.0, %v2578_v30 }
 0xa39   :  { %v2058_v27 = vadd.f32 1.0, %v2580_v28  ;;  %v2582_v18 = vpop.eup %2581 }
 0xa3a   :  { %2585 = vrcp.f32 %v2052_v29  ;;  %v2584_v44 = vpop.eup %2583  ;;  %v2065_v52 = vadd.f32 1.0, %v2582_v18 }
 0xa3b   :  { %2587 = vrcp.f32 %v2058_v27 }
 0xa3c   :  { %2589 = vrcp.f32 %v2065_v52 }
 0xa44   :  { %v2586_v33 = vpop.eup %2585 }
 0xa45   :  { %v2588_v9 = vpop.eup %2587  ;;  %v2069_v13 = vmul.f32 %v2586_v33, %v2584_v44 }
 0xa46   :  { %v2068_v61 = vmul.f32 %v2588_v9, %v5449_v6  ;;  %v2590_v60 = vpop.eup %2589 }
 0xa48   :  { %v2070_v26 = vadd.f32 %v2069_v13, %v2068_v61 }
 0xa4a   :  { %2591 = vtanh.f32 %v2070_v26 }
 0xa54   :  { %v2592_v54 = vpop.eup %2591 }
 0xa55   :  { %v2072_v31 = vmul.f32 %v2592_v54, %v2590_v60 }
 0xa57   :  { %v2121_v55 = vrot.slane %v2072_v31, 2 }
 0xa59   :  { %v2124_v49 = vpack.c.bf16 %v2121_v55, %v2121_v55 }
 0xa5b   :  { %v2128_v24 = vrot.slane %v2124_v49, 3 }
 0xa5d   :  { %2163 = vmatprep.mubr.bf16.mxu0 %v2128_v24  ;;  %2204 = vmatprep.mubr.bf16.mxu1 %v2128_v24 }
 0xa5e   :  { %2164 = vmatmul.mubr.bf16.vlgmr.msra.gmra.mrb[60].mxu0 %v2127_v8  ;;  %2205 = vmatmul.mubr.bf16.vlgmr.msra.gmra.mrb[60].mxu1 %v2127_v8 }
 0xb31   :  { %v2165_v25 = vpop.f32.mrb[60].mxu0  ;;  %v2206_v5 = vpop.f32.mrb[60].mxu1 }
 0xb32   :  { %v2213_v2 = vadd.f32 %v2165_v25, %v5445_v21  ;;  %v2167_v46 = vpop.f32.mrb[61].mxu0  ;;  %v2208_v45 = vpop.f32.mrb[61].mxu1  ;;  %v2215_v38 = vadd.f32 %v2206_v5, %v5448_v36 }
 0xb33   :  { %v2214_v48 = vadd.f32 %v2167_v46, %v5446_v22  ;;  %v2169_v35 = vpop.f32.mrb[62].mxu0  ;;  %v2210_v37 = vpop.f32.mrb[62].mxu1  ;;  %v2216_v56 = vadd.f32 %v2208_v45, %v5447_v0 }
 0xb34   :  { %v2330_v23 = vmul.f32 -1.442695, %v2213_v2  ;;  %v2170_v53 = vpop.f32.mrb[63].mxu0  ;;  %v2211_v10 = vpop.f32.mrb[63].mxu1 }
 0xb35   :  { %v2331_v11 = vmul.f32 -1.442695, %v2214_v48  ;;  %v2332_v12 = vmul.f32 -1.442695, %v2216_v56 }
 0xb36   :  { %2593 = vpow2.f32 %v2330_v23 }
 0xb37   :  { %2595 = vpow2.f32 %v2331_v11 }
 0xb38   :  { %2597 = vpow2.f32 %v2332_v12 }
 0xb39   :  { %2599 = vtanh.f32 %v2215_v38 }
 0xb40   :  { %v2594_v43 = vpop.eup %2593 }
 0xb41   :  { %v2596_v62 = vpop.eup %2595  ;;  %v2220_v47 = vadd.f32 1.0, %v2594_v43 }
 0xb42   :  { %v2226_v14 = vadd.f32 1.0, %v2596_v62  ;;  %v2598_v19 = vpop.eup %2597 }
 0xb43   :  { %2601 = vrcp.f32 %v2220_v47  ;;  %v2600_v42 = vpop.eup %2599  ;;  %v2233_v59 = vadd.f32 1.0, %v2598_v19 }
 0xb44   :  { %2603 = vrcp.f32 %v2226_v14 }
 0xb45   :  { %2605 = vrcp.f32 %v2233_v59 }
 0xb4d   :  { %v2602_v58 = vpop.eup %2601 }
 0xb4e   :  { %v2604_v16 = vpop.eup %2603  ;;  %v2237_v39 = vmul.f32 %v2602_v58, %v2600_v42 }
 0xb4f   :  { %v2236_v20 = vmul.f32 %v2604_v16, %v2070_v26  ;;  %v2606_v40 = vpop.eup %2605 }
 0xb51   :  { %v2238_v21 = vadd.f32 %v2237_v39, %v2236_v20 }
 0xb53   :  { %2607 = vtanh.f32 %v2238_v21 }
 0xb5d   :  { %v2608_v3 = vpop.eup %2607 }
 0xb5e   :  { %v2240_v22 = vmul.f32 %v2608_v3, %v2606_v40 }
 0xb60   :  { %v2248_v63 = vmul.f32 %v2333_v41, %v2240_v22 }
 0xb62   :  { %v2250_v15 = vsel %vm2249_vm2, %v2248_v63, 0.0 }
 0xb63   :  { %2251 = vadd.xlane.f32.xlu0 %v2250_v15 }
 0xbf0   :  { %v2252_v34 = vpop.xlane.xlu0 %2251 }
 0xbf1   :  { %v2260_v51 = vadd.f32 %v2334_v1, %v2252_v34 }
 0xbf3   :  { %v2261_v57 = vmax.f32 %v2260_v51, 0.0 }
 0xbf5   :  { %2263 = vst.msk [vmem:[%s4634_s7] sm:$0x3] %vm2262_vm3, %v2261_v57 }
 0xbf6   :  { %2268 = vsyncmov [#allocation4] }
 0xbf9   :  { %s2269_s27 = vpop.sfrf %2268 }
 0xbfa   :  { %p2335_p0 = scmp.ne.s32.totalorder %s2269_s27, 0 }
 0xbfc   :  { %2273 = shalt.err (%p2335_p0)  }

</bundles_post_ra>
